<compile_context>
chip_gen: v7x
topology: tpu7x:2x2x1
jax: 0.10.0
libtpu: 0.0.40
codegen_flags: <defaults>
</compile_context>

<pallas_src>
import functools

import jax
import jax.numpy as jnp
from jax.experimental import pallas as pl
from jax.experimental.pallas import tpu as pltpu


def _round_up(x, m):
    return ((x + m - 1) // m) * m


def _pick_tile(n, candidates):
    for c in candidates:
        if n % c == 0:
            return c
    return n


def _pick_row_tile(mp, candidates, min_split_tile):
    """Largest divisor tile; prefer >=2 blocks (dual-TC chips) if tile stays big."""
    tm = _pick_tile(mp, candidates)
    if mp // tm < 2:
        for c in candidates:
            if c >= min_split_tile and mp % c == 0 and mp // c >= 2:
                return c
    return tm


# ----------------------------- Pallas kernels ------------------------------

def _mm_stats_kernel(a_ref, b_ref, sa_ref, ba_ref,
                     y_ref, sum_ref, sq_ref, acc_ref,
                     *, apply_in_affine_relu, row_limit):
    """Tiled bf16 matmul, f32 accumulation, fused per-channel sum/sumsq stats.

    Optional prologue: a <- relu(a * sa + ba) (per-K-channel affine), used to
    fuse the previous layer's BatchNorm+ReLU into this matmul's A read.
    """
    k = pl.program_id(2)

    @pl.when(k == 0)
    def _():
        acc_ref[...] = jnp.zeros_like(acc_ref)

    a = a_ref[...]
    if apply_in_affine_relu:
        a32 = a.astype(jnp.float32)
        a32 = jnp.maximum(a32 * sa_ref[...] + ba_ref[...], 0.0)
        if row_limit is not None:
            tm = a_ref.shape[0]
            rows = pl.program_id(0) * tm + jax.lax.broadcasted_iota(
                jnp.int32, a32.shape, 0)
            a32 = jnp.where(rows < row_limit, a32, 0.0)
        a = a32.astype(jnp.bfloat16)

    acc_ref[...] += jnp.dot(a, b_ref[...], preferred_element_type=jnp.float32)

    @pl.when(k == pl.num_programs(2) - 1)
    def _():
        y = acc_ref[...]
        y_ref[...] = y.astype(y_ref.dtype)
        s = jnp.sum(y, axis=0, keepdims=True)          # (1, tn) per-block sum
        sq = jnp.sum(y * y, axis=0, keepdims=True)     # (1, tn) per-block sumsq
        sum_ref[...] = jnp.broadcast_to(s, sum_ref.shape)
        sq_ref[...] = jnp.broadcast_to(sq, sq_ref.shape)


def _bn_relu_kernel(y_ref, s_ref, b_ref, o_ref):
    y = y_ref[...].astype(jnp.float32)
    o_ref[...] = jnp.maximum(y * s_ref[...] + b_ref[...], 0.0).astype(o_ref.dtype)


def _bn_add_bn_relu_kernel(y_ref, s_ref, b_ref, r_ref, rs_ref, rb_ref, o_ref):
    main = y_ref[...].astype(jnp.float32) * s_ref[...] + b_ref[...]
    res = r_ref[...].astype(jnp.float32) * rs_ref[...] + rb_ref[...]
    o_ref[...] = jnp.maximum(main + res, 0.0)


# ------------------------------ Pallas wrappers -----------------------------

def matmul_stats(a, b, in_scale=None, in_bias=None):
    """a: [M, K] bf16, b: [K, N] bf16 (K, N multiples of 128, pre-padded).

    Returns (y_bf16[M, N], col_sum_f32[N], col_sumsq_f32[N]); the sums are
    per-output-channel statistics of the f32 matmul result (for fused BN).
    Optional in_scale/in_bias [K] apply relu(a*s + b) to A inside the kernel.
    """
    M, K = a.shape
    Kb, N = b.shape
    assert K == Kb and K % 128 == 0 and N % 128 == 0
    Mp = _round_up(M, 8)
    if Mp != M:
        a = jnp.pad(a, ((0, Mp - M), (0, 0)))

    tm = _pick_row_tile(Mp, (512, 256, 128, 64, 32, 16, 8), 256)
    tn = _pick_tile(N, (256, 128))
    tk = _pick_tile(K, (512, 256, 128))
    nm, nn, nk = Mp // tm, N // tn, K // tk

    apply_aff = in_scale is not None
    if apply_aff:
        sa = in_scale.reshape(1, K).astype(jnp.float32)
        ba = in_bias.reshape(1, K).astype(jnp.float32)
    else:
        sa = jnp.ones((1, K), jnp.float32)
        ba = jnp.zeros((1, K), jnp.float32)

    kernel = functools.partial(
        _mm_stats_kernel,
        apply_in_affine_relu=apply_aff,
        row_limit=(M if (apply_aff and Mp != M) else None))

    y, ssum, ssq = pl.pallas_call(
        kernel,
        out_shape=(jax.ShapeDtypeStruct((Mp, N), jnp.bfloat16),
                   jax.ShapeDtypeStruct((nm * 8, N), jnp.float32),
                   jax.ShapeDtypeStruct((nm * 8, N), jnp.float32)),
        grid=(nm, nn, nk),
        in_specs=[
            pl.BlockSpec((tm, tk), lambda i, j, k: (i, k)),
            pl.BlockSpec((tk, tn), lambda i, j, k: (k, j)),
            pl.BlockSpec((1, tk), lambda i, j, k: (0, k)),
            pl.BlockSpec((1, tk), lambda i, j, k: (0, k)),
        ],
        out_specs=(
            pl.BlockSpec((tm, tn), lambda i, j, k: (i, j)),
            pl.BlockSpec((8, tn), lambda i, j, k: (i, j)),
            pl.BlockSpec((8, tn), lambda i, j, k: (i, j)),
        ),
        scratch_shapes=[pltpu.VMEM((tm, tn), jnp.float32)],
        compiler_params=pltpu.CompilerParams(
            dimension_semantics=("parallel", "parallel", "arbitrary")),
    )(a, b, sa, ba)

    # per-M-block partial stats -> reduce over blocks in tiny JAX glue
    col_sum = ssum.reshape(nm, 8, N)[:, 0, :].sum(axis=0)
    col_sq = ssq.reshape(nm, 8, N)[:, 0, :].sum(axis=0)
    return y[:M], col_sum, col_sq


def bn_relu(y, scale, bias):
    """relu(y*scale + bias); y: [M, C] bf16, scale/bias: [C] f32 -> bf16."""
    M, C = y.shape
    assert C % 128 == 0
    Mp = _round_up(M, 8)
    if Mp != M:
        y = jnp.pad(y, ((0, Mp - M), (0, 0)))
    tm = _pick_row_tile(Mp, (1024, 512, 256, 128, 64, 32, 16, 8), 512)
    out = pl.pallas_call(
        _bn_relu_kernel,
        out_shape=jax.ShapeDtypeStruct((Mp, C), jnp.bfloat16),
        grid=(Mp // tm,),
        in_specs=[
            pl.BlockSpec((tm, C), lambda i: (i, 0)),
            pl.BlockSpec((1, C), lambda i: (0, 0)),
            pl.BlockSpec((1, C), lambda i: (0, 0)),
        ],
        out_specs=pl.BlockSpec((tm, C), lambda i: (i, 0)),
        compiler_params=pltpu.CompilerParams(dimension_semantics=("parallel",)),
    )(y, scale.reshape(1, C).astype(jnp.float32),
      bias.reshape(1, C).astype(jnp.float32))
    return out[:M]


def bn_add_bn_relu(y, s, b, r, rs, rb):
    """relu((y*s + b) + (r*rs + rb)); y, r: [M, C] bf16; affines [C] f32."""
    M, C = y.shape
    assert C % 128 == 0 and r.shape == (M, C)
    Mp = _round_up(M, 8)
    if Mp != M:
        y = jnp.pad(y, ((0, Mp - M), (0, 0)))
        r = jnp.pad(r, ((0, Mp - M), (0, 0)))
    tm = _pick_row_tile(Mp, (1024, 512, 256, 128, 64, 32, 16, 8), 512)
    vec = lambda v: v.reshape(1, C).astype(jnp.float32)
    out = pl.pallas_call(
        _bn_add_bn_relu_kernel,
        out_shape=jax.ShapeDtypeStruct((Mp, C), jnp.float32),
        grid=(Mp // tm,),
        in_specs=[
            pl.BlockSpec((tm, C), lambda i: (i, 0)),
            pl.BlockSpec((1, C), lambda i: (0, 0)),
            pl.BlockSpec((1, C), lambda i: (0, 0)),
            pl.BlockSpec((tm, C), lambda i: (i, 0)),
            pl.BlockSpec((1, C), lambda i: (0, 0)),
            pl.BlockSpec((1, C), lambda i: (0, 0)),
        ],
        out_specs=pl.BlockSpec((tm, C), lambda i: (i, 0)),
        compiler_params=pltpu.CompilerParams(dimension_semantics=("parallel",)),
    )(y, vec(s), vec(b), r, vec(rs), vec(rb))
    return out[:M]


# ------------------------------- JAX glue -----------------------------------

def bn_affine_from_stats(col_sum, col_sq, rows, gamma, beta, eps=1e-5):
    """Training-mode BatchNorm folded to per-channel (scale, bias) from fused stats."""
    mean = col_sum / rows
    var = jnp.maximum(col_sq / rows - mean * mean, 0.0)  # biased batch variance
    scale = gamma * jax.lax.rsqrt(var + eps)
    bias = beta - mean * scale
    return scale, bias


def im2col_3x3(x, stride):
    """x: NHWC (bf16). 3x3 conv, pad=1, given stride -> ([N,Ho,Wo,9*C], Ho, Wo)."""
    N, H, W, C = x.shape
    xp = jnp.pad(x, ((0, 0), (1, 1), (1, 1), (0, 0)))
    Ho = (H + 2 - 3) // stride + 1
    Wo = (W + 2 - 3) // stride + 1
    cols = []
    for kh in range(3):
        for kw in range(3):
            cols.append(
                xp[:, kh:kh + stride * (Ho - 1) + 1:stride,
                      kw:kw + stride * (Wo - 1) + 1:stride, :])
    return jnp.concatenate(cols, axis=-1), Ho, Wo


def bottleneck_forward(x_nchw, params, *, stride, exp_planes):
    x = jnp.transpose(x_nchw, (0, 2, 3, 1)).astype(jnp.float32)   # NHWC
    N, H, W, Cin = x.shape
    Cin_p, Cmid_p = params["w1"].shape
    Cout_p = params["w3"].shape[1]

    # Pad input channels once; all later activations stay channel-padded bf16.
    xp = jnp.pad(x, ((0, 0), (0, 0), (0, 0), (0, Cin_p - Cin))).astype(jnp.bfloat16)

    # --- conv1 (1x1) with fused BN1 statistics ---
    M1 = N * H * W
    y1, sum1, sq1 = matmul_stats(xp.reshape(M1, Cin_p), params["w1"])
    s1, b1 = bn_affine_from_stats(sum1, sq1, M1, params["g1"], params["be1"])
    o1 = bn_relu(y1, s1, b1).reshape(N, H, W, Cmid_p)     # relu(bn1(conv1))

    # --- conv2 (3x3, stride, pad=1) via im2col on bf16 + fused BN2 stats ---
    # TODO(synk): replace im2col with per-tap accumulating matmuls / in-kernel
    # halo DMA to avoid materializing the 9x activation copy in HBM.
    cols, Ho, Wo = im2col_3x3(o1, stride)
    M2 = N * Ho * Wo
    y2, sum2, sq2 = matmul_stats(cols.reshape(M2, 9 * Cmid_p), params["w2"])
    s2, b2 = bn_affine_from_stats(sum2, sq2, M2, params["g2"], params["be2"])

    # --- conv3 (1x1): relu(bn2(.)) fused into the matmul prologue; BN3 stats fused ---
    y3, sum3, sq3 = matmul_stats(y2, params["w3"], in_scale=s2, in_bias=b2)
    s3, b3 = bn_affine_from_stats(sum3, sq3, M2, params["g3"], params["be3"])

    # --- shortcut ---
    if "w_sc" in params:
        xs = xp[:, ::stride, ::stride, :].reshape(M2, Cin_p)   # 1x1 stride-s conv
        ys, sums, sqs = matmul_stats(xs, params["w_sc"])
        ss, bs = bn_affine_from_stats(sums, sqs, M2, params["g_sc"], params["be_sc"])
    else:
        ys = xp.reshape(M1, Cin_p)                             # identity shortcut
        ss = jnp.ones((Cout_p,), jnp.float32)
        bs = jnp.zeros((Cout_p,), jnp.float32)

    # --- fused: relu(bn3(conv3) + bn_sc(shortcut)) ---
    out = bn_add_bn_relu(y3, s3, b3, ys, ss, bs)
    out = out[:, :exp_planes].reshape(N, Ho, Wo, exp_planes)
    return jnp.transpose(out, (0, 3, 1, 2))                    # back to NCHW


# ---------------------------- parameter handling -----------------------------

def init_params(key, in_planes, planes, stride, expansion=4):
    """Raw f32 parameters, PyTorch-equivalent layout."""
    ks = jax.random.split(key, 12)
    exp_planes = expansion * planes
    p = {
        "w1": 0.1 * jax.random.normal(ks[0], (in_planes, planes), jnp.float32),
        "g1": 1.0 + 0.1 * jax.random.normal(ks[1], (planes,), jnp.float32),
        "be1": 0.1 * jax.random.normal(ks[2], (planes,), jnp.float32),
        "w2": 0.1 * jax.random.normal(ks[3], (3, 3, planes, planes), jnp.float32),
        "g2": 1.0 + 0.1 * jax.random.normal(ks[4], (planes,), jnp.float32),
        "be2": 0.1 * jax.random.normal(ks[5], (planes,), jnp.float32),
        "w3": 0.1 * jax.random.normal(ks[6], (planes, exp_planes), jnp.float32),
        "g3": 1.0 + 0.1 * jax.random.normal(ks[7], (exp_planes,), jnp.float32),
        "be3": 0.1 * jax.random.normal(ks[8], (exp_planes,), jnp.float32),
    }
    if stride != 1 or in_planes != exp_planes:
        p["w_sc"] = 0.1 * jax.random.normal(ks[9], (in_planes, exp_planes), jnp.float32)
        p["g_sc"] = 1.0 + 0.1 * jax.random.normal(ks[10], (exp_planes,), jnp.float32)
        p["be_sc"] = 0.1 * jax.random.normal(ks[11], (exp_planes,), jnp.float32)
    return p


def prepare_params(raw):
    """One-time channel padding (-> multiples of 128) + bf16 cast of weights."""
    in_planes, planes = raw["w1"].shape
    exp_planes = raw["w3"].shape[1]
    Cin_p = _round_up(in_planes, 128)
    Cmid_p = _round_up(planes, 128)
    Cout_p = _round_up(exp_planes, 128)

    def pad2(w, rp, cp):
        return jnp.pad(w, ((0, rp - w.shape[0]),
                           (0, cp - w.shape[1]))).astype(jnp.bfloat16)

    def padv(v, cp):
        return jnp.pad(v, (0, cp - v.shape[0])).astype(jnp.float32)

    w2 = jnp.pad(raw["w2"], ((0, 0), (0, 0),
                             (0, Cmid_p - planes), (0, Cmid_p - planes)))
    p = {
        "w1": pad2(raw["w1"], Cin_p, Cmid_p),
        "g1": padv(raw["g1"], Cmid_p), "be1": padv(raw["be1"], Cmid_p),
        "w2": w2.reshape(9 * Cmid_p, Cmid_p).astype(jnp.bfloat16),
        "g2": padv(raw["g2"], Cmid_p), "be2": padv(raw["be2"], Cmid_p),
        "w3": pad2(raw["w3"], Cmid_p, Cout_p),
        "g3": padv(raw["g3"], Cout_p), "be3": padv(raw["be3"], Cout_p),
    }
    if "w_sc" in raw:
        p["w_sc"] = pad2(raw["w_sc"], Cin_p, Cout_p)
        p["g_sc"] = padv(raw["g_sc"], Cout_p)
        p["be_sc"] = padv(raw["be_sc"], Cout_p)
    return p


if __name__ == "__main__":
    in_planes, planes, stride = 4, 8, 2          # shortcut branch is active
    expansion = 4
    key = jax.random.PRNGKey(0)
    k_x, k_p = jax.random.split(key)

    x = jax.random.normal(k_x, (2, in_planes, 16, 16), jnp.float32)   # NCHW
    raw = init_params(k_p, in_planes, planes, stride, expansion)
    params = prepare_params(raw)

    fwd = jax.jit(functools.partial(
        bottleneck_forward, stride=stride, exp_planes=expansion * planes))
    out = jax.block_until_ready(fwd(x, params))

    assert out.shape == (2, expansion * planes, 8, 8), out.shape
    assert bool(jnp.all(jnp.isfinite(out)))
    assert bool(jnp.all(out >= 0.0))             # final ReLU
    print("KERNEL_OK")
</pallas_src>

<mosaic_0001>
module attributes {stable_mosaic.version = 11 : i64} {
  func.func @_mm_stats_kernel(%arg0: i32, %arg1: i32, %arg2: i32, %arg3: memref<128x128xbf16, #tpu.memory_space<vmem>>, %arg4: memref<128x128xbf16, #tpu.memory_space<vmem>>, %arg5: memref<1x128xf32, #tpu.memory_space<vmem>>, %arg6: memref<1x128xf32, #tpu.memory_space<vmem>>, %arg7: memref<128x128xbf16, #tpu.memory_space<vmem>>, %arg8: memref<8x128xf32, #tpu.memory_space<vmem>>, %arg9: memref<8x128xf32, #tpu.memory_space<vmem>>, %arg10: memref<128x128xf32, #tpu.memory_space<vmem>>) attributes {dimension_semantics = [#tpu.dimension_semantics<parallel>, #tpu.dimension_semantics<parallel>, #tpu.dimension_semantics<arbitrary>], iteration_bounds = array<i64: 1, 1, 1>, scalar_prefetch = 0 : i64, scratch_operands = 1 : i64, tpu.core_type = #tpu.core_type<tc>, window_params = [{transform_indices = @transform_0, window_bounds = array<i64: 128, 128>}, {transform_indices = @transform_1, window_bounds = array<i64: 128, 128>}, {transform_indices = @transform_2, window_bounds = array<i64: 1, 128>}, {transform_indices = @transform_3, window_bounds = array<i64: 1, 128>}, {transform_indices = @transform_4, window_bounds = array<i64: 128, 128>}, {transform_indices = @transform_5, window_bounds = array<i64: 8, 128>}, {transform_indices = @transform_6, window_bounds = array<i64: 8, 128>}]} {
    %c0_i32 = arith.constant 0 : i32
    %0 = arith.cmpi eq, %arg2, %c0_i32 : i32
    %1 = arith.extui %0 : i1 to i32
    %c0_i32_0 = arith.constant 0 : i32
    %2 = arith.cmpi ne, %1, %c0_i32_0 : i32
    scf.if %2 {
      %cst_10 = arith.constant 0.000000e+00 : f32
      %12 = vector.broadcast %cst_10 : f32 to vector<128x128xf32>
      %c0_11 = arith.constant 0 : index
      %c0_12 = arith.constant 0 : index
      %13 = vector.load %arg10[%c0_11, %c0_12] : memref<128x128xf32, #tpu.memory_space<vmem>>, vector<128x128xf32>
      tpu.vector_store %arg10[%c0_11, %c0_12], %12 {strides = array<i32>} : memref<128x128xf32, #tpu.memory_space<vmem>>, vector<128x128xf32>,
    } else {
    }
    %c0 = arith.constant 0 : index
    %c0_1 = arith.constant 0 : index
    %3 = vector.load %arg3[%c0, %c0_1] : memref<128x128xbf16, #tpu.memory_space<vmem>>, vector<128x128xbf16>
    %c0_2 = arith.constant 0 : index
    %c0_3 = arith.constant 0 : index
    %4 = vector.load %arg10[%c0_2, %c0_3] : memref<128x128xf32, #tpu.memory_space<vmem>>, vector<128x128xf32>
    %c0_4 = arith.constant 0 : index
    %c0_5 = arith.constant 0 : index
    %5 = vector.load %arg4[%c0_4, %c0_5] : memref<128x128xbf16, #tpu.memory_space<vmem>>, vector<128x128xbf16>
    %cst = arith.constant dense<0.000000e+00> : vector<128x128xf32>
    %6 = tpu.matmul %3, %5, %cst {dimension_numbers = #tpu.dot_dimension_numbers<[1], [0], [0], [1], [0, 0, 1, 1], [], []>} : vector<128x128xbf16>, vector<128x128xbf16>, vector<128x128xf32> -> vector<128x128xf32>
    %7 = arith.addf %4, %6 : vector<128x128xf32>
    %c0_6 = arith.constant 0 : index
    %c0_7 = arith.constant 0 : index
    %8 = vector.load %arg10[%c0_6, %c0_7] : memref<128x128xf32, #tpu.memory_space<vmem>>, vector<128x128xf32>
    tpu.vector_store %arg10[%c0_6, %c0_7], %7 {strides = array<i32>} : memref<128x128xf32, #tpu.memory_space<vmem>>, vector<128x128xf32>,
    %c0_i32_8 = arith.constant 0 : i32
    %9 = arith.cmpi eq, %arg2, %c0_i32_8 : i32
    %10 = arith.extui %9 : i1 to i32
    %c0_i32_9 = arith.constant 0 : i32
    %11 = arith.cmpi ne, %10, %c0_i32_9 : i32
    scf.if %11 {
      %c0_10 = arith.constant 0 : index
      %c0_11 = arith.constant 0 : index
      %12 = vector.load %arg10[%c0_10, %c0_11] : memref<128x128xf32, #tpu.memory_space<vmem>>, vector<128x128xf32>
      %13 = arith.truncf %12 : vector<128x128xf32> to vector<128x128xbf16>
      %c0_12 = arith.constant 0 : index
      %c0_13 = arith.constant 0 : index
      %14 = vector.load %arg7[%c0_12, %c0_13] : memref<128x128xbf16, #tpu.memory_space<vmem>>, vector<128x128xbf16>
      tpu.vector_store %arg7[%c0_12, %c0_13], %13 {strides = array<i32>} : memref<128x128xbf16, #tpu.memory_space<vmem>>, vector<128x128xbf16>,
      %cst_14 = arith.constant dense<0.000000e+00> : vector<128xf32>
      %15 = vector.multi_reduction <add>, %12, %cst_14 [0] : vector<128x128xf32> to vector<128xf32>
      %16 = vector.shape_cast %15 : vector<128xf32> to vector<1x128xf32>
      %17 = arith.mulf %12, %12 : vector<128x128xf32>
      %cst_15 = arith.constant dense<0.000000e+00> : vector<128xf32>
      %18 = vector.multi_reduction <add>, %17, %cst_15 [0] : vector<128x128xf32> to vector<128xf32>
      %19 = vector.shape_cast %18 : vector<128xf32> to vector<1x128xf32>
      %20 = vector.shape_cast %16 : vector<1x128xf32> to vector<1x128xf32>
      %21 = vector.broadcast %20 : vector<1x128xf32> to vector<8x128xf32>
      %c0_16 = arith.constant 0 : index
      %c0_17 = arith.constant 0 : index
      %22 = vector.load %arg8[%c0_16, %c0_17] : memref<8x128xf32, #tpu.memory_space<vmem>>, vector<8x128xf32>
      tpu.vector_store %arg8[%c0_16, %c0_17], %21 {strides = array<i32>} : memref<8x128xf32, #tpu.memory_space<vmem>>, vector<8x128xf32>,
      %23 = vector.shape_cast %19 : vector<1x128xf32> to vector<1x128xf32>
      %24 = vector.broadcast %23 : vector<1x128xf32> to vector<8x128xf32>
      %c0_18 = arith.constant 0 : index
      %c0_19 = arith.constant 0 : index
      %25 = vector.load %arg9[%c0_18, %c0_19] : memref<8x128xf32, #tpu.memory_space<vmem>>, vector<8x128xf32>
      tpu.vector_store %arg9[%c0_18, %c0_19], %24 {strides = array<i32>} : memref<8x128xf32, #tpu.memory_space<vmem>>, vector<8x128xf32>,
    } else {
    }
    return
  }
  func.func @transform_0(%arg0: i32, %arg1: i32, %arg2: i32) -> (i32, i32) {
    %c0_i32 = arith.constant 0 : i32
    return %arg0, %arg2 : i32, i32
  }
  func.func @transform_1(%arg0: i32, %arg1: i32, %arg2: i32) -> (i32, i32) {
    %c0_i32 = arith.constant 0 : i32
    return %arg2, %arg1 : i32, i32
  }
  func.func @transform_2(%arg0: i32, %arg1: i32, %arg2: i32) -> (i32, i32) {
    %c0_i32 = arith.constant 0 : i32
    %c0_i32_0 = arith.constant 0 : i32
    return %c0_i32, %arg2 : i32, i32
  }
  func.func @transform_3(%arg0: i32, %arg1: i32, %arg2: i32) -> (i32, i32) {
    %c0_i32 = arith.constant 0 : i32
    %c0_i32_0 = arith.constant 0 : i32
    return %c0_i32, %arg2 : i32, i32
  }
  func.func @transform_4(%arg0: i32, %arg1: i32, %arg2: i32) -> (i32, i32) {
    %c0_i32 = arith.constant 0 : i32
    return %arg0, %arg1 : i32, i32
  }
  func.func @transform_5(%arg0: i32, %arg1: i32, %arg2: i32) -> (i32, i32) {
    %c0_i32 = arith.constant 0 : i32
    return %arg0, %arg1 : i32, i32
  }
  func.func @transform_6(%arg0: i32, %arg1: i32, %arg2: i32) -> (i32, i32) {
    %c0_i32 = arith.constant 0 : i32
    return %arg0, %arg1 : i32, i32
  }
}

module attributes {stable_mosaic.version = 11 : i64} {
  func.func @_mm_stats_kernel(%arg0: i32, %arg1: i32, %arg2: i32, %arg3: memref<256x128xbf16, #tpu.memory_space<vmem>>, %arg4: memref<128x128xbf16, #tpu.memory_space<vmem>>, %arg5: memref<1x128xf32, #tpu.memory_space<vmem>>, %arg6: memref<1x128xf32, #tpu.memory_space<vmem>>, %arg7: memref<256x128xbf16, #tpu.memory_space<vmem>>, %arg8: memref<8x128xf32, #tpu.memory_space<vmem>>, %arg9: memref<8x128xf32, #tpu.memory_space<vmem>>, %arg10: memref<256x128xf32, #tpu.memory_space<vmem>>) attributes {dimension_semantics = [#tpu.dimension_semantics<parallel>, #tpu.dimension_semantics<parallel>, #tpu.dimension_semantics<arbitrary>], iteration_bounds = array<i64: 2, 1, 1>, scalar_prefetch = 0 : i64, scratch_operands = 1 : i64, tpu.core_type = #tpu.core_type<tc>, window_params = [{transform_indices = @transform_0, window_bounds = array<i64: 256, 128>}, {transform_indices = @transform_1, window_bounds = array<i64: 128, 128>}, {transform_indices = @transform_2, window_bounds = array<i64: 1, 128>}, {transform_indices = @transform_3, window_bounds = array<i64: 1, 128>}, {transform_indices = @transform_4, window_bounds = array<i64: 256, 128>}, {transform_indices = @transform_5, window_bounds = array<i64: 8, 128>}, {transform_indices = @transform_6, window_bounds = array<i64: 8, 128>}]} {
    %c0_i32 = arith.constant 0 : i32
    %0 = arith.cmpi eq, %arg2, %c0_i32 : i32
    %1 = arith.extui %0 : i1 to i32
    %c0_i32_0 = arith.constant 0 : i32
    %2 = arith.cmpi ne, %1, %c0_i32_0 : i32
    scf.if %2 {
      %cst_10 = arith.constant 0.000000e+00 : f32
      %12 = vector.broadcast %cst_10 : f32 to vector<256x128xf32>
      %c0_11 = arith.constant 0 : index
      %c0_12 = arith.constant 0 : index
      %13 = vector.load %arg10[%c0_11, %c0_12] : memref<256x128xf32, #tpu.memory_space<vmem>>, vector<256x128xf32>
      tpu.vector_store %arg10[%c0_11, %c0_12], %12 {strides = array<i32>} : memref<256x128xf32, #tpu.memory_space<vmem>>, vector<256x128xf32>,
    } else {
    }
    %c0 = arith.constant 0 : index
    %c0_1 = arith.constant 0 : index
    %3 = vector.load %arg3[%c0, %c0_1] : memref<256x128xbf16, #tpu.memory_space<vmem>>, vector<256x128xbf16>
    %c0_2 = arith.constant 0 : index
    %c0_3 = arith.constant 0 : index
    %4 = vector.load %arg10[%c0_2, %c0_3] : memref<256x128xf32, #tpu.memory_space<vmem>>, vector<256x128xf32>
    %c0_4 = arith.constant 0 : index
    %c0_5 = arith.constant 0 : index
    %5 = vector.load %arg4[%c0_4, %c0_5] : memref<128x128xbf16, #tpu.memory_space<vmem>>, vector<128x128xbf16>
    %cst = arith.constant dense<0.000000e+00> : vector<256x128xf32>
    %6 = tpu.matmul %3, %5, %cst {dimension_numbers = #tpu.dot_dimension_numbers<[1], [0], [0], [1], [0, 0, 1, 1], [], []>} : vector<256x128xbf16>, vector<128x128xbf16>, vector<256x128xf32> -> vector<256x128xf32>
    %7 = arith.addf %4, %6 : vector<256x128xf32>
    %c0_6 = arith.constant 0 : index
    %c0_7 = arith.constant 0 : index
    %8 = vector.load %arg10[%c0_6, %c0_7] : memref<256x128xf32, #tpu.memory_space<vmem>>, vector<256x128xf32>
    tpu.vector_store %arg10[%c0_6, %c0_7], %7 {strides = array<i32>} : memref<256x128xf32, #tpu.memory_space<vmem>>, vector<256x128xf32>,
    %c0_i32_8 = arith.constant 0 : i32
    %9 = arith.cmpi eq, %arg2, %c0_i32_8 : i32
    %10 = arith.extui %9 : i1 to i32
    %c0_i32_9 = arith.constant 0 : i32
    %11 = arith.cmpi ne, %10, %c0_i32_9 : i32
    scf.if %11 {
      %c0_10 = arith.constant 0 : index
      %c0_11 = arith.constant 0 : index
      %12 = vector.load %arg10[%c0_10, %c0_11] : memref<256x128xf32, #tpu.memory_space<vmem>>, vector<256x128xf32>
      %13 = arith.truncf %12 : vector<256x128xf32> to vector<256x128xbf16>
      %c0_12 = arith.constant 0 : index
      %c0_13 = arith.constant 0 : index
      %14 = vector.load %arg7[%c0_12, %c0_13] : memref<256x128xbf16, #tpu.memory_space<vmem>>, vector<256x128xbf16>
      tpu.vector_store %arg7[%c0_12, %c0_13], %13 {strides = array<i32>} : memref<256x128xbf16, #tpu.memory_space<vmem>>, vector<256x128xbf16>,
      %cst_14 = arith.constant dense<0.000000e+00> : vector<128xf32>
      %15 = vector.multi_reduction <add>, %12, %cst_14 [0] : vector<256x128xf32> to vector<128xf32>
      %16 = vector.shape_cast %15 : vector<128xf32> to vector<1x128xf32>
      %17 = arith.mulf %12, %12 : vector<256x128xf32>
      %cst_15 = arith.constant dense<0.000000e+00> : vector<128xf32>
      %18 = vector.multi_reduction <add>, %17, %cst_15 [0] : vector<256x128xf32> to vector<128xf32>
      %19 = vector.shape_cast %18 : vector<128xf32> to vector<1x128xf32>
      %20 = vector.shape_cast %16 : vector<1x128xf32> to vector<1x128xf32>
      %21 = vector.broadcast %20 : vector<1x128xf32> to vector<8x128xf32>
      %c0_16 = arith.constant 0 : index
      %c0_17 = arith.constant 0 : index
      %22 = vector.load %arg8[%c0_16, %c0_17] : memref<8x128xf32, #tpu.memory_space<vmem>>, vector<8x128xf32>
      tpu.vector_store %arg8[%c0_16, %c0_17], %21 {strides = array<i32>} : memref<8x128xf32, #tpu.memory_space<vmem>>, vector<8x128xf32>,
      %23 = vector.shape_cast %19 : vector<1x128xf32> to vector<1x128xf32>
      %24 = vector.broadcast %23 : vector<1x128xf32> to vector<8x128xf32>
      %c0_18 = arith.constant 0 : index
      %c0_19 = arith.constant 0 : index
      %25 = vector.load %arg9[%c0_18, %c0_19] : memref<8x128xf32, #tpu.memory_space<vmem>>, vector<8x128xf32>
      tpu.vector_store %arg9[%c0_18, %c0_19], %24 {strides = array<i32>} : memref<8x128xf32, #tpu.memory_space<vmem>>, vector<8x128xf32>,
    } else {
    }
    return
  }
  func.func @transform_0(%arg0: i32, %arg1: i32, %arg2: i32) -> (i32, i32) {
    %c0_i32 = arith.constant 0 : i32
    return %arg0, %arg2 : i32, i32
  }
  func.func @transform_1(%arg0: i32, %arg1: i32, %arg2: i32) -> (i32, i32) {
    %c0_i32 = arith.constant 0 : i32
    return %arg2, %arg1 : i32, i32
  }
  func.func @transform_2(%arg0: i32, %arg1: i32, %arg2: i32) -> (i32, i32) {
    %c0_i32 = arith.constant 0 : i32
    %c0_i32_0 = arith.constant 0 : i32
    return %c0_i32, %arg2 : i32, i32
  }
  func.func @transform_3(%arg0: i32, %arg1: i32, %arg2: i32) -> (i32, i32) {
    %c0_i32 = arith.constant 0 : i32
    %c0_i32_0 = arith.constant 0 : i32
    return %c0_i32, %arg2 : i32, i32
  }
  func.func @transform_4(%arg0: i32, %arg1: i32, %arg2: i32) -> (i32, i32) {
    %c0_i32 = arith.constant 0 : i32
    return %arg0, %arg1 : i32, i32
  }
  func.func @transform_5(%arg0: i32, %arg1: i32, %arg2: i32) -> (i32, i32) {
    %c0_i32 = arith.constant 0 : i32
    return %arg0, %arg1 : i32, i32
  }
  func.func @transform_6(%arg0: i32, %arg1: i32, %arg2: i32) -> (i32, i32) {
    %c0_i32 = arith.constant 0 : i32
    return %arg0, %arg1 : i32, i32
  }
}

module attributes {stable_mosaic.version = 11 : i64} {
  func.func @_bn_relu_kernel(%arg0: i32, %arg1: memref<512x128xbf16, #tpu.memory_space<vmem>>, %arg2: memref<1x128xf32, #tpu.memory_space<vmem>>, %arg3: memref<1x128xf32, #tpu.memory_space<vmem>>, %arg4: memref<512x128xbf16, #tpu.memory_space<vmem>>) attributes {dimension_semantics = [#tpu.dimension_semantics<parallel>], iteration_bounds = array<i64: 1>, scalar_prefetch = 0 : i64, scratch_operands = 0 : i64, tpu.core_type = #tpu.core_type<tc>, window_params = [{transform_indices = @transform_0, window_bounds = array<i64: 512, 128>}, {pipeline_mode = #tpu.pipeline_mode<synchronous>, transform_indices = @transform_1, window_bounds = array<i64: 1, 128>}, {pipeline_mode = #tpu.pipeline_mode<synchronous>, transform_indices = @transform_2, window_bounds = array<i64: 1, 128>}, {transform_indices = @transform_3, window_bounds = array<i64: 512, 128>}]} {
    %c0 = arith.constant 0 : index
    %c0_0 = arith.constant 0 : index
    %0 = vector.load %arg1[%c0, %c0_0] : memref<512x128xbf16, #tpu.memory_space<vmem>>, vector<512x128xbf16>
    %1 = arith.extf %0 : vector<512x128xbf16> to vector<512x128xf32>
    %c0_1 = arith.constant 0 : index
    %c0_2 = arith.constant 0 : index
    %2 = vector.load %arg2[%c0_1, %c0_2] : memref<1x128xf32, #tpu.memory_space<vmem>>, vector<1x128xf32>
    %3 = vector.broadcast %2 : vector<1x128xf32> to vector<512x128xf32>
    %4 = arith.mulf %1, %3 : vector<512x128xf32>
    %c0_3 = arith.constant 0 : index
    %c0_4 = arith.constant 0 : index
    %5 = vector.load %arg3[%c0_3, %c0_4] : memref<1x128xf32, #tpu.memory_space<vmem>>, vector<1x128xf32>
    %6 = vector.broadcast %5 : vector<1x128xf32> to vector<512x128xf32>
    %7 = arith.addf %4, %6 : vector<512x128xf32>
    %cst = arith.constant 0.000000e+00 : f32
    %8 = vector.broadcast %cst : f32 to vector<512x128xf32>
    %9 = arith.maximumf %7, %8 : vector<512x128xf32>
    %10 = arith.truncf %9 : vector<512x128xf32> to vector<512x128xbf16>
    %c0_5 = arith.constant 0 : index
    %c0_6 = arith.constant 0 : index
    %11 = vector.load %arg4[%c0_5, %c0_6] : memref<512x128xbf16, #tpu.memory_space<vmem>>, vector<512x128xbf16>
    tpu.vector_store %arg4[%c0_5, %c0_6], %10 {strides = array<i32>} : memref<512x128xbf16, #tpu.memory_space<vmem>>, vector<512x128xbf16>,
    return
  }
  func.func @transform_0(%arg0: i32) -> (i32, i32) {
    %c0_i32 = arith.constant 0 : i32
    %c0_i32_0 = arith.constant 0 : i32
    return %arg0, %c0_i32 : i32, i32
  }
  func.func @transform_1(%arg0: i32) -> (i32, i32) {
    %c0_i32 = arith.constant 0 : i32
    %c0_i32_0 = arith.constant 0 : i32
    %c0_i32_1 = arith.constant 0 : i32
    return %c0_i32, %c0_i32_0 : i32, i32
  }
  func.func @transform_2(%arg0: i32) -> (i32, i32) {
    %c0_i32 = arith.constant 0 : i32
    %c0_i32_0 = arith.constant 0 : i32
    %c0_i32_1 = arith.constant 0 : i32
    return %c0_i32, %c0_i32_0 : i32, i32
  }
  func.func @transform_3(%arg0: i32) -> (i32, i32) {
    %c0_i32 = arith.constant 0 : i32
    %c0_i32_0 = arith.constant 0 : i32
    return %arg0, %c0_i32 : i32, i32
  }
}

module attributes {stable_mosaic.version = 11 : i64} {
  func.func @_bn_add_bn_relu_kernel(%arg0: i32, %arg1: memref<128x128xbf16, #tpu.memory_space<vmem>>, %arg2: memref<1x128xf32, #tpu.memory_space<vmem>>, %arg3: memref<1x128xf32, #tpu.memory_space<vmem>>, %arg4: memref<128x128xbf16, #tpu.memory_space<vmem>>, %arg5: memref<1x128xf32, #tpu.memory_space<vmem>>, %arg6: memref<1x128xf32, #tpu.memory_space<vmem>>, %arg7: memref<128x128xf32, #tpu.memory_space<vmem>>) attributes {dimension_semantics = [#tpu.dimension_semantics<parallel>], iteration_bounds = array<i64: 1>, scalar_prefetch = 0 : i64, scratch_operands = 0 : i64, tpu.core_type = #tpu.core_type<tc>, window_params = [{transform_indices = @transform_0, window_bounds = array<i64: 128, 128>}, {pipeline_mode = #tpu.pipeline_mode<synchronous>, transform_indices = @transform_1, window_bounds = array<i64: 1, 128>}, {pipeline_mode = #tpu.pipeline_mode<synchronous>, transform_indices = @transform_2, window_bounds = array<i64: 1, 128>}, {transform_indices = @transform_3, window_bounds = array<i64: 128, 128>}, {pipeline_mode = #tpu.pipeline_mode<synchronous>, transform_indices = @transform_4, window_bounds = array<i64: 1, 128>}, {pipeline_mode = #tpu.pipeline_mode<synchronous>, transform_indices = @transform_5, window_bounds = array<i64: 1, 128>}, {transform_indices = @transform_6, window_bounds = array<i64: 128, 128>}]} {
    %c0 = arith.constant 0 : index
    %c0_0 = arith.constant 0 : index
    %0 = vector.load %arg1[%c0, %c0_0] : memref<128x128xbf16, #tpu.memory_space<vmem>>, vector<128x128xbf16>
    %1 = arith.extf %0 : vector<128x128xbf16> to vector<128x128xf32>
    %c0_1 = arith.constant 0 : index
    %c0_2 = arith.constant 0 : index
    %2 = vector.load %arg2[%c0_1, %c0_2] : memref<1x128xf32, #tpu.memory_space<vmem>>, vector<1x128xf32>
    %3 = vector.broadcast %2 : vector<1x128xf32> to vector<128x128xf32>
    %4 = arith.mulf %1, %3 : vector<128x128xf32>
    %c0_3 = arith.constant 0 : index
    %c0_4 = arith.constant 0 : index
    %5 = vector.load %arg3[%c0_3, %c0_4] : memref<1x128xf32, #tpu.memory_space<vmem>>, vector<1x128xf32>
    %6 = vector.broadcast %5 : vector<1x128xf32> to vector<128x128xf32>
    %7 = arith.addf %4, %6 : vector<128x128xf32>
    %c0_5 = arith.constant 0 : index
    %c0_6 = arith.constant 0 : index
    %8 = vector.load %arg4[%c0_5, %c0_6] : memref<128x128xbf16, #tpu.memory_space<vmem>>, vector<128x128xbf16>
    %9 = arith.extf %8 : vector<128x128xbf16> to vector<128x128xf32>
    %c0_7 = arith.constant 0 : index
    %c0_8 = arith.constant 0 : index
    %10 = vector.load %arg5[%c0_7, %c0_8] : memref<1x128xf32, #tpu.memory_space<vmem>>, vector<1x128xf32>
    %11 = vector.broadcast %10 : vector<1x128xf32> to vector<128x128xf32>
    %12 = arith.mulf %9, %11 : vector<128x128xf32>
    %c0_9 = arith.constant 0 : index
    %c0_10 = arith.constant 0 : index
    %13 = vector.load %arg6[%c0_9, %c0_10] : memref<1x128xf32, #tpu.memory_space<vmem>>, vector<1x128xf32>
    %14 = vector.broadcast %13 : vector<1x128xf32> to vector<128x128xf32>
    %15 = arith.addf %12, %14 : vector<128x128xf32>
    %16 = arith.addf %7, %15 : vector<128x128xf32>
    %cst = arith.constant 0.000000e+00 : f32
    %17 = vector.broadcast %cst : f32 to vector<128x128xf32>
    %18 = arith.maximumf %16, %17 : vector<128x128xf32>
    %c0_11 = arith.constant 0 : index
    %c0_12 = arith.constant 0 : index
    %19 = vector.load %arg7[%c0_11, %c0_12] : memref<128x128xf32, #tpu.memory_space<vmem>>, vector<128x128xf32>
    tpu.vector_store %arg7[%c0_11, %c0_12], %18 {strides = array<i32>} : memref<128x128xf32, #tpu.memory_space<vmem>>, vector<128x128xf32>,
    return
  }
  func.func @transform_0(%arg0: i32) -> (i32, i32) {
    %c0_i32 = arith.constant 0 : i32
    %c0_i32_0 = arith.constant 0 : i32
    return %arg0, %c0_i32 : i32, i32
  }
  func.func @transform_1(%arg0: i32) -> (i32, i32) {
    %c0_i32 = arith.constant 0 : i32
    %c0_i32_0 = arith.constant 0 : i32
    %c0_i32_1 = arith.constant 0 : i32
    return %c0_i32, %c0_i32_0 : i32, i32
  }
  func.func @transform_2(%arg0: i32) -> (i32, i32) {
    %c0_i32 = arith.constant 0 : i32
    %c0_i32_0 = arith.constant 0 : i32
    %c0_i32_1 = arith.constant 0 : i32
    return %c0_i32, %c0_i32_0 : i32, i32
  }
  func.func @transform_3(%arg0: i32) -> (i32, i32) {
    %c0_i32 = arith.constant 0 : i32
    %c0_i32_0 = arith.constant 0 : i32
    return %arg0, %c0_i32 : i32, i32
  }
  func.func @transform_4(%arg0: i32) -> (i32, i32) {
    %c0_i32 = arith.constant 0 : i32
    %c0_i32_0 = arith.constant 0 : i32
    %c0_i32_1 = arith.constant 0 : i32
    return %c0_i32, %c0_i32_0 : i32, i32
  }
  func.func @transform_5(%arg0: i32) -> (i32, i32) {
    %c0_i32 = arith.constant 0 : i32
    %c0_i32_0 = arith.constant 0 : i32
    %c0_i32_1 = arith.constant 0 : i32
    return %c0_i32, %c0_i32_0 : i32, i32
  }
  func.func @transform_6(%arg0: i32) -> (i32, i32) {
    %c0_i32 = arith.constant 0 : i32
    %c0_i32_0 = arith.constant 0 : i32
    return %arg0, %c0_i32 : i32, i32
  }
}

module attributes {stable_mosaic.version = 11 : i64} {
  func.func @_mm_stats_kernel(%arg0: i32, %arg1: i32, %arg2: i32, %arg3: memref<128x128xbf16, #tpu.memory_space<vmem>>, %arg4: memref<128x128xbf16, #tpu.memory_space<vmem>>, %arg5: memref<1x128xf32, #tpu.memory_space<vmem>>, %arg6: memref<1x128xf32, #tpu.memory_space<vmem>>, %arg7: memref<128x128xbf16, #tpu.memory_space<vmem>>, %arg8: memref<8x128xf32, #tpu.memory_space<vmem>>, %arg9: memref<8x128xf32, #tpu.memory_space<vmem>>, %arg10: memref<128x128xf32, #tpu.memory_space<vmem>>) attributes {dimension_semantics = [#tpu.dimension_semantics<parallel>, #tpu.dimension_semantics<parallel>, #tpu.dimension_semantics<arbitrary>], iteration_bounds = array<i64: 1, 1, 1>, scalar_prefetch = 0 : i64, scratch_operands = 1 : i64, tpu.core_type = #tpu.core_type<tc>, window_params = [{transform_indices = @transform_0, window_bounds = array<i64: 128, 128>}, {transform_indices = @transform_1, window_bounds = array<i64: 128, 128>}, {transform_indices = @transform_2, window_bounds = array<i64: 1, 128>}, {transform_indices = @transform_3, window_bounds = array<i64: 1, 128>}, {transform_indices = @transform_4, window_bounds = array<i64: 128, 128>}, {transform_indices = @transform_5, window_bounds = array<i64: 8, 128>}, {transform_indices = @transform_6, window_bounds = array<i64: 8, 128>}]} {
    %c0_i32 = arith.constant 0 : i32
    %0 = arith.cmpi eq, %arg2, %c0_i32 : i32
    %1 = arith.extui %0 : i1 to i32
    %c0_i32_0 = arith.constant 0 : i32
    %2 = arith.cmpi ne, %1, %c0_i32_0 : i32
    scf.if %2 {
      %cst_15 = arith.constant 0.000000e+00 : f32
      %22 = vector.broadcast %cst_15 : f32 to vector<128x128xf32>
      %c0_16 = arith.constant 0 : index
      %c0_17 = arith.constant 0 : index
      %23 = vector.load %arg10[%c0_16, %c0_17] : memref<128x128xf32, #tpu.memory_space<vmem>>, vector<128x128xf32>
      tpu.vector_store %arg10[%c0_16, %c0_17], %22 {strides = array<i32>} : memref<128x128xf32, #tpu.memory_space<vmem>>, vector<128x128xf32>,
    } else {
    }
    %c0 = arith.constant 0 : index
    %c0_1 = arith.constant 0 : index
    %3 = vector.load %arg3[%c0, %c0_1] : memref<128x128xbf16, #tpu.memory_space<vmem>>, vector<128x128xbf16>
    %4 = arith.extf %3 : vector<128x128xbf16> to vector<128x128xf32>
    %c0_2 = arith.constant 0 : index
    %c0_3 = arith.constant 0 : index
    %5 = vector.load %arg5[%c0_2, %c0_3] : memref<1x128xf32, #tpu.memory_space<vmem>>, vector<1x128xf32>
    %6 = vector.broadcast %5 : vector<1x128xf32> to vector<128x128xf32>
    %7 = arith.mulf %4, %6 : vector<128x128xf32>
    %c0_4 = arith.constant 0 : index
    %c0_5 = arith.constant 0 : index
    %8 = vector.load %arg6[%c0_4, %c0_5] : memref<1x128xf32, #tpu.memory_space<vmem>>, vector<1x128xf32>
    %9 = vector.broadcast %8 : vector<1x128xf32> to vector<128x128xf32>
    %10 = arith.addf %7, %9 : vector<128x128xf32>
    %cst = arith.constant 0.000000e+00 : f32
    %11 = vector.broadcast %cst : f32 to vector<128x128xf32>
    %12 = arith.maximumf %10, %11 : vector<128x128xf32>
    %13 = arith.truncf %12 : vector<128x128xf32> to vector<128x128xbf16>
    %c0_6 = arith.constant 0 : index
    %c0_7 = arith.constant 0 : index
    %14 = vector.load %arg10[%c0_6, %c0_7] : memref<128x128xf32, #tpu.memory_space<vmem>>, vector<128x128xf32>
    %c0_8 = arith.constant 0 : index
    %c0_9 = arith.constant 0 : index
    %15 = vector.load %arg4[%c0_8, %c0_9] : memref<128x128xbf16, #tpu.memory_space<vmem>>, vector<128x128xbf16>
    %cst_10 = arith.constant dense<0.000000e+00> : vector<128x128xf32>
    %16 = tpu.matmul %13, %15, %cst_10 {dimension_numbers = #tpu.dot_dimension_numbers<[1], [0], [0], [1], [0, 0, 1, 1], [], []>} : vector<128x128xbf16>, vector<128x128xbf16>, vector<128x128xf32> -> vector<128x128xf32>
    %17 = arith.addf %14, %16 : vector<128x128xf32>
    %c0_11 = arith.constant 0 : index
    %c0_12 = arith.constant 0 : index
    %18 = vector.load %arg10[%c0_11, %c0_12] : memref<128x128xf32, #tpu.memory_space<vmem>>, vector<128x128xf32>
    tpu.vector_store %arg10[%c0_11, %c0_12], %17 {strides = array<i32>} : memref<128x128xf32, #tpu.memory_space<vmem>>, vector<128x128xf32>,
    %c0_i32_13 = arith.constant 0 : i32
    %19 = arith.cmpi eq, %arg2, %c0_i32_13 : i32
    %20 = arith.extui %19 : i1 to i32
    %c0_i32_14 = arith.constant 0 : i32
    %21 = arith.cmpi ne, %20, %c0_i32_14 : i32
    scf.if %21 {
      %c0_15 = arith.constant 0 : index
      %c0_16 = arith.constant 0 : index
      %22 = vector.load %arg10[%c0_15, %c0_16] : memref<128x128xf32, #tpu.memory_space<vmem>>, vector<128x128xf32>
      %23 = arith.truncf %22 : vector<128x128xf32> to vector<128x128xbf16>
      %c0_17 = arith.constant 0 : index
      %c0_18 = arith.constant 0 : index
      %24 = vector.load %arg7[%c0_17, %c0_18] : memref<128x128xbf16, #tpu.memory_space<vmem>>, vector<128x128xbf16>
      tpu.vector_store %arg7[%c0_17, %c0_18], %23 {strides = array<i32>} : memref<128x128xbf16, #tpu.memory_space<vmem>>, vector<128x128xbf16>,
      %cst_19 = arith.constant dense<0.000000e+00> : vector<128xf32>
      %25 = vector.multi_reduction <add>, %22, %cst_19 [0] : vector<128x128xf32> to vector<128xf32>
      %26 = vector.shape_cast %25 : vector<128xf32> to vector<1x128xf32>
      %27 = arith.mulf %22, %22 : vector<128x128xf32>
      %cst_20 = arith.constant dense<0.000000e+00> : vector<128xf32>
      %28 = vector.multi_reduction <add>, %27, %cst_20 [0] : vector<128x128xf32> to vector<128xf32>
      %29 = vector.shape_cast %28 : vector<128xf32> to vector<1x128xf32>
      %30 = vector.shape_cast %26 : vector<1x128xf32> to vector<1x128xf32>
      %31 = vector.broadcast %30 : vector<1x128xf32> to vector<8x128xf32>
      %c0_21 = arith.constant 0 : index
      %c0_22 = arith.constant 0 : index
      %32 = vector.load %arg8[%c0_21, %c0_22] : memref<8x128xf32, #tpu.memory_space<vmem>>, vector<8x128xf32>
      tpu.vector_store %arg8[%c0_21, %c0_22], %31 {strides = array<i32>} : memref<8x128xf32, #tpu.memory_space<vmem>>, vector<8x128xf32>,
      %33 = vector.shape_cast %29 : vector<1x128xf32> to vector<1x128xf32>
      %34 = vector.broadcast %33 : vector<1x128xf32> to vector<8x128xf32>
      %c0_23 = arith.constant 0 : index
      %c0_24 = arith.constant 0 : index
      %35 = vector.load %arg9[%c0_23, %c0_24] : memref<8x128xf32, #tpu.memory_space<vmem>>, vector<8x128xf32>
      tpu.vector_store %arg9[%c0_23, %c0_24], %34 {strides = array<i32>} : memref<8x128xf32, #tpu.memory_space<vmem>>, vector<8x128xf32>,
    } else {
    }
    return
  }
  func.func @transform_0(%arg0: i32, %arg1: i32, %arg2: i32) -> (i32, i32) {
    %c0_i32 = arith.constant 0 : i32
    return %arg0, %arg2 : i32, i32
  }
  func.func @transform_1(%arg0: i32, %arg1: i32, %arg2: i32) -> (i32, i32) {
    %c0_i32 = arith.constant 0 : i32
    return %arg2, %arg1 : i32, i32
  }
  func.func @transform_2(%arg0: i32, %arg1: i32, %arg2: i32) -> (i32, i32) {
    %c0_i32 = arith.constant 0 : i32
    %c0_i32_0 = arith.constant 0 : i32
    return %c0_i32, %arg2 : i32, i32
  }
  func.func @transform_3(%arg0: i32, %arg1: i32, %arg2: i32) -> (i32, i32) {
    %c0_i32 = arith.constant 0 : i32
    %c0_i32_0 = arith.constant 0 : i32
    return %c0_i32, %arg2 : i32, i32
  }
  func.func @transform_4(%arg0: i32, %arg1: i32, %arg2: i32) -> (i32, i32) {
    %c0_i32 = arith.constant 0 : i32
    return %arg0, %arg1 : i32, i32
  }
  func.func @transform_5(%arg0: i32, %arg1: i32, %arg2: i32) -> (i32, i32) {
    %c0_i32 = arith.constant 0 : i32
    return %arg0, %arg1 : i32, i32
  }
  func.func @transform_6(%arg0: i32, %arg1: i32, %arg2: i32) -> (i32, i32) {
    %c0_i32 = arith.constant 0 : i32
    return %arg0, %arg1 : i32, i32
  }
}

module attributes {stable_mosaic.version = 11 : i64} {
  func.func @_mm_stats_kernel(%arg0: i32, %arg1: i32, %arg2: i32, %arg3: memref<128x128xbf16, #tpu.memory_space<vmem>>, %arg4: memref<128x128xbf16, #tpu.memory_space<vmem>>, %arg5: memref<1x128xf32, #tpu.memory_space<vmem>>, %arg6: memref<1x128xf32, #tpu.memory_space<vmem>>, %arg7: memref<128x128xbf16, #tpu.memory_space<vmem>>, %arg8: memref<8x128xf32, #tpu.memory_space<vmem>>, %arg9: memref<8x128xf32, #tpu.memory_space<vmem>>, %arg10: memref<128x128xf32, #tpu.memory_space<vmem>>) attributes {dimension_semantics = [#tpu.dimension_semantics<parallel>, #tpu.dimension_semantics<parallel>, #tpu.dimension_semantics<arbitrary>], iteration_bounds = array<i64: 1, 1, 9>, scalar_prefetch = 0 : i64, scratch_operands = 1 : i64, tpu.core_type = #tpu.core_type<tc>, window_params = [{transform_indices = @transform_0, window_bounds = array<i64: 128, 128>}, {transform_indices = @transform_1, window_bounds = array<i64: 128, 128>}, {transform_indices = @transform_2, window_bounds = array<i64: 1, 128>}, {transform_indices = @transform_3, window_bounds = array<i64: 1, 128>}, {transform_indices = @transform_4, window_bounds = array<i64: 128, 128>}, {transform_indices = @transform_5, window_bounds = array<i64: 8, 128>}, {transform_indices = @transform_6, window_bounds = array<i64: 8, 128>}]} {
    %c0_i32 = arith.constant 0 : i32
    %0 = arith.cmpi eq, %arg2, %c0_i32 : i32
    %1 = arith.extui %0 : i1 to i32
    %c0_i32_0 = arith.constant 0 : i32
    %2 = arith.cmpi ne, %1, %c0_i32_0 : i32
    scf.if %2 {
      %cst_9 = arith.constant 0.000000e+00 : f32
      %12 = vector.broadcast %cst_9 : f32 to vector<128x128xf32>
      %c0_10 = arith.constant 0 : index
      %c0_11 = arith.constant 0 : index
      %13 = vector.load %arg10[%c0_10, %c0_11] : memref<128x128xf32, #tpu.memory_space<vmem>>, vector<128x128xf32>
      tpu.vector_store %arg10[%c0_10, %c0_11], %12 {strides = array<i32>} : memref<128x128xf32, #tpu.memory_space<vmem>>, vector<128x128xf32>,
    } else {
    }
    %c0 = arith.constant 0 : index
    %c0_1 = arith.constant 0 : index
    %3 = vector.load %arg3[%c0, %c0_1] : memref<128x128xbf16, #tpu.memory_space<vmem>>, vector<128x128xbf16>
    %c0_2 = arith.constant 0 : index
    %c0_3 = arith.constant 0 : index
    %4 = vector.load %arg10[%c0_2, %c0_3] : memref<128x128xf32, #tpu.memory_space<vmem>>, vector<128x128xf32>
    %c0_4 = arith.constant 0 : index
    %c0_5 = arith.constant 0 : index
    %5 = vector.load %arg4[%c0_4, %c0_5] : memref<128x128xbf16, #tpu.memory_space<vmem>>, vector<128x128xbf16>
    %cst = arith.constant dense<0.000000e+00> : vector<128x128xf32>
    %6 = tpu.matmul %3, %5, %cst {dimension_numbers = #tpu.dot_dimension_numbers<[1], [0], [0], [1], [0, 0, 1, 1], [], []>} : vector<128x128xbf16>, vector<128x128xbf16>, vector<128x128xf32> -> vector<128x128xf32>
    %7 = arith.addf %4, %6 : vector<128x128xf32>
    %c0_6 = arith.constant 0 : index
    %c0_7 = arith.constant 0 : index
    %8 = vector.load %arg10[%c0_6, %c0_7] : memref<128x128xf32, #tpu.memory_space<vmem>>, vector<128x128xf32>
    tpu.vector_store %arg10[%c0_6, %c0_7], %7 {strides = array<i32>} : memref<128x128xf32, #tpu.memory_space<vmem>>, vector<128x128xf32>,
    %c8_i32 = arith.constant 8 : i32
    %9 = arith.cmpi eq, %arg2, %c8_i32 : i32
    %10 = arith.extui %9 : i1 to i32
    %c0_i32_8 = arith.constant 0 : i32
    %11 = arith.cmpi ne, %10, %c0_i32_8 : i32
    scf.if %11 {
      %c0_9 = arith.constant 0 : index
      %c0_10 = arith.constant 0 : index
      %12 = vector.load %arg10[%c0_9, %c0_10] : memref<128x128xf32, #tpu.memory_space<vmem>>, vector<128x128xf32>
      %13 = arith.truncf %12 : vector<128x128xf32> to vector<128x128xbf16>
      %c0_11 = arith.constant 0 : index
      %c0_12 = arith.constant 0 : index
      %14 = vector.load %arg7[%c0_11, %c0_12] : memref<128x128xbf16, #tpu.memory_space<vmem>>, vector<128x128xbf16>
      tpu.vector_store %arg7[%c0_11, %c0_12], %13 {strides = array<i32>} : memref<128x128xbf16, #tpu.memory_space<vmem>>, vector<128x128xbf16>,
      %cst_13 = arith.constant dense<0.000000e+00> : vector<128xf32>
      %15 = vector.multi_reduction <add>, %12, %cst_13 [0] : vector<128x128xf32> to vector<128xf32>
      %16 = vector.shape_cast %15 : vector<128xf32> to vector<1x128xf32>
      %17 = arith.mulf %12, %12 : vector<128x128xf32>
      %cst_14 = arith.constant dense<0.000000e+00> : vector<128xf32>
      %18 = vector.multi_reduction <add>, %17, %cst_14 [0] : vector<128x128xf32> to vector<128xf32>
      %19 = vector.shape_cast %18 : vector<128xf32> to vector<1x128xf32>
      %20 = vector.shape_cast %16 : vector<1x128xf32> to vector<1x128xf32>
      %21 = vector.broadcast %20 : vector<1x128xf32> to vector<8x128xf32>
      %c0_15 = arith.constant 0 : index
      %c0_16 = arith.constant 0 : index
      %22 = vector.load %arg8[%c0_15, %c0_16] : memref<8x128xf32, #tpu.memory_space<vmem>>, vector<8x128xf32>
      tpu.vector_store %arg8[%c0_15, %c0_16], %21 {strides = array<i32>} : memref<8x128xf32, #tpu.memory_space<vmem>>, vector<8x128xf32>,
      %23 = vector.shape_cast %19 : vector<1x128xf32> to vector<1x128xf32>
      %24 = vector.broadcast %23 : vector<1x128xf32> to vector<8x128xf32>
      %c0_17 = arith.constant 0 : index
      %c0_18 = arith.constant 0 : index
      %25 = vector.load %arg9[%c0_17, %c0_18] : memref<8x128xf32, #tpu.memory_space<vmem>>, vector<8x128xf32>
      tpu.vector_store %arg9[%c0_17, %c0_18], %24 {strides = array<i32>} : memref<8x128xf32, #tpu.memory_space<vmem>>, vector<8x128xf32>,
    } else {
    }
    return
  }
  func.func @transform_0(%arg0: i32, %arg1: i32, %arg2: i32) -> (i32, i32) {
    %c0_i32 = arith.constant 0 : i32
    return %arg0, %arg2 : i32, i32
  }
  func.func @transform_1(%arg0: i32, %arg1: i32, %arg2: i32) -> (i32, i32) {
    %c0_i32 = arith.constant 0 : i32
    return %arg2, %arg1 : i32, i32
  }
  func.func @transform_2(%arg0: i32, %arg1: i32, %arg2: i32) -> (i32, i32) {
    %c0_i32 = arith.constant 0 : i32
    %c0_i32_0 = arith.constant 0 : i32
    return %c0_i32, %arg2 : i32, i32
  }
  func.func @transform_3(%arg0: i32, %arg1: i32, %arg2: i32) -> (i32, i32) {
    %c0_i32 = arith.constant 0 : i32
    %c0_i32_0 = arith.constant 0 : i32
    return %c0_i32, %arg2 : i32, i32
  }
  func.func @transform_4(%arg0: i32, %arg1: i32, %arg2: i32) -> (i32, i32) {
    %c0_i32 = arith.constant 0 : i32
    return %arg0, %arg1 : i32, i32
  }
  func.func @transform_5(%arg0: i32, %arg1: i32, %arg2: i32) -> (i32, i32) {
    %c0_i32 = arith.constant 0 : i32
    return %arg0, %arg1 : i32, i32
  }
  func.func @transform_6(%arg0: i32, %arg1: i32, %arg2: i32) -> (i32, i32) {
    %c0_i32 = arith.constant 0 : i32
    return %arg0, %arg1 : i32, i32
  }
}

</mosaic_0001>

<bundles_post_ra>
// kernel: bottleneck_forward.10
= control target key start
LH: loop header
LB: loop body
LE: loop exit
PB: predicated region body
PF: predicated region fallthrough
CT: control target
= control target key end

     0   :  { %s773_s1 = inlined_call_operand.vmem [shape: bf16[128,128], index: 1, kind: input, shape index: {}]   ;;  %s774_s2 = inlined_call_operand.vmem [shape: f32[1,128], index: 2, kind: input, shape index: {}]   ;;  %s775_s3 = inlined_call_operand.vmem [shape: f32[1,128], index: 3, kind: input, shape index: {}]   ;;  %s776_s0 = inlined_call_operand.vmem [shape: bf16[128,128], index: 0, kind: input, shape index: {}]   ;;  %s777_s4 = inlined_call_operand.vmem [shape: bf16[128,128], index: 4, kind: output, shape index: {0}]   ;;  %s778_s5 = inlined_call_operand.vmem [shape: f32[8,128], index: 5, kind: output, shape index: {1}]   ;;  %s779_s6 = inlined_call_operand.vmem [shape: f32[8,128], index: 6, kind: output, shape index: {2}]  }
   0x1   :  { %v644_v0 = vld [vmem:[%s773_s1] sm:$0xff]   ;;  %v645_v1 = vld [vmem:[%s773_s1 + $0x8] sm:$0xff]   ;;  %v646_v2 = vld [vmem:[%s773_s1 + $0x10] sm:$0xff]  }
   0x2   :  { %596 = vmatprep.subr.bf16.mxu0 %v644_v0  ;;  %628 = vmatprep.subr.bf16.mxu1 %v644_v0  ;;  %v647_v3 = vld [vmem:[%s773_s1 + $0x18] sm:$0xff]   ;;  %v652_v4 = vld [vmem:[%s776_s0] sm:$0xff]   ;;  %v649_v7 = vld [vmem:[%s773_s1 + $0x28] sm:$0xff]  }
   0x3   :  { %597 = vmatpush3.bf16.msra.mxu0 %v644_v0  ;;  %636 = vmatpush3.bf16.msra.mxu1 %v644_v0  ;;  %v648_v5 = vld [vmem:[%s773_s1 + $0x20] sm:$0xff]   ;;  %v650_v8 = vld [vmem:[%s773_s1 + $0x30] sm:$0xff]   ;;  %v651_v9 = vld [vmem:[%s773_s1 + $0x38] sm:$0xff]  }
   0x4   :  { %598 = vmatprep.subr.bf16.mxu0 %v645_v1  ;;  %629 = vmatprep.subr.bf16.mxu1 %v645_v1  ;;  %v656_v6 = vld [vmem:[%s776_s0 + $0x20] sm:$0xff]   ;;  %v653_v10 = vld [vmem:[%s776_s0 + $0x8] sm:$0xff]   ;;  %v654_v12 = vld [vmem:[%s776_s0 + $0x10] sm:$0xff]  }
   0x5   :  { %612 = vmatprep.mubr.bf16.mxu0 %v652_v4  ;;  %620 = vmatprep.mubr.bf16.mxu1 %v656_v6  ;;  %v657_v11 = vld [vmem:[%s776_s0 + $0x28] sm:$0xff]   ;;  %v658_v13 = vld [vmem:[%s776_s0 + $0x30] sm:$0xff]   ;;  %v655_v14 = vld [vmem:[%s776_s0 + $0x18] sm:$0xff]  }
   0x6   :  { %v659_v15 = vld [vmem:[%s776_s0 + $0x38] sm:$0xff]  }
   0x7   :  { %599 = vmatpush3.bf16.msra.mxu0 %v645_v1  ;;  %637 = vmatpush3.bf16.msra.mxu1 %v645_v1 }
   0x8   :  { %600 = vmatprep.subr.bf16.mxu0 %v646_v2  ;;  %630 = vmatprep.subr.bf16.mxu1 %v646_v2 }
   0xb   :  { %601 = vmatpush3.bf16.msra.mxu0 %v646_v2  ;;  %638 = vmatpush3.bf16.msra.mxu1 %v646_v2 }
   0xc   :  { %602 = vmatprep.subr.bf16.mxu0 %v647_v3  ;;  %631 = vmatprep.subr.bf16.mxu1 %v647_v3 }
   0xf   :  { %603 = vmatpush3.bf16.msra.mxu0 %v647_v3  ;;  %639 = vmatpush3.bf16.msra.mxu1 %v647_v3 }
  0x10   :  { %604 = vmatprep.subr.bf16.mxu0 %v648_v5  ;;  %632 = vmatprep.subr.bf16.mxu1 %v648_v5 }
  0x13   :  { %605 = vmatpush3.bf16.msra.mxu0 %v648_v5  ;;  %640 = vmatpush3.bf16.msra.mxu1 %v648_v5 }
  0x14   :  { %606 = vmatprep.subr.bf16.mxu0 %v649_v7  ;;  %633 = vmatprep.subr.bf16.mxu1 %v649_v7 }
  0x17   :  { %607 = vmatpush3.bf16.msra.mxu0 %v649_v7  ;;  %641 = vmatpush3.bf16.msra.mxu1 %v649_v7 }
  0x18   :  { %608 = vmatprep.subr.bf16.mxu0 %v650_v8  ;;  %634 = vmatprep.subr.bf16.mxu1 %v650_v8 }
  0x1b   :  { %609 = vmatpush3.bf16.msra.mxu0 %v650_v8  ;;  %642 = vmatpush3.bf16.msra.mxu1 %v650_v8 }
  0x1c   :  { %610 = vmatprep.subr.bf16.mxu0 %v651_v9  ;;  %635 = vmatprep.subr.bf16.mxu1 %v651_v9 }
  0x1f   :  { %611 = vmatpush3.bf16.msra.mxu0 %v651_v9  ;;  %643 = vmatpush3.bf16.msra.mxu1 %v651_v9 }
  0x22   :  { %613 = vmatmul.mubr.bf16.vlgmr.msra.gmra.mrb[0].mxu0 %v653_v10  ;;  %621 = vmatmul.mubr.bf16.vlgmr.msra.gmra.mrb[0].mxu1 %v657_v11 }
  0x23   :  { %616 = vmatprep.mubr.bf16.mxu0 %v654_v12  ;;  %624 = vmatprep.mubr.bf16.mxu1 %v658_v13 }
  0x2a   :  { %617 = vmatmul.mubr.bf16.gmra.mrb[4].mxu0 %v655_v14  ;;  %625 = vmatmul.mubr.bf16.gmra.mrb[4].mxu1 %v659_v15 }
  0xf5   :  { %v614_v16 = vpop.f32.mrb[0].mxu0  ;;  %v622_v17 = vpop.f32.mrb[0].mxu1 }
  0xf6   :  { %v219_v18 = vpop.f32.mrb[1].mxu0  ;;  %v251_v19 = vpop.f32.mrb[1].mxu1  ;;  %v436_v31 = vmul.f32 %v614_v16, %v614_v16  ;;  %v444_v3 = vmul.f32 %v622_v17, %v622_v17 }
  0xf7   :  { %v615_v20 = vpop.f32.mrb[2].mxu0  ;;  %v623_v21 = vpop.f32.mrb[2].mxu1  ;;  %v434_v22 = vmul.f32 %v219_v18, %v219_v18  ;;  %v442_v61 = vmul.f32 %v251_v19, %v251_v19 }
  0xf8   :  { %v541_v23 = vpack.c.bf16 %v615_v20, %v614_v16  ;;  %v222_v24 = vpop.f32.mrb[3].mxu0  ;;  %v561_v25 = vpack.c.bf16 %v623_v21, %v622_v17  ;;  %v254_v26 = vpop.f32.mrb[3].mxu1  ;;  %v437_v34 = vmul.f32 %v615_v20, %v615_v20  ;;  %v445_v6 = vmul.f32 %v623_v21, %v623_v21 }
  0xf9   :  { %v536_v27 = vpack.c.bf16 %v222_v24, %v219_v18  ;;  %v413_v28 = vadd.f32 %v222_v24, %v219_v18  ;;  %v435_v29 = vmul.f32 %v222_v24, %v222_v24  ;;  %v556_v30 = vpack.c.bf16 %v254_v26, %v251_v19 }
  0xfa   :  { %573 = vst [vmem:[%s777_s4 + $0x8] sm:$0xff] %v541_v23   ;;  %577 = vst [vmem:[%s777_s4 + $0x28] sm:$0xff] %v561_v25   ;;  %v443_v2 = vmul.f32 %v254_v26, %v254_v26 }
  0xfb   :  { %537 = vst [vmem:[%s777_s4] sm:$0xff] %v536_v27   ;;  %v414_v32 = vadd.f32 %v614_v16, %v413_v28  ;;  %v450_v33 = vadd.f32 %v435_v29, %v434_v22  ;;  %576 = vst [vmem:[%s777_s4 + $0x20] sm:$0xff] %v556_v30  }
  0xfd   :  { %v451_v35 = vadd.f32 %v450_v33, %v436_v31  ;;  %v618_v36 = vpop.f32.mrb[4].mxu0  ;;  %v415_v37 = vadd.f32 %v615_v20, %v414_v32  ;;  %v626_v38 = vpop.f32.mrb[4].mxu1 }
  0xfe   :  { %v235_v39 = vpop.f32.mrb[5].mxu0  ;;  %v267_v40 = vpop.f32.mrb[5].mxu1  ;;  %v440_v55 = vmul.f32 %v618_v36, %v618_v36  ;;  %v448_v15 = vmul.f32 %v626_v38, %v626_v38 }
  0xff   :  { %v416_v41 = vadd.f32 %v415_v37, %v235_v39  ;;  %v438_v42 = vmul.f32 %v235_v39, %v235_v39  ;;  %v452_v43 = vadd.f32 %v451_v35, %v437_v34  ;;  %v619_v44 = vpop.f32.mrb[6].mxu0  ;;  %v627_v45 = vpop.f32.mrb[6].mxu1  ;;  %v446_v9 = vmul.f32 %v267_v40, %v267_v40 }
 0x100   :  { %v551_v46 = vpack.c.bf16 %v619_v44, %v618_v36  ;;  %v238_v47 = vpop.f32.mrb[7].mxu0  ;;  %v571_v48 = vpack.c.bf16 %v627_v45, %v626_v38  ;;  %v270_v49 = vpop.f32.mrb[7].mxu1  ;;  %v441_v58 = vmul.f32 %v619_v44, %v619_v44 }
 0x101   :  { %v453_v50 = vadd.f32 %v452_v43, %v438_v42  ;;  %v546_v51 = vpack.c.bf16 %v238_v47, %v235_v39  ;;  %v417_v52 = vadd.f32 %v416_v41, %v238_v47  ;;  %v439_v53 = vmul.f32 %v238_v47, %v238_v47 }
 0x102   :  { %575 = vst [vmem:[%s777_s4 + $0x18] sm:$0xff] %v551_v46   ;;  %579 = vst [vmem:[%s777_s4 + $0x38] sm:$0xff] %v571_v48   ;;  %v566_v54 = vpack.c.bf16 %v270_v49, %v267_v40  ;;  %v447_v14 = vmul.f32 %v270_v49, %v270_v49 }
 0x103   :  { %574 = vst [vmem:[%s777_s4 + $0x10] sm:$0xff] %v546_v51   ;;  %v418_v56 = vadd.f32 %v618_v36, %v417_v52  ;;  %v454_v57 = vadd.f32 %v453_v50, %v439_v53 }
 0x104   :  { %578 = vst [vmem:[%s777_s4 + $0x30] sm:$0xff] %v566_v54  }
 0x105   :  { %v455_v59 = vadd.f32 %v454_v57, %v440_v55  ;;  %v419_v60 = vadd.f32 %v619_v44, %v418_v56 }
 0x107   :  { %v420_v62 = vadd.f32 %v419_v60, %v251_v19  ;;  %v456_v63 = vadd.f32 %v455_v59, %v441_v58  ;;  %v449_v19 = vmul.f32 %v627_v45, %v627_v45 }
 0x109   :  { %v457_v0 = vadd.f32 %v456_v63, %v442_v61  ;;  %v421_v1 = vadd.f32 %v420_v62, %v254_v26 }
 0x10b   :  { %v422_v4 = vadd.f32 %v622_v17, %v421_v1  ;;  %v458_v5 = vadd.f32 %v457_v0, %v443_v2 }
 0x10d   :  { %v459_v7 = vadd.f32 %v458_v5, %v444_v3  ;;  %v423_v8 = vadd.f32 %v623_v21, %v422_v4 }
 0x10f   :  { %v424_v10 = vadd.f32 %v423_v8, %v267_v40  ;;  %v460_v11 = vadd.f32 %v459_v7, %v445_v6 }
 0x111   :  { %v461_v12 = vadd.f32 %v460_v11, %v446_v9  ;;  %v425_v13 = vadd.f32 %v424_v10, %v270_v49 }
 0x113   :  { %v426_v16 = vadd.f32 %v626_v38, %v425_v13  ;;  %v462_v18 = vadd.f32 %v461_v12, %v447_v14 }
 0x115   :  { %v427_v20 = vadd.f32 %v627_v45, %v426_v16  ;;  %v463_v22 = vadd.f32 %v462_v18, %v448_v15 }
 0x117   :  { %v428_v23 = vrot.slane %v427_v20, 4  ;;  %v464_v24 = vadd.f32 %v463_v22, %v449_v19 }
 0x119   :  { %v429_v25 = vadd.f32 %v428_v23, %v427_v20  ;;  %v465_v17 = vrot.slane %v464_v24, 4 }
 0x11b   :  { %v430_v26 = vrot.slane %v429_v25, 2  ;;  %v466_v27 = vadd.f32 %v465_v17, %v464_v24 }
 0x11d   :  { %v431_v28 = vadd.f32 %v430_v26, %v429_v25  ;;  %v467_v21 = vrot.slane %v466_v27, 2 }
 0x11f   :  { %v432_v29 = vrot.slane %v431_v28, 1  ;;  %v468_v30 = vadd.f32 %v467_v21, %v466_v27 }
 0x121   :  { %v433_v31 = vadd.f32 %v432_v29, %v431_v28  ;;  %v469_v32 = vrot.slane %v468_v30, 1 }
 0x123   :  { %v470_v33 = vadd.f32 %v469_v32, %v468_v30  ;;  %471 = vst [vmem:[%s778_s5] sm:$0xff] %v433_v31 }
 0x125   :  { %472 = vst [vmem:[%s779_s6] sm:$0xff] %v470_v33 }

// kernel: bottleneck_forward.7
= control target key start
LH: loop header
LB: loop body
LE: loop exit
PB: predicated region body
PF: predicated region fallthrough
CT: control target
= control target key end

     0   :  { %s1502_s0 = inlined_call_operand.vmem [shape: bf16[512,128], index: 0, kind: input, shape index: {}]   ;;  %s1503_s1 = inlined_call_operand.vmem [shape: f32[1,128], index: 1, kind: input, shape index: {}]   ;;  %s1504_s2 = inlined_call_operand.vmem [shape: f32[1,128], index: 2, kind: input, shape index: {}]   ;;  %s1505_s3 = inlined_call_operand.vmem [shape: bf16[512,128], index: 3, kind: output, shape index: {}]  }
   0x1   :  { %v803_v0 = vld [vmem:[%s1502_s0] sm:$0xff]   ;;  %v1090_v4 = vld [vmem:[%s1502_s0 + $0x8] sm:$0xff]   ;;  %v1091_v5 = vld [vmem:[%s1502_s0 + $0x10] sm:$0xff]  }
   0x2   :  { %v1178_v1 = vld [vmem:[%s1503_s1] ss:$0 sm:$0xff]  ;;  %v804_v2 = vunpack.c.l.bf16 %v803_v0  ;;  %v805_v3 = vunpack.c.h.bf16 %v803_v0  ;;  %v1092_v6 = vld [vmem:[%s1502_s0 + $0x18] sm:$0xff]   ;;  %v808_v8 = vunpack.c.l.bf16 %v1090_v4  ;;  %v809_v9 = vunpack.c.h.bf16 %v1090_v4  ;;  %v1094_v33 = vld [vmem:[%s1502_s0 + $0x28] sm:$0xff]  }
   0x3   :  { %v1192_v7 = vld [vmem:[%s1504_s2] ss:$0 sm:$0xff]  ;;  %v812_v10 = vunpack.c.l.bf16 %v1091_v5  ;;  %v813_v11 = vunpack.c.h.bf16 %v1091_v5  ;;  %v816_v14 = vunpack.c.l.bf16 %v1092_v6  ;;  %v817_v15 = vunpack.c.h.bf16 %v1092_v6  ;;  %v1095_v38 = vld [vmem:[%s1502_s0 + $0x30] sm:$0xff]   ;;  %v1096_v43 = vld [vmem:[%s1502_s0 + $0x38] sm:$0xff]  }
   0x4   :  { %v149_v12 = vmul.f32 %v804_v2, %v1178_v1  ;;  %v150_v13 = vmul.f32 %v805_v3, %v1178_v1  ;;  %v151_v16 = vmul.f32 %v808_v8, %v1178_v1  ;;  %v152_v17 = vmul.f32 %v809_v9, %v1178_v1  ;;  %v1093_v28 = vld [vmem:[%s1502_s0 + $0x20] sm:$0xff]  }
   0x5   :  { %v153_v18 = vmul.f32 %v812_v10, %v1178_v1  ;;  %v154_v19 = vmul.f32 %v813_v11, %v1178_v1  ;;  %v155_v22 = vmul.f32 %v816_v14, %v1178_v1  ;;  %v156_v23 = vmul.f32 %v817_v15, %v1178_v1  ;;  %v1097_v0 = vld [vmem:[%s1502_s0 + $0x40] sm:$0xff]   ;;  %v1098_v11 = vld [vmem:[%s1502_s0 + $0x48] sm:$0xff]  }
   0x6   :  { %v220_v20 = vadd.f32 %v1192_v7, %v149_v12  ;;  %v221_v21 = vadd.f32 %v1192_v7, %v150_v13  ;;  %v222_v24 = vadd.f32 %v1192_v7, %v151_v16  ;;  %v223_v25 = vadd.f32 %v1192_v7, %v152_v17  ;;  %v1099_v16 = vld [vmem:[%s1502_s0 + $0x50] sm:$0xff]  }
   0x7   :  { %v224_v26 = vadd.f32 %v1192_v7, %v153_v18  ;;  %v225_v27 = vadd.f32 %v1192_v7, %v154_v19  ;;  %v226_v31 = vadd.f32 %v1192_v7, %v155_v22  ;;  %v227_v32 = vadd.f32 %v1192_v7, %v156_v23 }
   0x8   :  { %v284_v29 = vmax.f32 %v220_v20, 0.0  ;;  %v285_v30 = vmax.f32 %v221_v21, 0.0  ;;  %v286_v34 = vmax.f32 %v222_v24, 0.0  ;;  %v287_v35 = vmax.f32 %v223_v25, 0.0  ;;  %v1100_v25 = vld [vmem:[%s1502_s0 + $0x58] sm:$0xff]  }
   0x9   :  { %v288_v36 = vmax.f32 %v224_v26, 0.0  ;;  %v289_v37 = vmax.f32 %v225_v27, 0.0  ;;  %v290_v40 = vmax.f32 %v226_v31, 0.0  ;;  %v291_v41 = vmax.f32 %v227_v32, 0.0 }
   0xa   :  { %v933_v39 = vpack.c.bf16 %v285_v30, %v284_v29  ;;  %v820_v42 = vunpack.c.l.bf16 %v1093_v28  ;;  %v938_v44 = vpack.c.bf16 %v287_v35, %v286_v34  ;;  %v821_v46 = vunpack.c.h.bf16 %v1093_v28 }
   0xb   :  { %v943_v45 = vpack.c.bf16 %v289_v37, %v288_v36  ;;  %v824_v47 = vunpack.c.l.bf16 %v1094_v33  ;;  %v948_v48 = vpack.c.bf16 %v291_v41, %v290_v40  ;;  %v825_v50 = vunpack.c.h.bf16 %v1094_v33 }
   0xc   :  { %934 = vst [vmem:[%s1505_s3] sm:$0xff] %v933_v39   ;;  %v157_v49 = vmul.f32 %v820_v42, %v1178_v1  ;;  %v828_v51 = vunpack.c.l.bf16 %v1095_v38  ;;  %1121 = vst [vmem:[%s1505_s3 + $0x8] sm:$0xff] %v938_v44   ;;  %v158_v52 = vmul.f32 %v821_v46, %v1178_v1  ;;  %v829_v54 = vunpack.c.h.bf16 %v1095_v38  ;;  %v1101_v38 = vld [vmem:[%s1502_s0 + $0x60] sm:$0xff]  }
   0xd   :  { %1122 = vst [vmem:[%s1505_s3 + $0x10] sm:$0xff] %v943_v45   ;;  %v159_v53 = vmul.f32 %v824_v47, %v1178_v1  ;;  %v832_v55 = vunpack.c.l.bf16 %v1096_v43  ;;  %1123 = vst [vmem:[%s1505_s3 + $0x18] sm:$0xff] %v948_v48   ;;  %v160_v57 = vmul.f32 %v825_v50, %v1178_v1  ;;  %v833_v59 = vunpack.c.h.bf16 %v1096_v43 }
   0xe   :  { %v228_v56 = vadd.f32 %v1192_v7, %v157_v49  ;;  %v161_v58 = vmul.f32 %v828_v51, %v1178_v1  ;;  %v229_v60 = vadd.f32 %v1192_v7, %v158_v52  ;;  %v162_v62 = vmul.f32 %v829_v54, %v1178_v1  ;;  %v1102_v51 = vld [vmem:[%s1502_s0 + $0x68] sm:$0xff]  }
   0xf   :  { %v230_v61 = vadd.f32 %v1192_v7, %v159_v53  ;;  %v163_v63 = vmul.f32 %v832_v55, %v1178_v1  ;;  %v231_v3 = vadd.f32 %v1192_v7, %v160_v57  ;;  %v164_v5 = vmul.f32 %v833_v59, %v1178_v1 }
  0x10   :  { %v292_v2 = vmax.f32 %v228_v56, 0.0  ;;  %v232_v4 = vadd.f32 %v1192_v7, %v161_v58  ;;  %v293_v6 = vmax.f32 %v229_v60, 0.0  ;;  %v233_v9 = vadd.f32 %v1192_v7, %v162_v62  ;;  %v1103_v60 = vld [vmem:[%s1502_s0 + $0x70] sm:$0xff]  }
  0x11   :  { %v294_v8 = vmax.f32 %v230_v61, 0.0  ;;  %v234_v10 = vadd.f32 %v1192_v7, %v163_v63  ;;  %v295_v12 = vmax.f32 %v231_v3, 0.0  ;;  %v235_v14 = vadd.f32 %v1192_v7, %v164_v5 }
  0x12   :  { %v296_v13 = vmax.f32 %v232_v4, 0.0  ;;  %v836_v15 = vunpack.c.l.bf16 %v1097_v0  ;;  %v953_v17 = vpack.c.bf16 %v293_v6, %v292_v2  ;;  %v297_v18 = vmax.f32 %v233_v9, 0.0  ;;  %v1104_v2 = vld [vmem:[%s1502_s0 + $0x78] sm:$0xff]  }
  0x13   :  { %v298_v19 = vmax.f32 %v234_v10, 0.0  ;;  %v837_v20 = vunpack.c.h.bf16 %v1097_v0  ;;  %v958_v21 = vpack.c.bf16 %v295_v12, %v294_v8  ;;  %v299_v22 = vmax.f32 %v235_v14, 0.0  ;;  %v1105_v12 = vld [vmem:[%s1502_s0 + $0x80] sm:$0xff]  }
  0x14   :  { %v165_v23 = vmul.f32 %v836_v15, %v1178_v1  ;;  %v840_v24 = vunpack.c.l.bf16 %v1098_v11  ;;  %1124 = vst [vmem:[%s1505_s3 + $0x20] sm:$0xff] %v953_v17   ;;  %v963_v26 = vpack.c.bf16 %v297_v18, %v296_v13  ;;  %v841_v28 = vunpack.c.h.bf16 %v1098_v11 }
  0x15   :  { %v166_v27 = vmul.f32 %v837_v20, %v1178_v1  ;;  %v844_v29 = vunpack.c.l.bf16 %v1099_v16  ;;  %1125 = vst [vmem:[%s1505_s3 + $0x28] sm:$0xff] %v958_v21   ;;  %v968_v30 = vpack.c.bf16 %v299_v22, %v298_v19  ;;  %v845_v33 = vunpack.c.h.bf16 %v1099_v16 }
  0x16   :  { %v236_v31 = vadd.f32 %v1192_v7, %v165_v23  ;;  %v167_v32 = vmul.f32 %v840_v24, %v1178_v1  ;;  %1126 = vst [vmem:[%s1505_s3 + $0x30] sm:$0xff] %v963_v26   ;;  %v168_v35 = vmul.f32 %v841_v28, %v1178_v1  ;;  %v848_v37 = vunpack.c.l.bf16 %v1100_v25 }
  0x17   :  { %v237_v34 = vadd.f32 %v1192_v7, %v166_v27  ;;  %v169_v36 = vmul.f32 %v844_v29, %v1178_v1  ;;  %1127 = vst [vmem:[%s1505_s3 + $0x38] sm:$0xff] %v968_v30   ;;  %v170_v41 = vmul.f32 %v845_v33, %v1178_v1  ;;  %v849_v42 = vunpack.c.h.bf16 %v1100_v25  ;;  %v1106_v29 = vld [vmem:[%s1502_s0 + $0x88] sm:$0xff]  }
  0x18   :  { %v300_v39 = vmax.f32 %v236_v31, 0.0  ;;  %v238_v40 = vadd.f32 %v1192_v7, %v167_v32  ;;  %v239_v44 = vadd.f32 %v1192_v7, %v168_v35  ;;  %v171_v46 = vmul.f32 %v848_v37, %v1178_v1 }
  0x19   :  { %v301_v43 = vmax.f32 %v237_v34, 0.0  ;;  %v240_v45 = vadd.f32 %v1192_v7, %v169_v36  ;;  %v241_v48 = vadd.f32 %v1192_v7, %v170_v41  ;;  %v172_v49 = vmul.f32 %v849_v42, %v1178_v1  ;;  %v1107_v34 = vld [vmem:[%s1502_s0 + $0x90] sm:$0xff]  }
  0x1a   :  { %v302_v47 = vmax.f32 %v238_v40, 0.0  ;;  %v852_v50 = vunpack.c.l.bf16 %v1101_v38  ;;  %v303_v53 = vmax.f32 %v239_v44, 0.0  ;;  %v242_v55 = vadd.f32 %v1192_v7, %v171_v46 }
  0x1b   :  { %v973_v52 = vpack.c.bf16 %v301_v43, %v300_v39  ;;  %v304_v54 = vmax.f32 %v240_v45, 0.0  ;;  %v305_v56 = vmax.f32 %v241_v48, 0.0  ;;  %v243_v57 = vadd.f32 %v1192_v7, %v172_v49  ;;  %v1108_v43 = vld [vmem:[%s1502_s0 + $0x98] sm:$0xff]  }
  0x1c   :  { %v853_v58 = vunpack.c.h.bf16 %v1101_v38  ;;  %v173_v59 = vmul.f32 %v852_v50, %v1178_v1  ;;  %v978_v61 = vpack.c.bf16 %v303_v53, %v302_v47  ;;  %v306_v62 = vmax.f32 %v242_v55, 0.0 }
  0x1d   :  { %1128 = vst [vmem:[%s1505_s3 + $0x40] sm:$0xff] %v973_v52   ;;  %v856_v63 = vunpack.c.l.bf16 %v1102_v51  ;;  %v857_v0 = vunpack.c.h.bf16 %v1102_v51  ;;  %v983_v3 = vpack.c.bf16 %v305_v56, %v304_v54  ;;  %v307_v4 = vmax.f32 %v243_v57, 0.0  ;;  %v1109_v56 = vld [vmem:[%s1502_s0 + $0xa0] sm:$0xff]  }
  0x1e   :  { %v174_v5 = vmul.f32 %v853_v58, %v1178_v1  ;;  %v244_v6 = vadd.f32 %v1192_v7, %v173_v59  ;;  %1129 = vst [vmem:[%s1505_s3 + $0x48] sm:$0xff] %v978_v61   ;;  %v860_v10 = vunpack.c.l.bf16 %v1103_v60  ;;  %v861_v11 = vunpack.c.h.bf16 %v1103_v60 }
  0x1f   :  { %v175_v8 = vmul.f32 %v856_v63, %v1178_v1  ;;  %v176_v9 = vmul.f32 %v857_v0, %v1178_v1  ;;  %1130 = vst [vmem:[%s1505_s3 + $0x50] sm:$0xff] %v983_v3   ;;  %v988_v13 = vpack.c.bf16 %v307_v4, %v306_v62  ;;  %v864_v16 = vunpack.c.l.bf16 %v1104_v2 }
  0x20   :  { %v245_v14 = vadd.f32 %v1192_v7, %v174_v5  ;;  %v308_v15 = vmax.f32 %v244_v6, 0.0  ;;  %v177_v19 = vmul.f32 %v860_v10, %v1178_v1  ;;  %v178_v20 = vmul.f32 %v861_v11, %v1178_v1 }
  0x21   :  { %v246_v17 = vadd.f32 %v1192_v7, %v175_v8  ;;  %v247_v18 = vadd.f32 %v1192_v7, %v176_v9  ;;  %1131 = vst [vmem:[%s1505_s3 + $0x58] sm:$0xff] %v988_v13   ;;  %v865_v22 = vunpack.c.h.bf16 %v1104_v2  ;;  %v179_v23 = vmul.f32 %v864_v16, %v1178_v1  ;;  %v1110_v2 = vld [vmem:[%s1502_s0 + $0xa8] sm:$0xff]   ;;  %v1111_v16 = vld [vmem:[%s1502_s0 + $0xb0] sm:$0xff]  }
  0x22   :  { %v309_v21 = vmax.f32 %v245_v14, 0.0  ;;  %v868_v24 = vunpack.c.l.bf16 %v1105_v12  ;;  %v248_v27 = vadd.f32 %v1192_v7, %v177_v19  ;;  %v249_v28 = vadd.f32 %v1192_v7, %v178_v20 }
  0x23   :  { %v310_v25 = vmax.f32 %v246_v17, 0.0  ;;  %v311_v26 = vmax.f32 %v247_v18, 0.0  ;;  %v180_v31 = vmul.f32 %v865_v22, %v1178_v1  ;;  %v250_v32 = vadd.f32 %v1192_v7, %v179_v23 }
  0x24   :  { %v993_v30 = vpack.c.bf16 %v309_v21, %v308_v15  ;;  %v869_v33 = vunpack.c.h.bf16 %v1105_v12  ;;  %v312_v36 = vmax.f32 %v248_v27, 0.0  ;;  %v313_v37 = vmax.f32 %v249_v28, 0.0  ;;  %v1112_v21 = vld [vmem:[%s1502_s0 + $0xb8] sm:$0xff]  }
  0x25   :  { %v998_v35 = vpack.c.bf16 %v311_v26, %v310_v25  ;;  %v181_v38 = vmul.f32 %v868_v24, %v1178_v1  ;;  %v251_v39 = vadd.f32 %v1192_v7, %v180_v31  ;;  %v314_v40 = vmax.f32 %v250_v32, 0.0 }
  0x26   :  { %1132 = vst [vmem:[%s1505_s3 + $0x60] sm:$0xff] %v993_v30   ;;  %v182_v41 = vmul.f32 %v869_v33, %v1178_v1  ;;  %v872_v42 = vunpack.c.l.bf16 %v1106_v29  ;;  %v1003_v44 = vpack.c.bf16 %v313_v37, %v312_v36  ;;  %v873_v46 = vunpack.c.h.bf16 %v1106_v29 }
  0x27   :  { %1133 = vst [vmem:[%s1505_s3 + $0x68] sm:$0xff] %v998_v35   ;;  %v252_v45 = vadd.f32 %v1192_v7, %v181_v38  ;;  %v876_v47 = vunpack.c.l.bf16 %v1107_v34  ;;  %v315_v48 = vmax.f32 %v251_v39, 0.0  ;;  %v877_v51 = vunpack.c.h.bf16 %v1107_v34  ;;  %v1113_v34 = vld [vmem:[%s1502_s0 + $0xc0] sm:$0xff]  }
  0x28   :  { %v253_v49 = vadd.f32 %v1192_v7, %v182_v41  ;;  %v183_v50 = vmul.f32 %v872_v42, %v1178_v1  ;;  %1134 = vst [vmem:[%s1505_s3 + $0x70] sm:$0xff] %v1003_v44   ;;  %v184_v53 = vmul.f32 %v873_v46, %v1178_v1  ;;  %v880_v55 = vunpack.c.l.bf16 %v1108_v43 }
  0x29   :  { %v316_v52 = vmax.f32 %v252_v45, 0.0  ;;  %v185_v54 = vmul.f32 %v876_v47, %v1178_v1  ;;  %v1008_v57 = vpack.c.bf16 %v315_v48, %v314_v40  ;;  %v186_v60 = vmul.f32 %v877_v51, %v1178_v1  ;;  %v1114_v47 = vld [vmem:[%s1502_s0 + $0xc8] sm:$0xff]  }
  0x2a   :  { %v317_v58 = vmax.f32 %v253_v49, 0.0  ;;  %v254_v59 = vadd.f32 %v1192_v7, %v183_v50  ;;  %v255_v61 = vadd.f32 %v1192_v7, %v184_v53  ;;  %v881_v63 = vunpack.c.h.bf16 %v1108_v43 }
  0x2b   :  { %v256_v62 = vadd.f32 %v1192_v7, %v185_v54  ;;  %v187_v0 = vmul.f32 %v880_v55, %v1178_v1  ;;  %1135 = vst [vmem:[%s1505_s3 + $0x78] sm:$0xff] %v1008_v57   ;;  %v257_v5 = vadd.f32 %v1192_v7, %v186_v60  ;;  %v884_v6 = vunpack.c.l.bf16 %v1109_v56 }
  0x2c   :  { %v1013_v3 = vpack.c.bf16 %v317_v58, %v316_v52  ;;  %v318_v4 = vmax.f32 %v254_v59, 0.0  ;;  %v319_v8 = vmax.f32 %v255_v61, 0.0  ;;  %v188_v10 = vmul.f32 %v881_v63, %v1178_v1  ;;  %v1115_v52 = vld [vmem:[%s1502_s0 + $0xd0] sm:$0xff]   ;;  %v1116_v61 = vld [vmem:[%s1502_s0 + $0xd8] sm:$0xff]  }
  0x2d   :  { %v320_v9 = vmax.f32 %v256_v62, 0.0  ;;  %v258_v11 = vadd.f32 %v1192_v7, %v187_v0  ;;  %v321_v12 = vmax.f32 %v257_v5, 0.0  ;;  %v885_v13 = vunpack.c.h.bf16 %v1109_v56 }
  0x2e   :  { %1136 = vst [vmem:[%s1505_s3 + $0x80] sm:$0xff] %v1013_v3   ;;  %v189_v14 = vmul.f32 %v884_v6, %v1178_v1  ;;  %v888_v15 = vunpack.c.l.bf16 %v1110_v2  ;;  %v1018_v17 = vpack.c.bf16 %v319_v8, %v318_v4  ;;  %v259_v18 = vadd.f32 %v1192_v7, %v188_v10 }
  0x2f   :  { %v322_v19 = vmax.f32 %v258_v11, 0.0  ;;  %v889_v20 = vunpack.c.h.bf16 %v1110_v2  ;;  %v1023_v22 = vpack.c.bf16 %v321_v12, %v320_v9  ;;  %v190_v23 = vmul.f32 %v885_v13, %v1178_v1  ;;  %v1117_v12 = vld [vmem:[%s1502_s0 + $0xe0] sm:$0xff]  }
  0x30   :  { %v260_v24 = vadd.f32 %v1192_v7, %v189_v14  ;;  %v191_v25 = vmul.f32 %v888_v15, %v1178_v1  ;;  %1137 = vst [vmem:[%s1505_s3 + $0x88] sm:$0xff] %v1018_v17   ;;  %v323_v26 = vmax.f32 %v259_v18, 0.0  ;;  %v892_v28 = vunpack.c.l.bf16 %v1111_v16 }
  0x31   :  { %v192_v27 = vmul.f32 %v889_v20, %v1178_v1  ;;  %v893_v29 = vunpack.c.h.bf16 %v1111_v16  ;;  %1138 = vst [vmem:[%s1505_s3 + $0x90] sm:$0xff] %v1023_v22   ;;  %v261_v30 = vadd.f32 %v1192_v7, %v190_v23  ;;  %v896_v33 = vunpack.c.l.bf16 %v1112_v21 }
  0x32   :  { %v324_v31 = vmax.f32 %v260_v24, 0.0  ;;  %v262_v32 = vadd.f32 %v1192_v7, %v191_v25  ;;  %v1028_v35 = vpack.c.bf16 %v323_v26, %v322_v19  ;;  %v193_v37 = vmul.f32 %v892_v28, %v1178_v1 }
  0x33   :  { %v263_v36 = vadd.f32 %v1192_v7, %v192_v27  ;;  %v194_v38 = vmul.f32 %v893_v29, %v1178_v1  ;;  %v325_v39 = vmax.f32 %v261_v30, 0.0  ;;  %v897_v41 = vunpack.c.h.bf16 %v1112_v21  ;;  %v1118_v21 = vld [vmem:[%s1502_s0 + $0xe8] sm:$0xff]  }
  0x34   :  { %v326_v40 = vmax.f32 %v262_v32, 0.0  ;;  %v195_v42 = vmul.f32 %v896_v33, %v1178_v1  ;;  %1139 = vst [vmem:[%s1505_s3 + $0x98] sm:$0xff] %v1028_v35   ;;  %v264_v44 = vadd.f32 %v1192_v7, %v193_v37  ;;  %v900_v46 = vunpack.c.l.bf16 %v1113_v34 }
  0x35   :  { %v327_v43 = vmax.f32 %v263_v36, 0.0  ;;  %v265_v45 = vadd.f32 %v1192_v7, %v194_v38  ;;  %v1033_v48 = vpack.c.bf16 %v325_v39, %v324_v31  ;;  %v196_v49 = vmul.f32 %v897_v41, %v1178_v1  ;;  %v1120_v39 = vld [vmem:[%s1502_s0 + $0xf8] sm:$0xff]  }
  0x36   :  { %v266_v50 = vadd.f32 %v1192_v7, %v195_v42  ;;  %v901_v51 = vunpack.c.h.bf16 %v1113_v34  ;;  %v328_v54 = vmax.f32 %v264_v44, 0.0  ;;  %v197_v56 = vmul.f32 %v900_v46, %v1178_v1  ;;  %v1119_v34 = vld [vmem:[%s1502_s0 + $0xf0] sm:$0xff]  }
  0x37   :  { %v1038_v53 = vpack.c.bf16 %v327_v43, %v326_v40  ;;  %v329_v55 = vmax.f32 %v265_v45, 0.0  ;;  %1140 = vst [vmem:[%s1505_s3 + $0xa0] sm:$0xff] %v1033_v48   ;;  %v267_v57 = vadd.f32 %v1192_v7, %v196_v49  ;;  %v904_v60 = vunpack.c.l.bf16 %v1114_v47 }
  0x38   :  { %v330_v58 = vmax.f32 %v266_v50, 0.0  ;;  %v198_v59 = vmul.f32 %v901_v51, %v1178_v1  ;;  %v268_v63 = vadd.f32 %v1192_v7, %v197_v56  ;;  %v905_v0 = vunpack.c.h.bf16 %v1114_v47 }
  0x39   :  { %1141 = vst [vmem:[%s1505_s3 + $0xa8] sm:$0xff] %v1038_v53   ;;  %v1043_v62 = vpack.c.bf16 %v329_v55, %v328_v54  ;;  %v908_v2 = vunpack.c.l.bf16 %v1115_v52  ;;  %v331_v3 = vmax.f32 %v267_v57, 0.0  ;;  %v199_v5 = vmul.f32 %v904_v60, %v1178_v1 }
  0x3a   :  { %v269_v4 = vadd.f32 %v1192_v7, %v198_v59  ;;  %v909_v6 = vunpack.c.h.bf16 %v1115_v52  ;;  %v332_v8 = vmax.f32 %v268_v63, 0.0  ;;  %v200_v9 = vmul.f32 %v905_v0, %v1178_v1 }
  0x3b   :  { %1142 = vst [vmem:[%s1505_s3 + $0xb0] sm:$0xff] %v1043_v62   ;;  %v201_v10 = vmul.f32 %v908_v2, %v1178_v1  ;;  %v912_v11 = vunpack.c.l.bf16 %v1116_v61  ;;  %v1048_v13 = vpack.c.bf16 %v331_v3, %v330_v58  ;;  %v270_v15 = vadd.f32 %v1192_v7, %v199_v5 }
  0x3c   :  { %v333_v14 = vmax.f32 %v269_v4, 0.0  ;;  %v202_v16 = vmul.f32 %v909_v6, %v1178_v1  ;;  %v271_v17 = vadd.f32 %v1192_v7, %v200_v9  ;;  %v913_v19 = vunpack.c.h.bf16 %v1116_v61 }
  0x3d   :  { %v272_v18 = vadd.f32 %v1192_v7, %v201_v10  ;;  %v203_v20 = vmul.f32 %v912_v11, %v1178_v1  ;;  %1143 = vst [vmem:[%s1505_s3 + $0xb8] sm:$0xff] %v1048_v13   ;;  %v334_v23 = vmax.f32 %v270_v15, 0.0  ;;  %v916_v25 = vunpack.c.l.bf16 %v1117_v12 }
  0x3e   :  { %v1053_v22 = vpack.c.bf16 %v333_v14, %v332_v8  ;;  %v273_v24 = vadd.f32 %v1192_v7, %v202_v16  ;;  %v335_v26 = vmax.f32 %v271_v17, 0.0  ;;  %v204_v28 = vmul.f32 %v913_v19, %v1178_v1 }
  0x3f   :  { %v336_v27 = vmax.f32 %v272_v18, 0.0  ;;  %v274_v29 = vadd.f32 %v1192_v7, %v203_v20  ;;  %v917_v31 = vunpack.c.h.bf16 %v1117_v12  ;;  %v205_v32 = vmul.f32 %v916_v25, %v1178_v1 }
  0x40   :  { %1144 = vst [vmem:[%s1505_s3 + $0xc0] sm:$0xff] %v1053_v22   ;;  %v337_v30 = vmax.f32 %v273_v24, 0.0  ;;  %v920_v33 = vunpack.c.l.bf16 %v1118_v21  ;;  %v1058_v35 = vpack.c.bf16 %v335_v26, %v334_v23  ;;  %v275_v36 = vadd.f32 %v1192_v7, %v204_v28 }
  0x41   :  { %v338_v37 = vmax.f32 %v274_v29, 0.0  ;;  %v921_v38 = vunpack.c.h.bf16 %v1118_v21  ;;  %v206_v41 = vmul.f32 %v917_v31, %v1178_v1  ;;  %v276_v42 = vadd.f32 %v1192_v7, %v205_v32 }
  0x42   :  { %v1063_v40 = vpack.c.bf16 %v337_v30, %v336_v27  ;;  %v207_v43 = vmul.f32 %v920_v33, %v1178_v1  ;;  %1145 = vst [vmem:[%s1505_s3 + $0xc8] sm:$0xff] %v1058_v35   ;;  %v339_v44 = vmax.f32 %v275_v36, 0.0  ;;  %v924_v46 = vunpack.c.l.bf16 %v1119_v34 }
  0x43   :  { %v208_v45 = vmul.f32 %v921_v38, %v1178_v1  ;;  %v925_v47 = vunpack.c.h.bf16 %v1119_v34  ;;  %v277_v48 = vadd.f32 %v1192_v7, %v206_v41  ;;  %v340_v49 = vmax.f32 %v276_v42, 0.0 }
  0x44   :  { %1146 = vst [vmem:[%s1505_s3 + $0xd0] sm:$0xff] %v1063_v40   ;;  %v278_v50 = vadd.f32 %v1192_v7, %v207_v43  ;;  %v928_v51 = vunpack.c.l.bf16 %v1120_v39  ;;  %v1068_v52 = vpack.c.bf16 %v339_v44, %v338_v37  ;;  %v209_v54 = vmul.f32 %v924_v46, %v1178_v1 }
  0x45   :  { %v279_v53 = vadd.f32 %v1192_v7, %v208_v45  ;;  %v210_v55 = vmul.f32 %v925_v47, %v1178_v1  ;;  %v341_v56 = vmax.f32 %v277_v48, 0.0  ;;  %v929_v58 = vunpack.c.h.bf16 %v1120_v39 }
  0x46   :  { %v342_v57 = vmax.f32 %v278_v50, 0.0  ;;  %v211_v59 = vmul.f32 %v928_v51, %v1178_v1  ;;  %1147 = vst [vmem:[%s1505_s3 + $0xd8] sm:$0xff] %v1068_v52   ;;  %v280_v61 = vadd.f32 %v1192_v7, %v209_v54 }
  0x47   :  { %v343_v60 = vmax.f32 %v279_v53, 0.0  ;;  %v281_v62 = vadd.f32 %v1192_v7, %v210_v55  ;;  %v1073_v63 = vpack.c.bf16 %v341_v56, %v340_v49  ;;  %v212_v0 = vmul.f32 %v929_v58, %v1178_v1 }
  0x48   :  { %v282_v2 = vadd.f32 %v1192_v7, %v211_v59  ;;  %v344_v4 = vmax.f32 %v280_v61, 0.0 }
  0x49   :  { %v1078_v3 = vpack.c.bf16 %v343_v60, %v342_v57  ;;  %v345_v5 = vmax.f32 %v281_v62, 0.0  ;;  %1148 = vst [vmem:[%s1505_s3 + $0xe0] sm:$0xff] %v1073_v63   ;;  %v283_v6 = vadd.f32 %v1192_v7, %v212_v0 }
  0x4a   :  { %v346_v8 = vmax.f32 %v282_v2, 0.0 }
  0x4b   :  { %1149 = vst [vmem:[%s1505_s3 + $0xe8] sm:$0xff] %v1078_v3   ;;  %v1083_v9 = vpack.c.bf16 %v345_v5, %v344_v4  ;;  %v347_v10 = vmax.f32 %v283_v6, 0.0 }
  0x4d   :  { %1150 = vst [vmem:[%s1505_s3 + $0xf0] sm:$0xff] %v1083_v9   ;;  %v1088_v1 = vpack.c.bf16 %v347_v10, %v346_v8 }
  0x4f   :  { %1151 = vst [vmem:[%s1505_s3 + $0xf8] sm:$0xff] %v1088_v1  }

// kernel: bottleneck_forward.6
= control target key start
LH: loop header
LB: loop body
LE: loop exit
PB: predicated region body
PF: predicated region fallthrough
CT: control target
= control target key end

     0   :  { %s1779_s21 = smov 0   ;;  %s1781_s22 = smov 0   ;;  %s1974_s0 = inlined_call_operand.vmem [shape: bf16[512,128], index: 0, kind: input, shape index: {}]   ;;  %s1975_s1 = inlined_call_operand.vmem [shape: bf16[128,128], index: 1, kind: input, shape index: {}]   ;;  %s1976_s2 = inlined_call_operand.vmem [shape: f32[1,128], index: 2, kind: input, shape index: {}]   ;;  %s1977_s3 = inlined_call_operand.vmem [shape: f32[1,128], index: 3, kind: input, shape index: {}]   ;;  %s1978_s4 = inlined_call_operand.vmem [shape: bf16[512,128], index: 4, kind: output, shape index: {0}]   ;;  %s1979_s5 = inlined_call_operand.vmem [shape: f32[16,128], index: 5, kind: output, shape index: {1}]   ;;  %s1980_s6 = inlined_call_operand.vmem [shape: f32[16,128], index: 6, kind: output, shape index: {2}]  }
   0x1   :  { %s1783_s23 = smov 0  }
   0x2 LB: > { %s36_s2 = sadd.s32 1, %s1738_s22  ;;  %p1392_p0 = scmp.ge.s32.totalorder %s1742_s23, 1  ;;  %s1742_s23 = sphi %s1783_s23, %s17_s23   ;;  %s1738_s22 = sphi %s1781_s22, %s1982_s22   ;;  %s1734_s21 = sphi %s1779_s21, %s1981_s21  }
   0x3   : > { %p38_p1 = scmp.ge.s32.totalorder %s36_s2, 2  ;;  %p280_p2 = scmp.lt.s32.totalorder %s1742_s23, 3 }
   0x5   : > { %s1984_s2 = smov (%p38_p1, %s36_s2), 0  ;;  %p281_p3 = pnand %p1392_p0, %p280_p2 }
   0x6   : > { %v1696_v0 = vld [vmem:[%s1975_s1] sm:$0xff] (!%p281_p3)   ;;  %s1393_s25 = sshll.u32 (!%p281_p3), %s1734_s21, 5  ;;  %v1697_v1 = vld [vmem:[%s1975_s1 + $0x8] sm:$0xff] (!%p281_p3)   ;;  %v1698_v2 = vld [vmem:[%s1975_s1 + $0x10] sm:$0xff] (!%p281_p3)   ;;  %p377_p5 = scmp.lt.s32.totalorder (!%p281_p3), %s1734_s21, 1 }
   0x7   : > { %284 = sbr.rel (%p281_p3) target bundleno = 331 (0x14b), region = 36  ;;  %p345_p4 = scmp.lt.s32.totalorder (!%p281_p3), %s1393_s25, 63  ;;  %1608 = vmatprep.subr.bf16.mxu0 (!%p281_p3), %v1696_v0  ;;  %1656 = vmatprep.subr.bf16.mxu1 (!%p281_p3), %v1696_v0  ;;  %v1699_v3 = vld [vmem:[%s1975_s1 + $0x18] sm:$0xff] (!%p281_p3)   ;;  %v1700_v5 = vld [vmem:[%s1975_s1 + $0x20] sm:$0xff] (!%p281_p3)   ;;  %v1701_v6 = vld [vmem:[%s1975_s1 + $0x28] sm:$0xff] (!%p281_p3)  }
   0x8   : > { %1609 = vmatpush3.bf16.msra.mxu0 (!%p281_p3), %v1696_v0  ;;  %1664 = vmatpush3.bf16.msra.mxu1 (!%p281_p3), %v1696_v0  ;;  %v1702_v8 = vld [vmem:[%s1975_s1 + $0x30] sm:$0xff] (!%p281_p3)   ;;  %v1703_v9 = vld [vmem:[%s1975_s1 + $0x38] sm:$0xff] (!%p281_p3)  }
   0x9   : > { %1610 = vmatprep.subr.bf16.mxu0 (!%p281_p3), %v1697_v1  ;;  %1657 = vmatprep.subr.bf16.mxu1 (!%p281_p3), %v1697_v1 }
   0xc   : > { %1611 = vmatpush3.bf16.msra.mxu0 (!%p281_p3), %v1697_v1  ;;  %1665 = vmatpush3.bf16.msra.mxu1 (!%p281_p3), %v1697_v1 }
   0xd   : > { %1612 = vmatprep.subr.bf16.mxu0 (!%p281_p3), %v1698_v2  ;;  %1658 = vmatprep.subr.bf16.mxu1 (!%p281_p3), %v1698_v2 }
   0xe   : > { %s1986_s25 = smov (!%p345_p4, %s1393_s25), 63  ;;  %s1988_s21 = smov (!%p377_p5, %s1734_s21), 1 }
   0xf   : > { %s1394_s30 = sshll.u32 %s1986_s25, 2  ;;  %s1397_s25 = sshll.u32 %s1988_s21, 3 }
  0x10   : > { %s1817_s9 = scalar_lea.vmem %s1974_s0, %s1394_s30  ;;  %1613 = vmatpush3.bf16.msra.mxu0 %v1698_v2  ;;  %1666 = vmatpush3.bf16.msra.mxu1 %v1698_v2  ;;  %s1859_s24 = scalar_lea.vmem %s1978_s4, %s1394_s30 }
  0x11   : > { %v1704_v4 = vld [vmem:[%s1817_s9] sm:$0xff]   ;;  %1614 = vmatprep.subr.bf16.mxu0 %v1699_v3  ;;  %1659 = vmatprep.subr.bf16.mxu1 %v1699_v3  ;;  %v1705_v10 = vld [vmem:[%s1817_s9 + $0x8] sm:$0xff]   ;;  %v1706_v12 = vld [vmem:[%s1817_s9 + $0x10] sm:$0xff]   ;;  %s383_s28 = scalar_lea.vmem %s1979_s5, %s1397_s25  ;;  %s390_s7 = scalar_lea.vmem %s1980_s6, %s1397_s25 }
  0x12   : > { %1624 = vmatprep.mubr.bf16.mxu0 %v1704_v4  ;;  %v1712_v7 = vld [vmem:[%s1817_s9 + $0x40] sm:$0xff]   ;;  %v1713_v11 = vld [vmem:[%s1817_s9 + $0x48] sm:$0xff]   ;;  %v1714_v13 = vld [vmem:[%s1817_s9 + $0x50] sm:$0xff]  }
  0x13   : > { %1640 = vmatprep.mubr.bf16.mxu1 %v1712_v7  ;;  %v1707_v14 = vld [vmem:[%s1817_s9 + $0x18] sm:$0xff]   ;;  %v1708_v16 = vld [vmem:[%s1817_s9 + $0x20] sm:$0xff]   ;;  %v1709_v18 = vld [vmem:[%s1817_s9 + $0x28] sm:$0xff]  }
  0x14   : > { %1615 = vmatpush3.bf16.msra.mxu0 %v1699_v3  ;;  %1667 = vmatpush3.bf16.msra.mxu1 %v1699_v3  ;;  %v1715_v15 = vld [vmem:[%s1817_s9 + $0x58] sm:$0xff]   ;;  %v1716_v17 = vld [vmem:[%s1817_s9 + $0x60] sm:$0xff]   ;;  %v1717_v19 = vld [vmem:[%s1817_s9 + $0x68] sm:$0xff]  }
  0x15   : > { %1616 = vmatprep.subr.bf16.mxu0 %v1700_v5  ;;  %1660 = vmatprep.subr.bf16.mxu1 %v1700_v5  ;;  %v1710_v20 = vld [vmem:[%s1817_s9 + $0x30] sm:$0xff]   ;;  %v1711_v22 = vld [vmem:[%s1817_s9 + $0x38] sm:$0xff]  }
  0x16   : > { %v1718_v21 = vld [vmem:[%s1817_s9 + $0x70] sm:$0xff]   ;;  %v1719_v23 = vld [vmem:[%s1817_s9 + $0x78] sm:$0xff]  }
  0x18   : > { %1617 = vmatpush3.bf16.msra.mxu0 %v1700_v5  ;;  %1668 = vmatpush3.bf16.msra.mxu1 %v1700_v5 }
  0x19   : > { %1618 = vmatprep.subr.bf16.mxu0 %v1701_v6  ;;  %1661 = vmatprep.subr.bf16.mxu1 %v1701_v6 }
  0x1c   : > { %1619 = vmatpush3.bf16.msra.mxu0 %v1701_v6  ;;  %1669 = vmatpush3.bf16.msra.mxu1 %v1701_v6 }
  0x1d   : > { %1620 = vmatprep.subr.bf16.mxu0 %v1702_v8  ;;  %1662 = vmatprep.subr.bf16.mxu1 %v1702_v8 }
  0x20   : > { %1621 = vmatpush3.bf16.msra.mxu0 %v1702_v8  ;;  %1670 = vmatpush3.bf16.msra.mxu1 %v1702_v8 }
  0x21   : > { %1622 = vmatprep.subr.bf16.mxu0 %v1703_v9  ;;  %1663 = vmatprep.subr.bf16.mxu1 %v1703_v9 }
  0x24   : > { %1623 = vmatpush3.bf16.msra.mxu0 %v1703_v9  ;;  %1671 = vmatpush3.bf16.msra.mxu1 %v1703_v9 }
  0x27   : > { %1625 = vmatmul.mubr.bf16.vlgmr.msra.gmra.mrb[0].mxu0 %v1705_v10  ;;  %1641 = vmatmul.mubr.bf16.vlgmr.msra.gmra.mrb[0].mxu1 %v1713_v11 }
  0x28   : > { %1628 = vmatprep.mubr.bf16.mxu0 %v1706_v12  ;;  %1644 = vmatprep.mubr.bf16.mxu1 %v1714_v13 }
  0x2f   : > { %1629 = vmatmul.mubr.bf16.gmra.mrb[4].mxu0 %v1707_v14  ;;  %1645 = vmatmul.mubr.bf16.gmra.mrb[4].mxu1 %v1715_v15 }
  0x30   : > { %1632 = vmatprep.mubr.bf16.mxu0 %v1708_v16  ;;  %1648 = vmatprep.mubr.bf16.mxu1 %v1716_v17 }
  0x37   : > { %1633 = vmatmul.mubr.bf16.gmra.mrb[8].mxu0 %v1709_v18  ;;  %1649 = vmatmul.mubr.bf16.gmra.mrb[8].mxu1 %v1717_v19 }
  0x38   : > { %1636 = vmatprep.mubr.bf16.mxu0 %v1710_v20  ;;  %1652 = vmatprep.mubr.bf16.mxu1 %v1718_v21 }
  0x3f   : > { %1637 = vmatmul.mubr.bf16.gmra.mrb[12].mxu0 %v1711_v22  ;;  %1653 = vmatmul.mubr.bf16.gmra.mrb[12].mxu1 %v1719_v23 }
  0xfa   : > { %v1626_v24 = vpop.f32.mrb[0].mxu0  ;;  %v1850_v25 = vpop.f32.mrb[0].mxu1 }
  0xfb   : > { %v686_v26 = vpop.f32.mrb[1].mxu0  ;;  %v1852_v27 = vpop.f32.mrb[1].mxu1  ;;  %v1111_v39 = vmul.f32 %v1626_v24, %v1626_v24 }
  0xfc   : > { %v1627_v28 = vpop.f32.mrb[2].mxu0  ;;  %v1861_v29 = vpop.f32.mrb[2].mxu1  ;;  %v1109_v30 = vmul.f32 %v686_v26, %v686_v26 }
  0xfd   : > { %v1497_v31 = vpack.c.bf16 %v1627_v28, %v1626_v24  ;;  %v689_v32 = vpop.f32.mrb[3].mxu0  ;;  %v1537_v33 = vpack.c.bf16 %v1861_v29, %v1850_v25  ;;  %v1865_v34 = vpop.f32.mrb[3].mxu1  ;;  %v1112_v42 = vmul.f32 %v1627_v28, %v1627_v28 }
  0xfe   : > { %v1492_v35 = vpack.c.bf16 %v689_v32, %v686_v26  ;;  %v1072_v36 = vadd.f32 %v689_v32, %v686_v26  ;;  %v1110_v37 = vmul.f32 %v689_v32, %v689_v32  ;;  %v1532_v38 = vpack.c.bf16 %v1865_v34, %v1852_v27 }
  0xff   : > { %1569 = vst [vmem:[%s1859_s24 + $0x8] sm:$0xff] %v1497_v31   ;;  %1577 = vst [vmem:[%s1859_s24 + $0x48] sm:$0xff] %v1537_v33  }
 0x100   : > { %1493 = vst [vmem:[%s1859_s24] sm:$0xff] %v1492_v35   ;;  %v1073_v40 = vadd.f32 %v1626_v24, %v1072_v36  ;;  %v1141_v41 = vadd.f32 %v1110_v37, %v1109_v30  ;;  %1576 = vst [vmem:[%s1859_s24 + $0x40] sm:$0xff] %v1532_v38  }
 0x102   : > { %v1142_v43 = vadd.f32 %v1141_v41, %v1111_v39  ;;  %v1630_v44 = vpop.f32.mrb[4].mxu0  ;;  %v1074_v45 = vadd.f32 %v1627_v28, %v1073_v40  ;;  %v1873_v46 = vpop.f32.mrb[4].mxu1 }
 0x103   : > { %v702_v47 = vpop.f32.mrb[5].mxu0  ;;  %v1875_v48 = vpop.f32.mrb[5].mxu1  ;;  %v1115_v63 = vmul.f32 %v1630_v44, %v1630_v44 }
 0x104   : > { %v1075_v49 = vadd.f32 %v1074_v45, %v702_v47  ;;  %v1113_v50 = vmul.f32 %v702_v47, %v702_v47  ;;  %v1143_v51 = vadd.f32 %v1142_v43, %v1112_v42  ;;  %v1631_v52 = vpop.f32.mrb[6].mxu0  ;;  %v1877_v53 = vpop.f32.mrb[6].mxu1 }
 0x105   : > { %v1507_v54 = vpack.c.bf16 %v1631_v52, %v1630_v44  ;;  %v705_v55 = vpop.f32.mrb[7].mxu0  ;;  %v1547_v56 = vpack.c.bf16 %v1877_v53, %v1873_v46  ;;  %v1881_v57 = vpop.f32.mrb[7].mxu1  ;;  %v1116_v2 = vmul.f32 %v1631_v52, %v1631_v52 }
 0x106   : > { %v1144_v58 = vadd.f32 %v1143_v51, %v1113_v50  ;;  %v1502_v59 = vpack.c.bf16 %v705_v55, %v702_v47  ;;  %v1076_v60 = vadd.f32 %v1075_v49, %v705_v55  ;;  %v1114_v61 = vmul.f32 %v705_v55, %v705_v55 }
 0x107   : > { %1571 = vst [vmem:[%s1859_s24 + $0x18] sm:$0xff] %v1507_v54   ;;  %1579 = vst [vmem:[%s1859_s24 + $0x58] sm:$0xff] %v1547_v56   ;;  %v1542_v62 = vpack.c.bf16 %v1881_v57, %v1875_v48 }
 0x108   : > { %1570 = vst [vmem:[%s1859_s24 + $0x10] sm:$0xff] %v1502_v59   ;;  %v1077_v0 = vadd.f32 %v1630_v44, %v1076_v60  ;;  %v1145_v1 = vadd.f32 %v1144_v58, %v1114_v61  ;;  %v1125_v61 = vmul.f32 %v1852_v27, %v1852_v27 }
 0x109   : > { %1578 = vst [vmem:[%s1859_s24 + $0x50] sm:$0xff] %v1542_v62  }
 0x10a   : > { %v1146_v3 = vadd.f32 %v1145_v1, %v1115_v63  ;;  %v1634_v4 = vpop.f32.mrb[8].mxu0  ;;  %v1078_v5 = vadd.f32 %v1631_v52, %v1077_v0  ;;  %v1889_v6 = vpop.f32.mrb[8].mxu1 }
 0x10b   : > { %v718_v7 = vpop.f32.mrb[9].mxu0  ;;  %v1891_v8 = vpop.f32.mrb[9].mxu1  ;;  %v1119_v23 = vmul.f32 %v1634_v4, %v1634_v4 }
 0x10c   : > { %v1079_v9 = vadd.f32 %v1078_v5, %v718_v7  ;;  %v1117_v10 = vmul.f32 %v718_v7, %v718_v7  ;;  %v1147_v11 = vadd.f32 %v1146_v3, %v1116_v2  ;;  %v1635_v12 = vpop.f32.mrb[10].mxu0  ;;  %v1893_v13 = vpop.f32.mrb[10].mxu1  ;;  %v1126_v2 = vmul.f32 %v1865_v34, %v1865_v34 }
 0x10d   : > { %v1517_v14 = vpack.c.bf16 %v1635_v12, %v1634_v4  ;;  %v721_v15 = vpop.f32.mrb[11].mxu0  ;;  %v1557_v16 = vpack.c.bf16 %v1893_v13, %v1889_v6  ;;  %v1897_v17 = vpop.f32.mrb[11].mxu1  ;;  %v1120_v28 = vmul.f32 %v1635_v12, %v1635_v12  ;;  %v1127_v3 = vmul.f32 %v1850_v25, %v1850_v25 }
 0x10e   : > { %v1148_v18 = vadd.f32 %v1147_v11, %v1117_v10  ;;  %v1512_v19 = vpack.c.bf16 %v721_v15, %v718_v7  ;;  %v1080_v20 = vadd.f32 %v1079_v9, %v721_v15  ;;  %v1118_v21 = vmul.f32 %v721_v15, %v721_v15 }
 0x10f   : > { %1573 = vst [vmem:[%s1859_s24 + $0x28] sm:$0xff] %v1517_v14   ;;  %1581 = vst [vmem:[%s1859_s24 + $0x68] sm:$0xff] %v1557_v16   ;;  %v1552_v22 = vpack.c.bf16 %v1897_v17, %v1891_v8  ;;  %v1128_v7 = vmul.f32 %v1861_v29, %v1861_v29  ;;  %v1130_v15 = vmul.f32 %v1881_v57, %v1881_v57 }
 0x110   : > { %1572 = vst [vmem:[%s1859_s24 + $0x20] sm:$0xff] %v1512_v19   ;;  %v1081_v24 = vadd.f32 %v1634_v4, %v1080_v20  ;;  %v1149_v26 = vadd.f32 %v1148_v18, %v1118_v21 }
 0x111   : > { %1580 = vst [vmem:[%s1859_s24 + $0x60] sm:$0xff] %v1552_v22  }
 0x112   : > { %v1150_v30 = vadd.f32 %v1149_v26, %v1119_v23  ;;  %v1638_v31 = vpop.f32.mrb[12].mxu0  ;;  %v1082_v32 = vadd.f32 %v1635_v12, %v1081_v24  ;;  %v1905_v33 = vpop.f32.mrb[12].mxu1  ;;  %v1134_v24 = vmul.f32 %v1897_v17, %v1897_v17 }
 0x113   : > { %v734_v35 = vpop.f32.mrb[13].mxu0  ;;  %v798_v36 = vpop.f32.mrb[13].mxu1  ;;  %v1123_v54 = vmul.f32 %v1638_v31, %v1638_v31 }
 0x114   : > { %v1083_v37 = vadd.f32 %v1082_v32, %v734_v35  ;;  %v1121_v38 = vmul.f32 %v734_v35, %v734_v35  ;;  %v1151_v39 = vadd.f32 %v1150_v30, %v1120_v28  ;;  %v1639_v40 = vpop.f32.mrb[14].mxu0  ;;  %v1907_v41 = vpop.f32.mrb[14].mxu1 }
 0x115   : > { %v1527_v42 = vpack.c.bf16 %v1639_v40, %v1638_v31  ;;  %v737_v43 = vpop.f32.mrb[15].mxu0  ;;  %v1567_v44 = vpack.c.bf16 %v1907_v41, %v1905_v33  ;;  %v801_v45 = vpop.f32.mrb[15].mxu1  ;;  %v1124_v58 = vmul.f32 %v1639_v40, %v1639_v40 }
 0x116   : > { %v1152_v47 = vadd.f32 %v1151_v39, %v1121_v38  ;;  %v1522_v49 = vpack.c.bf16 %v737_v43, %v734_v35  ;;  %v1084_v50 = vadd.f32 %v1083_v37, %v737_v43  ;;  %v1122_v51 = vmul.f32 %v737_v43, %v737_v43 }
 0x117   : > { %1575 = vst [vmem:[%s1859_s24 + $0x38] sm:$0xff] %v1527_v42   ;;  %1583 = vst [vmem:[%s1859_s24 + $0x78] sm:$0xff] %v1567_v44   ;;  %v1562_v52 = vpack.c.bf16 %v801_v45, %v798_v36  ;;  %v1139_v39 = vmul.f32 %v1905_v33, %v1905_v33  ;;  %v1140_v42 = vmul.f32 %v1907_v41, %v1907_v41 }
 0x118   : > { %1574 = vst [vmem:[%s1859_s24 + $0x30] sm:$0xff] %v1522_v49   ;;  %v1085_v55 = vadd.f32 %v1638_v31, %v1084_v50  ;;  %v1153_v56 = vadd.f32 %v1152_v47, %v1122_v51  ;;  %v1137_v31 = vmul.f32 %v798_v36, %v798_v36 }
 0x119   : > { %1582 = vst [vmem:[%s1859_s24 + $0x70] sm:$0xff] %v1562_v52  }
 0x11a   : > { %v1154_v59 = vadd.f32 %v1153_v56, %v1123_v54  ;;  %v1086_v60 = vadd.f32 %v1639_v40, %v1085_v55 }
 0x11c   : > { %v1087_v62 = vadd.f32 %v1086_v60, %v1852_v27  ;;  %v1155_v63 = vadd.f32 %v1154_v59, %v1124_v58  ;;  %v1129_v27 = vmul.f32 %v1875_v48, %v1875_v48 }
 0x11e   : > { %v1156_v0 = vadd.f32 %v1155_v63, %v1125_v61  ;;  %v1088_v1 = vadd.f32 %v1087_v62, %v1865_v34 }
 0x120   : > { %v1089_v4 = vadd.f32 %v1850_v25, %v1088_v1  ;;  %v1157_v5 = vadd.f32 %v1156_v0, %v1126_v2  ;;  %v1131_v25 = vmul.f32 %v1873_v46, %v1873_v46 }
 0x122   : > { %v1158_v9 = vadd.f32 %v1157_v5, %v1127_v3  ;;  %v1090_v10 = vadd.f32 %v1861_v29, %v1089_v4  ;;  %v1132_v29 = vmul.f32 %v1877_v53, %v1877_v53 }
 0x124   : > { %v1091_v11 = vadd.f32 %v1090_v10, %v1875_v48  ;;  %v1159_v12 = vadd.f32 %v1158_v9, %v1128_v7  ;;  %v1133_v48 = vmul.f32 %v1891_v8, %v1891_v8 }
 0x126   : > { %v1160_v14 = vadd.f32 %v1159_v12, %v1129_v27  ;;  %v1092_v34 = vadd.f32 %v1091_v11, %v1881_v57 }
 0x128   : > { %v1093_v16 = vadd.f32 %v1873_v46, %v1092_v34  ;;  %v1161_v18 = vadd.f32 %v1160_v14, %v1130_v15  ;;  %v1135_v46 = vmul.f32 %v1889_v6, %v1889_v6 }
 0x12a   : > { %v1162_v19 = vadd.f32 %v1161_v18, %v1131_v25  ;;  %v1094_v20 = vadd.f32 %v1877_v53, %v1093_v16  ;;  %v1136_v53 = vmul.f32 %v1893_v13, %v1893_v13 }
 0x12c   : > { %v1095_v21 = vadd.f32 %v1094_v20, %v1891_v8  ;;  %v1163_v22 = vadd.f32 %v1162_v19, %v1132_v29 }
 0x12e   : > { %v1164_v23 = vadd.f32 %v1163_v22, %v1133_v48  ;;  %v1096_v57 = vadd.f32 %v1095_v21, %v1897_v17  ;;  %v1138_v17 = vmul.f32 %v801_v45, %v801_v45 }
 0x130   : > { %v1097_v26 = vadd.f32 %v1889_v6, %v1096_v57  ;;  %v1165_v28 = vadd.f32 %v1164_v23, %v1134_v24 }
 0x132   : > { %v1166_v30 = vadd.f32 %v1165_v28, %v1135_v46  ;;  %v1098_v8 = vadd.f32 %v1893_v13, %v1097_v26 }
 0x134   : > { %v1099_v32 = vadd.f32 %v1098_v8, %v798_v36  ;;  %v1167_v35 = vadd.f32 %v1166_v30, %v1136_v53 }
 0x136   : > { %v1168_v37 = vadd.f32 %v1167_v35, %v1137_v31  ;;  %v1100_v38 = vadd.f32 %v1099_v32, %v801_v45 }
 0x138   : > { %v1101_v40 = vadd.f32 %v1905_v33, %v1100_v38  ;;  %v1169_v6 = vadd.f32 %v1168_v37, %v1138_v17 }
 0x13a   : > { %v1102_v43 = vadd.f32 %v1907_v41, %v1101_v40  ;;  %v1170_v13 = vadd.f32 %v1169_v6, %v1139_v39 }
 0x13c   : > { %v1103_v44 = vrot.slane %v1102_v43, 4  ;;  %v1171_v47 = vadd.f32 %v1170_v13, %v1140_v42 }
 0x13e   : > { %v1104_v36 = vadd.f32 %v1103_v44, %v1102_v43  ;;  %v1172_v49 = vrot.slane %v1171_v47, 4 }
 0x140   : > { %v1105_v50 = vrot.slane %v1104_v36, 2  ;;  %v1173_v45 = vadd.f32 %v1172_v49, %v1171_v47 }
 0x142   : > { %v1106_v51 = vadd.f32 %v1105_v50, %v1104_v36  ;;  %v1174_v52 = vrot.slane %v1173_v45, 2 }
 0x144   : > { %v1107_v54 = vrot.slane %v1106_v51, 1  ;;  %v1175_v33 = vadd.f32 %v1174_v52, %v1173_v45 }
 0x146   : > { %v1108_v55 = vadd.f32 %v1107_v54, %v1106_v51  ;;  %v1176_v56 = vrot.slane %v1175_v33, 1 }
 0x148   : > { %v1177_v41 = vadd.f32 %v1176_v56, %v1175_v33  ;;  %1178 = vst [vmem:[%s383_s28] sm:$0xff] %v1108_v55 }
 0x14a   : > { %1179 = vst [vmem:[%s390_s7] sm:$0xff] %v1177_v41 }
 0x14b PF: > { %s17_s23 = sadd.s32 1, %s1742_s23   ;;  %s1981_s21 = smov %s1738_s22 }
 0x14c   : > { %p14_p6 = scmp.ge.s32.totalorder %s17_s23, 4   ;;  %s1982_s22 = smov %s1984_s2 }
 0x14e   :  { %16 = sbr.rel (!%p14_p6) target bundleno = 2 (0x2), region = 107 }

// kernel: bottleneck_forward.11
= control target key start
LH: loop header
LB: loop body
LE: loop exit
PB: predicated region body
PF: predicated region fallthrough
CT: control target
= control target key end

     0   :  { %s535_s0 = inlined_call_operand.vmem [shape: bf16[128,128], index: 0, kind: input, shape index: {}]   ;;  %s536_s1 = inlined_call_operand.vmem [shape: f32[1,128], index: 1, kind: input, shape index: {}]   ;;  %s537_s2 = inlined_call_operand.vmem [shape: f32[1,128], index: 2, kind: input, shape index: {}]   ;;  %s538_s3 = inlined_call_operand.vmem [shape: bf16[128,128], index: 3, kind: input, shape index: {}]   ;;  %s539_s4 = inlined_call_operand.vmem [shape: f32[1,128], index: 4, kind: input, shape index: {}]   ;;  %s540_s5 = inlined_call_operand.vmem [shape: f32[1,128], index: 5, kind: input, shape index: {}]   ;;  %s541_s6 = inlined_call_operand.hbm [shape: f32[128,128], index: 6, kind: output, shape index: {}]  }
   0x1   :  { %v249_v0 = vld [vmem:[%s535_s0] sm:$0xff]   ;;  %v312_v9 = vld [vmem:[%s535_s0 + $0x8] sm:$0xff]   ;;  %v313_v20 = vld [vmem:[%s535_s0 + $0x10] sm:$0xff]  }
   0x2   :  { %v397_v1 = vld [vmem:[%s536_s1] ss:$0 sm:$0xff]  ;;  %v250_v2 = vunpack.c.l.bf16 %v249_v0  ;;  %v251_v5 = vunpack.c.h.bf16 %v249_v0  ;;  %v319_v10 = vld [vmem:[%s538_s3 + $0x8] sm:$0xff]   ;;  %v254_v14 = vunpack.c.l.bf16 %v312_v9  ;;  %v255_v18 = vunpack.c.h.bf16 %v312_v9  ;;  %v320_v21 = vld [vmem:[%s538_s3 + $0x10] sm:$0xff]  }
   0x3   :  { %v281_v3 = vld [vmem:[%s538_s3] sm:$0xff]   ;;  %v286_v15 = vunpack.c.l.bf16 %v319_v10  ;;  %v287_v19 = vunpack.c.h.bf16 %v319_v10 }
   0x4   :  { %v405_v4 = vld [vmem:[%s539_s4] ss:$0 sm:$0xff]  ;;  %v282_v7 = vunpack.c.l.bf16 %v281_v3  ;;  %v283_v8 = vunpack.c.h.bf16 %v281_v3  ;;  %v63_v11 = vmul.f32 %v250_v2, %v397_v1  ;;  %v64_v13 = vmul.f32 %v251_v5, %v397_v1 }
   0x5   :  { %v410_v6 = vld [vmem:[%s537_s2] ss:$0 sm:$0xff]  ;;  %v65_v24 = vmul.f32 %v254_v14, %v397_v1  ;;  %v143_v25 = vmul.f32 %v286_v15, %v405_v4  ;;  %v66_v28 = vmul.f32 %v255_v18, %v397_v1  ;;  %v144_v29 = vmul.f32 %v287_v19, %v405_v4 }
   0x6   :  { %v422_v12 = vld [vmem:[%s540_s5] ss:$0 sm:$0xff]  ;;  %v141_v16 = vmul.f32 %v282_v7, %v405_v4  ;;  %v142_v17 = vmul.f32 %v283_v8, %v405_v4  ;;  %v86_v22 = vadd.f32 %v410_v6, %v63_v11  ;;  %v87_v23 = vadd.f32 %v410_v6, %v64_v13 }
   0x8   :  { %v164_v26 = vadd.f32 %v422_v12, %v141_v16  ;;  %v165_v27 = vadd.f32 %v422_v12, %v142_v17 }
   0x9   :  { %11 = vsyncpa [#allocation3], 0  ;;  %v88_v30 = vadd.f32 %v410_v6, %v65_v24  ;;  %v166_v31 = vadd.f32 %v422_v12, %v143_v25  ;;  %v258_v32 = vunpack.c.l.bf16 %v313_v20  ;;  %v290_v33 = vunpack.c.l.bf16 %v320_v21  ;;  %v314_v42 = vld [vmem:[%s535_s0 + $0x18] sm:$0xff]   ;;  %v315_v52 = vld [vmem:[%s535_s0 + $0x20] sm:$0xff]  }
   0xa   :  { %v180_v34 = vadd.f32 %v164_v26, %v86_v22  ;;  %v181_v35 = vadd.f32 %v165_v27, %v87_v23  ;;  %v89_v36 = vadd.f32 %v410_v6, %v66_v28  ;;  %v167_v37 = vadd.f32 %v422_v12, %v144_v29  ;;  %v321_v43 = vld [vmem:[%s538_s3 + $0x18] sm:$0xff]   ;;  %v322_v57 = vld [vmem:[%s538_s3 + $0x20] sm:$0xff]   ;;  %v316_v14 = vld [vmem:[%s535_s0 + $0x28] sm:$0xff]  }
   0xb   :  { %v182_v38 = vadd.f32 %v166_v31, %v88_v30  ;;  %v67_v39 = vmul.f32 %v258_v32, %v397_v1  ;;  %v145_v40 = vmul.f32 %v290_v33, %v405_v4  ;;  %v259_v41 = vunpack.c.h.bf16 %v313_v20  ;;  %v323_v19 = vld [vmem:[%s538_s3 + $0x28] sm:$0xff]   ;;  %v317_v32 = vld [vmem:[%s535_s0 + $0x30] sm:$0xff]  }
   0xc   :  { %v196_v44 = vmax.f32 %v180_v34, 0.0  ;;  %v197_v45 = vmax.f32 %v181_v35, 0.0  ;;  %v183_v46 = vadd.f32 %v167_v37, %v89_v36  ;;  %v291_v47 = vunpack.c.h.bf16 %v320_v21  ;;  %v324_v33 = vld [vmem:[%s538_s3 + $0x30] sm:$0xff]  }
   0xd   :  { %v198_v48 = vmax.f32 %v182_v38, 0.0  ;;  %v90_v49 = vadd.f32 %v410_v6, %v67_v39  ;;  %v168_v50 = vadd.f32 %v422_v12, %v145_v40  ;;  %v68_v51 = vmul.f32 %v259_v41, %v397_v1 }
   0xe   :  { %212 = vst [vmem:[#allocation2] sm:$0xff] %v196_v44  ;;  %213 = vst [vmem:[#allocation2 + $0x8] sm:$0xff] %v197_v45  ;;  %v199_v53 = vmax.f32 %v183_v46, 0.0  ;;  %v146_v54 = vmul.f32 %v291_v47, %v405_v4  ;;  %v262_v55 = vunpack.c.l.bf16 %v314_v42  ;;  %v294_v56 = vunpack.c.l.bf16 %v321_v43  ;;  %v318_v46 = vld [vmem:[%s535_s0 + $0x38] sm:$0xff]   ;;  %s353_s0 = smov [#allocation2]  }
   0xf   :  { %214 = vst [vmem:[#allocation2 + $0x10] sm:$0xff] %v198_v48  ;;  %v184_v58 = vadd.f32 %v168_v50, %v90_v49  ;;  %v91_v59 = vadd.f32 %v410_v6, %v68_v51  ;;  %v263_v60 = vunpack.c.h.bf16 %v314_v42  ;;  %v295_v61 = vunpack.c.h.bf16 %v321_v43 }
  0x10   :  { %215 = vst [vmem:[#allocation2 + $0x18] sm:$0xff] %v199_v53  ;;  %v169_v62 = vadd.f32 %v422_v12, %v146_v54  ;;  %v69_v63 = vmul.f32 %v262_v55, %v397_v1  ;;  %v147_v0 = vmul.f32 %v294_v56, %v405_v4  ;;  %v266_v2 = vunpack.c.l.bf16 %v315_v52  ;;  %v325_v55 = vld [vmem:[%s538_s3 + $0x38] sm:$0xff]   ;;  %s233_s3 = sshll.u32 %s353_s0, 4  ;;  %s234_s3 = int_to_ptr.vmem [resolvable:$true] %s233_s3 }
  0x11   :  { %v200_v3 = vmax.f32 %v184_v58, 0.0  ;;  %v70_v5 = vmul.f32 %v263_v60, %v397_v1  ;;  %v148_v7 = vmul.f32 %v295_v61, %v405_v4  ;;  %v298_v8 = vunpack.c.l.bf16 %v322_v57  ;;  %s329_s8 = scalar_lea.vmem %s234_s3, 2048  ;;  %p334_p1 = scmp.lt.s32.totalorder %s234_s3, %s234_s3 }
  0x12   :  { %v185_v9 = vadd.f32 %v169_v62, %v91_v59  ;;  %v92_v10 = vadd.f32 %v410_v6, %v69_v63  ;;  %v170_v11 = vadd.f32 %v422_v12, %v147_v0  ;;  %v71_v13 = vmul.f32 %v266_v2, %v397_v1  ;;  %p330_p0 = scmp.ne.s32.totalorder %s234_s3, %s329_s8  ;;  %p335_p2 = scmp.lt.s32.totalorder %s329_s8, %s329_s8 }
  0x13   :  { %216 = vst [vmem:[#allocation2 + $0x20] sm:$0xff] %v200_v3  ;;  %v93_v15 = vadd.f32 %v410_v6, %v70_v5  ;;  %v171_v16 = vadd.f32 %v422_v12, %v148_v7  ;;  %v149_v17 = vmul.f32 %v298_v8, %v405_v4  ;;  %v267_v18 = vunpack.c.h.bf16 %v315_v52 }
  0x14   :  { %v201_v20 = vmax.f32 %v185_v9, 0.0  ;;  %v186_v21 = vadd.f32 %v170_v11, %v92_v10  ;;  %v94_v22 = vadd.f32 %v410_v6, %v71_v13  ;;  %v299_v23 = vunpack.c.h.bf16 %v322_v57  ;;  %p336_p3 = por %p335_p2, %p334_p1 }
  0x15   :  { %v187_v24 = vadd.f32 %v171_v16, %v93_v15  ;;  %v172_v25 = vadd.f32 %v422_v12, %v149_v17  ;;  %v72_v26 = vmul.f32 %v267_v18, %v397_v1  ;;  %v270_v27 = vunpack.c.l.bf16 %v316_v14 }
  0x16   :  { %217 = vst [vmem:[#allocation2 + $0x28] sm:$0xff] %v201_v20  ;;  %v202_v28 = vmax.f32 %v186_v21, 0.0  ;;  %v150_v29 = vmul.f32 %v299_v23, %v405_v4  ;;  %v302_v30 = vunpack.c.l.bf16 %v323_v19  ;;  %v271_v31 = vunpack.c.h.bf16 %v316_v14  ;;  %p337_p4 = pnand %p336_p3, %p330_p0 }
  0x17   :  { %v203_v34 = vmax.f32 %v187_v24, 0.0  ;;  %v188_v35 = vadd.f32 %v172_v25, %v94_v22  ;;  %v95_v36 = vadd.f32 %v410_v6, %v72_v26  ;;  %v73_v37 = vmul.f32 %v270_v27, %v397_v1 }
  0x18   :  { %218 = vst [vmem:[#allocation2 + $0x30] sm:$0xff] %v202_v28  ;;  %v173_v38 = vadd.f32 %v422_v12, %v150_v29  ;;  %v151_v39 = vmul.f32 %v302_v30, %v405_v4  ;;  %v74_v40 = vmul.f32 %v271_v31, %v397_v1  ;;  %v303_v41 = vunpack.c.h.bf16 %v323_v19 }
  0x19   :  { %219 = vst [vmem:[#allocation2 + $0x38] sm:$0xff] %v203_v34  ;;  %v204_v42 = vmax.f32 %v188_v35, 0.0  ;;  %v96_v43 = vadd.f32 %v410_v6, %v73_v37  ;;  %v274_v44 = vunpack.c.l.bf16 %v317_v32  ;;  %v306_v45 = vunpack.c.l.bf16 %v324_v33 }
  0x1a   :  { %v189_v47 = vadd.f32 %v173_v38, %v95_v36  ;;  %v174_v48 = vadd.f32 %v422_v12, %v151_v39  ;;  %v97_v49 = vadd.f32 %v410_v6, %v74_v40  ;;  %v152_v50 = vmul.f32 %v303_v41, %v405_v4 }
  0x1b   :  { %220 = vst [vmem:[#allocation2 + $0x40] sm:$0xff] %v204_v42  ;;  %v75_v51 = vmul.f32 %v274_v44, %v397_v1  ;;  %v153_v52 = vmul.f32 %v306_v45, %v405_v4  ;;  %v275_v53 = vunpack.c.h.bf16 %v317_v32  ;;  %v307_v54 = vunpack.c.h.bf16 %v324_v33 }
  0x1c   :  { %v205_v56 = vmax.f32 %v189_v47, 0.0  ;;  %v190_v57 = vadd.f32 %v174_v48, %v96_v43  ;;  %v175_v58 = vadd.f32 %v422_v12, %v152_v50  ;;  %v278_v59 = vunpack.c.l.bf16 %v318_v46 }
  0x1d   :  { %v98_v60 = vadd.f32 %v410_v6, %v75_v51  ;;  %v176_v61 = vadd.f32 %v422_v12, %v153_v52  ;;  %v76_v62 = vmul.f32 %v275_v53, %v397_v1  ;;  %v154_v63 = vmul.f32 %v307_v54, %v405_v4 }
  0x1e   :  { %221 = vst [vmem:[#allocation2 + $0x48] sm:$0xff] %v205_v56  ;;  %v206_v0 = vmax.f32 %v190_v57, 0.0  ;;  %v191_v2 = vadd.f32 %v175_v58, %v97_v49  ;;  %v77_v3 = vmul.f32 %v278_v59, %v397_v1  ;;  %v310_v5 = vunpack.c.l.bf16 %v325_v55 }
  0x1f   :  { %v192_v7 = vadd.f32 %v176_v61, %v98_v60  ;;  %v99_v8 = vadd.f32 %v410_v6, %v76_v62  ;;  %v177_v9 = vadd.f32 %v422_v12, %v154_v63  ;;  %v279_v10 = vunpack.c.h.bf16 %v318_v46 }
  0x20   :  { %222 = vst [vmem:[#allocation2 + $0x50] sm:$0xff] %v206_v0  ;;  %v207_v11 = vmax.f32 %v191_v2, 0.0  ;;  %v100_v13 = vadd.f32 %v410_v6, %v77_v3  ;;  %v155_v14 = vmul.f32 %v310_v5, %v405_v4  ;;  %v311_v15 = vunpack.c.h.bf16 %v325_v55 }
  0x21   :  { %v208_v16 = vmax.f32 %v192_v7, 0.0  ;;  %v193_v17 = vadd.f32 %v177_v9, %v99_v8  ;;  %v78_v18 = vmul.f32 %v279_v10, %v397_v1 }
  0x22   :  { %223 = vst [vmem:[#allocation2 + $0x58] sm:$0xff] %v207_v11  ;;  %v178_v19 = vadd.f32 %v422_v12, %v155_v14  ;;  %v156_v20 = vmul.f32 %v311_v15, %v405_v4 }
  0x23   :  { %224 = vst [vmem:[#allocation2 + $0x60] sm:$0xff] %v208_v16  ;;  %v209_v21 = vmax.f32 %v193_v17, 0.0  ;;  %v101_v22 = vadd.f32 %v410_v6, %v78_v18 }
  0x24   :  { %v194_v23 = vadd.f32 %v178_v19, %v100_v13  ;;  %v179_v24 = vadd.f32 %v422_v12, %v156_v20 }
  0x25   :  { %225 = vst [vmem:[#allocation2 + $0x68] sm:$0xff] %v209_v21 }
  0x26   :  { %v210_v25 = vmax.f32 %v194_v23, 0.0  ;;  %v195_v26 = vadd.f32 %v179_v24, %v101_v22 }
  0x28   :  { %226 = vst [vmem:[#allocation2 + $0x70] sm:$0xff] %v210_v25  ;;  %v211_v1 = vmax.f32 %v195_v26, 0.0 }
  0x2a   :  { %227 = vst [vmem:[#allocation2 + $0x78] sm:$0xff] %v211_v1 }
  0x2b   :  { %340 = shalt.err (!%p337_p4)
}
  0x2c   :  { %s341_s10 = scalar_lea.hbm %s541_s6, 2048 }
  0x2d   :  { %p342_p5 = scmp.ne.s32.totalorder %s541_s6, %s341_s10  ;;  %p345_p6 = scmp.lt.u32.totalorder %s341_s10, %s541_s6 }
  0x2f   :  { %p347_p7 = pnand %p345_p6, %p342_p5 }
  0x31   :  { %350 = shalt.err (!%p347_p7)
}
  0x32   :  { %s354_s5 = smov 128   ;;  %s355_s14 = smov 8  }
  0x33   :  { %239 = dma.vmem_to_hbm [thread:$0]  %s234_s3, 2048, %s541_s6, [#allocation3], %s354_s5, %s354_s5, %s355_s14  }
  0x34   :  { %351 = dma.done.wait [#allocation3], 2048  }
  0x35   :  { %352 = vsyncadd [#allocation3], 4294965248 }
  0x36   :  { %243 = vsyncpa [#allocation3], 1 }

// kernel: bottleneck_forward.9
= control target key start
LH: loop header
LB: loop body
LE: loop exit
PB: predicated region body
PF: predicated region fallthrough
CT: control target
= control target key end

     0   :  { %s878_s1 = inlined_call_operand.vmem [shape: bf16[128,128], index: 1, kind: input, shape index: {}]   ;;  %s879_s0 = inlined_call_operand.vmem [shape: bf16[128,128], index: 0, kind: input, shape index: {}]   ;;  %s880_s2 = inlined_call_operand.vmem [shape: f32[1,128], index: 2, kind: input, shape index: {}]   ;;  %s881_s3 = inlined_call_operand.vmem [shape: f32[1,128], index: 3, kind: input, shape index: {}]   ;;  %s882_s4 = inlined_call_operand.vmem [shape: bf16[128,128], index: 4, kind: output, shape index: {0}]   ;;  %s883_s5 = inlined_call_operand.vmem [shape: f32[8,128], index: 5, kind: output, shape index: {1}]   ;;  %s884_s6 = inlined_call_operand.vmem [shape: f32[8,128], index: 6, kind: output, shape index: {2}]  }
   0x1   :  { %v715_v0 = vld [vmem:[%s878_s1] sm:$0xff]   ;;  %v716_v1 = vld [vmem:[%s878_s1 + $0x8] sm:$0xff]   ;;  %v717_v2 = vld [vmem:[%s878_s1 + $0x10] sm:$0xff]  }
   0x2   :  { %667 = vmatprep.subr.bf16.mxu0 %v715_v0  ;;  %699 = vmatprep.subr.bf16.mxu1 %v715_v0  ;;  %v718_v3 = vld [vmem:[%s878_s1 + $0x18] sm:$0xff]   ;;  %v566_v4 = vld [vmem:[%s879_s0] sm:$0xff]   ;;  %v637_v8 = vld [vmem:[%s879_s0 + $0x8] sm:$0xff]  }
   0x3   :  { %668 = vmatpush3.bf16.msra.mxu0 %v715_v0  ;;  %707 = vmatpush3.bf16.msra.mxu1 %v715_v0  ;;  %v776_v5 = vld [vmem:[%s880_s2] ss:$0 sm:$0xff]  ;;  %v567_v6 = vunpack.c.l.bf16 %v566_v4  ;;  %v568_v7 = vunpack.c.h.bf16 %v566_v4  ;;  %v638_v9 = vld [vmem:[%s879_s0 + $0x10] sm:$0xff]   ;;  %v571_v11 = vunpack.c.l.bf16 %v637_v8  ;;  %v572_v14 = vunpack.c.h.bf16 %v637_v8  ;;  %v639_v22 = vld [vmem:[%s879_s0 + $0x18] sm:$0xff]  }
   0x4   :  { %669 = vmatprep.subr.bf16.mxu0 %v716_v1  ;;  %700 = vmatprep.subr.bf16.mxu1 %v716_v1  ;;  %v787_v10 = vld [vmem:[%s881_s3] ss:$0 sm:$0xff]  ;;  %v575_v17 = vunpack.c.l.bf16 %v638_v9  ;;  %v576_v21 = vunpack.c.h.bf16 %v638_v9  ;;  %v641_v27 = vld [vmem:[%s879_s0 + $0x28] sm:$0xff]   ;;  %v642_v30 = vld [vmem:[%s879_s0 + $0x30] sm:$0xff]   ;;  %v579_v32 = vunpack.c.l.bf16 %v639_v22  ;;  %v580_v33 = vunpack.c.h.bf16 %v639_v22 }
   0x5   :  { %v80_v12 = vmul.f32 %v567_v6, %v776_v5  ;;  %v81_v13 = vmul.f32 %v568_v7, %v776_v5  ;;  %v640_v15 = vld [vmem:[%s879_s0 + $0x20] sm:$0xff]   ;;  %v82_v20 = vmul.f32 %v571_v11, %v776_v5  ;;  %v83_v26 = vmul.f32 %v572_v14, %v776_v5  ;;  %v720_v28 = vld [vmem:[%s878_s1 + $0x28] sm:$0xff]   ;;  %v643_v39 = vld [vmem:[%s879_s0 + $0x38] sm:$0xff]  }
   0x6   :  { %v719_v16 = vld [vmem:[%s878_s1 + $0x20] sm:$0xff]   ;;  %v583_v23 = vunpack.c.l.bf16 %v640_v15  ;;  %v84_v29 = vmul.f32 %v575_v17, %v776_v5  ;;  %v584_v34 = vunpack.c.h.bf16 %v640_v15  ;;  %v85_v36 = vmul.f32 %v576_v21, %v776_v5  ;;  %v721_v44 = vld [vmem:[%s878_s1 + $0x30] sm:$0xff]   ;;  %v722_v61 = vld [vmem:[%s878_s1 + $0x38] sm:$0xff]  }
   0x7   :  { %670 = vmatpush3.bf16.msra.mxu0 %v716_v1  ;;  %708 = vmatpush3.bf16.msra.mxu1 %v716_v1  ;;  %v103_v18 = vadd.f32 %v787_v10, %v80_v12  ;;  %v104_v19 = vadd.f32 %v787_v10, %v81_v13  ;;  %v105_v35 = vadd.f32 %v787_v10, %v82_v20  ;;  %v587_v38 = vunpack.c.l.bf16 %v641_v27 }
   0x8   :  { %671 = vmatprep.subr.bf16.mxu0 %v717_v2  ;;  %701 = vmatprep.subr.bf16.mxu1 %v717_v2  ;;  %v88_v37 = vmul.f32 %v583_v23, %v776_v5  ;;  %v106_v40 = vadd.f32 %v787_v10, %v83_v26  ;;  %v89_v41 = vmul.f32 %v584_v34, %v776_v5  ;;  %v588_v42 = vunpack.c.h.bf16 %v641_v27 }
   0x9   :  { %v119_v24 = vmax.f32 %v103_v18, 0.0  ;;  %v120_v25 = vmax.f32 %v104_v19, 0.0  ;;  %v591_v43 = vunpack.c.l.bf16 %v642_v30  ;;  %v107_v45 = vadd.f32 %v787_v10, %v84_v29 }
   0xa   :  { %v111_v46 = vadd.f32 %v787_v10, %v88_v37  ;;  %v90_v47 = vmul.f32 %v587_v38, %v776_v5  ;;  %v592_v48 = vunpack.c.h.bf16 %v642_v30  ;;  %v112_v49 = vadd.f32 %v787_v10, %v89_v41 }
   0xb   :  { %672 = vmatpush3.bf16.msra.mxu0 %v717_v2  ;;  %709 = vmatpush3.bf16.msra.mxu1 %v717_v2  ;;  %v135_v31 = vpack.c.bf16 %v120_v25, %v119_v24  ;;  %v91_v50 = vmul.f32 %v588_v42, %v776_v5  ;;  %v92_v51 = vmul.f32 %v591_v43, %v776_v5  ;;  %v595_v52 = vunpack.c.l.bf16 %v643_v39 }
   0xc   :  { %673 = vmatprep.subr.bf16.mxu0 %v718_v3  ;;  %702 = vmatprep.subr.bf16.mxu1 %v718_v3  ;;  %v127_v53 = vmax.f32 %v111_v46, 0.0  ;;  %v113_v54 = vadd.f32 %v787_v10, %v90_v47  ;;  %v93_v55 = vmul.f32 %v592_v48, %v776_v5  ;;  %v596_v56 = vunpack.c.h.bf16 %v643_v39 }
   0xd   :  { %683 = vmatprep.mubr.bf16.mxu0 %v135_v31  ;;  %v108_v57 = vadd.f32 %v787_v10, %v85_v36  ;;  %v128_v58 = vmax.f32 %v112_v49, 0.0  ;;  %v114_v59 = vadd.f32 %v787_v10, %v91_v50  ;;  %v115_v60 = vadd.f32 %v787_v10, %v92_v51 }
   0xe   :  { %v86_v62 = vmul.f32 %v579_v32, %v776_v5  ;;  %v116_v63 = vadd.f32 %v787_v10, %v93_v55  ;;  %v121_v0 = vmax.f32 %v105_v35, 0.0  ;;  %v122_v1 = vmax.f32 %v106_v40, 0.0 }
   0xf   :  { %674 = vmatpush3.bf16.msra.mxu0 %v718_v3  ;;  %710 = vmatpush3.bf16.msra.mxu1 %v718_v3  ;;  %v87_v2 = vmul.f32 %v580_v33, %v776_v5  ;;  %v139_v3 = vpack.c.bf16 %v128_v58, %v127_v53  ;;  %v129_v4 = vmax.f32 %v113_v54, 0.0  ;;  %v130_v6 = vmax.f32 %v114_v59, 0.0 }
  0x10   :  { %675 = vmatprep.subr.bf16.mxu0 %v719_v16  ;;  %703 = vmatprep.subr.bf16.mxu1 %v719_v16  ;;  %v94_v7 = vmul.f32 %v595_v52, %v776_v5  ;;  %v95_v8 = vmul.f32 %v596_v56, %v776_v5  ;;  %v123_v9 = vmax.f32 %v107_v45, 0.0  ;;  %v124_v11 = vmax.f32 %v108_v57, 0.0 }
  0x11   :  { %v131_v12 = vmax.f32 %v115_v60, 0.0  ;;  %v132_v13 = vmax.f32 %v116_v63, 0.0  ;;  %v109_v14 = vadd.f32 %v787_v10, %v86_v62  ;;  %v110_v15 = vadd.f32 %v787_v10, %v87_v2  ;;  %691 = vmatprep.mubr.bf16.mxu1 %v139_v3 }
  0x12   :  { %v140_v17 = vpack.c.bf16 %v130_v6, %v129_v4  ;;  %v117_v18 = vadd.f32 %v787_v10, %v94_v7  ;;  %v118_v19 = vadd.f32 %v787_v10, %v95_v8  ;;  %v137_v5 = vpack.c.bf16 %v124_v11, %v123_v9 }
  0x13   :  { %676 = vmatpush3.bf16.msra.mxu0 %v719_v16  ;;  %711 = vmatpush3.bf16.msra.mxu1 %v719_v16  ;;  %v136_v16 = vpack.c.bf16 %v122_v1, %v121_v0  ;;  %v141_v20 = vpack.c.bf16 %v132_v13, %v131_v12  ;;  %v125_v21 = vmax.f32 %v109_v14, 0.0  ;;  %v126_v22 = vmax.f32 %v110_v15, 0.0 }
  0x14   :  { %677 = vmatprep.subr.bf16.mxu0 %v720_v28  ;;  %704 = vmatprep.subr.bf16.mxu1 %v720_v28  ;;  %v133_v23 = vmax.f32 %v117_v18, 0.0  ;;  %v134_v24 = vmax.f32 %v118_v19, 0.0 }
  0x15   :  { %v138_v25 = vpack.c.bf16 %v126_v22, %v125_v21 }
  0x16   :  { %v142_v26 = vpack.c.bf16 %v134_v24, %v133_v23 }
  0x17   :  { %678 = vmatpush3.bf16.msra.mxu0 %v720_v28  ;;  %712 = vmatpush3.bf16.msra.mxu1 %v720_v28 }
  0x18   :  { %679 = vmatprep.subr.bf16.mxu0 %v721_v44  ;;  %705 = vmatprep.subr.bf16.mxu1 %v721_v44 }
  0x1b   :  { %680 = vmatpush3.bf16.msra.mxu0 %v721_v44  ;;  %713 = vmatpush3.bf16.msra.mxu1 %v721_v44 }
  0x1c   :  { %681 = vmatprep.subr.bf16.mxu0 %v722_v61  ;;  %706 = vmatprep.subr.bf16.mxu1 %v722_v61 }
  0x1f   :  { %682 = vmatpush3.bf16.msra.mxu0 %v722_v61  ;;  %714 = vmatpush3.bf16.msra.mxu1 %v722_v61 }
  0x22   :  { %684 = vmatmul.mubr.bf16.vlgmr.msra.gmra.mrb[0].mxu0 %v136_v16  ;;  %692 = vmatmul.mubr.bf16.vlgmr.msra.gmra.mrb[0].mxu1 %v140_v17 }
  0x23   :  { %687 = vmatprep.mubr.bf16.mxu0 %v137_v5  ;;  %695 = vmatprep.mubr.bf16.mxu1 %v141_v20 }
  0x2a   :  { %688 = vmatmul.mubr.bf16.gmra.mrb[4].mxu0 %v138_v25  ;;  %696 = vmatmul.mubr.bf16.gmra.mrb[4].mxu1 %v142_v26 }
  0xf5   :  { %v685_v27 = vpop.f32.mrb[0].mxu0  ;;  %v693_v28 = vpop.f32.mrb[0].mxu1 }
  0xf6   :  { %v257_v29 = vpop.f32.mrb[1].mxu0  ;;  %v289_v10 = vpop.f32.mrb[1].mxu1  ;;  %v474_v41 = vmul.f32 %v685_v27, %v685_v27  ;;  %v482_v15 = vmul.f32 %v693_v28, %v693_v28 }
  0xf7   :  { %v686_v30 = vpop.f32.mrb[2].mxu0  ;;  %v694_v31 = vpop.f32.mrb[2].mxu1  ;;  %v472_v32 = vmul.f32 %v257_v29, %v257_v29  ;;  %v480_v8 = vmul.f32 %v289_v10, %v289_v10 }
  0xf8   :  { %v605_v33 = vpack.c.bf16 %v686_v30, %v685_v27  ;;  %v260_v34 = vpop.f32.mrb[3].mxu0  ;;  %v625_v35 = vpack.c.bf16 %v694_v31, %v693_v28  ;;  %v292_v36 = vpop.f32.mrb[3].mxu1  ;;  %v475_v44 = vmul.f32 %v686_v30, %v686_v30  ;;  %v483_v18 = vmul.f32 %v694_v31, %v694_v31 }
  0xf9   :  { %v600_v37 = vpack.c.bf16 %v260_v34, %v257_v29  ;;  %v451_v38 = vadd.f32 %v260_v34, %v257_v29  ;;  %v473_v39 = vmul.f32 %v260_v34, %v260_v34  ;;  %v620_v40 = vpack.c.bf16 %v292_v36, %v289_v10 }
  0xfa   :  { %644 = vst [vmem:[%s882_s4 + $0x8] sm:$0xff] %v605_v33   ;;  %648 = vst [vmem:[%s882_s4 + $0x28] sm:$0xff] %v625_v35   ;;  %v481_v14 = vmul.f32 %v292_v36, %v292_v36 }
  0xfb   :  { %601 = vst [vmem:[%s882_s4] sm:$0xff] %v600_v37   ;;  %v452_v42 = vadd.f32 %v685_v27, %v451_v38  ;;  %v488_v43 = vadd.f32 %v473_v39, %v472_v32  ;;  %647 = vst [vmem:[%s882_s4 + $0x20] sm:$0xff] %v620_v40  }
  0xfd   :  { %v489_v45 = vadd.f32 %v488_v43, %v474_v41  ;;  %v689_v46 = vpop.f32.mrb[4].mxu0  ;;  %v453_v47 = vadd.f32 %v686_v30, %v452_v42  ;;  %v697_v48 = vpop.f32.mrb[4].mxu1 }
  0xfe   :  { %v273_v49 = vpop.f32.mrb[5].mxu0  ;;  %v305_v50 = vpop.f32.mrb[5].mxu1  ;;  %v478_v1 = vmul.f32 %v689_v46, %v689_v46  ;;  %v486_v26 = vmul.f32 %v697_v48, %v697_v48 }
  0xff   :  { %v454_v51 = vadd.f32 %v453_v47, %v273_v49  ;;  %v476_v52 = vmul.f32 %v273_v49, %v273_v49  ;;  %v490_v53 = vadd.f32 %v489_v45, %v475_v44  ;;  %v690_v54 = vpop.f32.mrb[6].mxu0  ;;  %v698_v55 = vpop.f32.mrb[6].mxu1  ;;  %v484_v20 = vmul.f32 %v305_v50, %v305_v50 }
 0x100   :  { %v615_v56 = vpack.c.bf16 %v690_v54, %v689_v46  ;;  %v276_v57 = vpop.f32.mrb[7].mxu0  ;;  %v635_v58 = vpack.c.bf16 %v698_v55, %v697_v48  ;;  %v308_v59 = vpop.f32.mrb[7].mxu1  ;;  %v479_v4 = vmul.f32 %v690_v54, %v690_v54 }
 0x101   :  { %v491_v60 = vadd.f32 %v490_v53, %v476_v52  ;;  %v610_v61 = vpack.c.bf16 %v276_v57, %v273_v49  ;;  %v455_v62 = vadd.f32 %v454_v51, %v276_v57  ;;  %v477_v63 = vmul.f32 %v276_v57, %v276_v57 }
 0x102   :  { %646 = vst [vmem:[%s882_s4 + $0x18] sm:$0xff] %v615_v56   ;;  %650 = vst [vmem:[%s882_s4 + $0x38] sm:$0xff] %v635_v58   ;;  %v630_v0 = vpack.c.bf16 %v308_v59, %v305_v50  ;;  %v485_v25 = vmul.f32 %v308_v59, %v308_v59 }
 0x103   :  { %645 = vst [vmem:[%s882_s4 + $0x10] sm:$0xff] %v610_v61   ;;  %v456_v2 = vadd.f32 %v689_v46, %v455_v62  ;;  %v492_v3 = vadd.f32 %v491_v60, %v477_v63 }
 0x104   :  { %649 = vst [vmem:[%s882_s4 + $0x30] sm:$0xff] %v630_v0  }
 0x105   :  { %v493_v6 = vadd.f32 %v492_v3, %v478_v1  ;;  %v457_v7 = vadd.f32 %v690_v54, %v456_v2 }
 0x107   :  { %v458_v9 = vadd.f32 %v457_v7, %v289_v10  ;;  %v494_v11 = vadd.f32 %v493_v6, %v479_v4  ;;  %v487_v10 = vmul.f32 %v698_v55, %v698_v55 }
 0x109   :  { %v495_v12 = vadd.f32 %v494_v11, %v480_v8  ;;  %v459_v13 = vadd.f32 %v458_v9, %v292_v36 }
 0x10b   :  { %v460_v16 = vadd.f32 %v693_v28, %v459_v13  ;;  %v496_v17 = vadd.f32 %v495_v12, %v481_v14 }
 0x10d   :  { %v497_v19 = vadd.f32 %v496_v17, %v482_v15  ;;  %v461_v5 = vadd.f32 %v694_v31, %v460_v16 }
 0x10f   :  { %v462_v21 = vadd.f32 %v461_v5, %v305_v50  ;;  %v498_v22 = vadd.f32 %v497_v19, %v483_v18 }
 0x111   :  { %v499_v23 = vadd.f32 %v498_v22, %v484_v20  ;;  %v463_v24 = vadd.f32 %v462_v21, %v308_v59 }
 0x113   :  { %v464_v27 = vadd.f32 %v697_v48, %v463_v24  ;;  %v500_v29 = vadd.f32 %v499_v23, %v485_v25 }
 0x115   :  { %v465_v30 = vadd.f32 %v698_v55, %v464_v27  ;;  %v501_v32 = vadd.f32 %v500_v29, %v486_v26 }
 0x117   :  { %v466_v33 = vrot.slane %v465_v30, 4  ;;  %v502_v34 = vadd.f32 %v501_v32, %v487_v10 }
 0x119   :  { %v467_v35 = vadd.f32 %v466_v33, %v465_v30  ;;  %v503_v28 = vrot.slane %v502_v34, 4 }
 0x11b   :  { %v468_v36 = vrot.slane %v467_v35, 2  ;;  %v504_v37 = vadd.f32 %v503_v28, %v502_v34 }
 0x11d   :  { %v469_v38 = vadd.f32 %v468_v36, %v467_v35  ;;  %v505_v31 = vrot.slane %v504_v37, 2 }
 0x11f   :  { %v470_v39 = vrot.slane %v469_v38, 1  ;;  %v506_v40 = vadd.f32 %v505_v31, %v504_v37 }
 0x121   :  { %v471_v41 = vadd.f32 %v470_v39, %v469_v38  ;;  %v507_v42 = vrot.slane %v506_v40, 1 }
 0x123   :  { %v508_v43 = vadd.f32 %v507_v42, %v506_v40  ;;  %509 = vst [vmem:[%s883_s5] sm:$0xff] %v471_v41 }
 0x125   :  { %510 = vst [vmem:[%s884_s6] sm:$0xff] %v508_v43 }

// kernel: bottleneck_forward.8
= control target key start
LH: loop header
LB: loop body
LE: loop exit
PB: predicated region body
PF: predicated region fallthrough
CT: control target
= control target key end

     0   :  { %s1440_s21 = smov 0   ;;  %s1442_s22 = smov 0   ;;  %s1575_s0 = inlined_call_operand.vmem [shape: bf16[128,1152], index: 0, kind: input, shape index: {}]   ;;  %s1576_s1 = inlined_call_operand.vmem [shape: bf16[1152,128], index: 1, kind: input, shape index: {}]   ;;  %s1577_s2 = inlined_call_operand.vmem [shape: f32[1,1152], index: 2, kind: input, shape index: {}]   ;;  %s1578_s3 = inlined_call_operand.vmem [shape: f32[1,1152], index: 3, kind: input, shape index: {}]   ;;  %s1579_s4 = inlined_call_operand.vmem [shape: bf16[128,128], index: 4, kind: output, shape index: {0}]   ;;  %s1580_s5 = inlined_call_operand.vmem [shape: f32[8,128], index: 5, kind: output, shape index: {1}]   ;;  %s1581_s6 = inlined_call_operand.vmem [shape: f32[8,128], index: 6, kind: output, shape index: {2}]  }
   0x1   :  { %s1444_s23 = smov 0   ;;  %s1446_s24 = smov 0  }
   0x2   :  { %s1448_s2 = smov 0  }
   0x3 LB: > { %s29_s3 = sadd.s32 1, %s1398_s24  ;;  %p52_p1 = scmp.ne.s32.totalorder %s1390_s22, %s1386_s21  ;;  %s1402_s2 = sphi %s1448_s2, %s17_s2   ;;  %s1398_s24 = sphi %s1446_s24, %s1585_s24   ;;  %s1394_s23 = sphi %s1444_s23, %s1584_s23   ;;  %s1390_s22 = sphi %s1442_s22, %s1583_s22   ;;  %s1386_s21 = sphi %s1440_s21, %s1582_s21  }
   0x4   : > { %p30_p0 = scmp.ge.s32.totalorder %s29_s3, 9  ;;  %p53_p2 = scmp.eq.s32.totalorder %s1402_s2, 0 }
   0x5   : > { %s45_s26 = sadd.s32 1, %s1390_s22  ;;  %p1133_p5 = scmp.ge.s32.totalorder %s1402_s2, 9 }
   0x6   : > { %s1587_s3 = smov (%p30_p0, %s29_s3), 0  ;;  %p54_p3 = por %p53_p2, %p52_p1 }
   0x7   : > { %s41_s25 = ssub.s32 %s1398_s24, %s1587_s3  ;;  %242 = sbr.rel (%p1133_p5) target bundleno = 28 (0x1c), region = 16 }
   0x8   : > { %p43_p4 = scmp.eq.s32.totalorder %s41_s25, 0 }
   0xa   : > { %s1475_s27 = scalar_select %p43_p4, %s1390_s22, %s45_s26  }
   0xe   : > { %245 = sbr.rel (!%p54_p3) target bundleno = 28 (0x1c), region = 20  ;;  %s247_s28 = sand.u32 (%p54_p3), 1, %s1390_s22  }
   0xf   : > { %s1135_s29 = sshll.u32 (%p54_p3), %s1398_s24, 2  ;;  %s1134_s30 = sshll.u32 (%p54_p3), %s247_s28, 6 }
  0x10   : > { %s1483_s9 = scalar_lea.vmem (%p54_p3), %s1575_s0, %s1135_s29  ;;  %s249_s10 = scalar_lea.vmem (%p54_p3), [#allocation3], %s1134_s30 }
  0x11   : > { %v270_v0 = vld [vmem:[%s1483_s9] sm:$0xf] (%p54_p3)  ;;  %v272_v1 = vld [vmem:[%s1483_s9 + $0x24] sm:$0xf] (%p54_p3)  ;;  %v274_v2 = vld [vmem:[%s1483_s9 + $0x48] sm:$0xf] (%p54_p3) }
  0x12   : > { %271 = vst [vmem:[%s249_s10] sm:$0xf] (%p54_p3), %v270_v0  ;;  %273 = vst [vmem:[%s249_s10 + $0x4] sm:$0xf] (%p54_p3), %v272_v1  ;;  %v276_v3 = vld [vmem:[%s1483_s9 + $0x6c] sm:$0xf] (%p54_p3) }
  0x13   : > { %v278_v4 = vld [vmem:[%s1483_s9 + $0x90] sm:$0xf] (%p54_p3)  ;;  %275 = vst [vmem:[%s249_s10 + $0x8] sm:$0xf] (%p54_p3), %v274_v2  ;;  %277 = vst [vmem:[%s249_s10 + $0xc] sm:$0xf] (%p54_p3), %v276_v3 }
  0x14   : > { %279 = vst [vmem:[%s249_s10 + $0x10] sm:$0xf] (%p54_p3), %v278_v4  ;;  %v280_v5 = vld [vmem:[%s1483_s9 + $0xb4] sm:$0xf] (%p54_p3)  ;;  %v282_v6 = vld [vmem:[%s1483_s9 + $0xd8] sm:$0xf] (%p54_p3) }
  0x15   : > { %v284_v7 = vld [vmem:[%s1483_s9 + $0xfc] sm:$0xf]  ;;  %281 = vst [vmem:[%s249_s10 + $0x14] sm:$0xf] %v280_v5  ;;  %283 = vst [vmem:[%s249_s10 + $0x18] sm:$0xf] %v282_v6 }
  0x16   : > { %285 = vst [vmem:[%s249_s10 + $0x1c] sm:$0xf] %v284_v7  ;;  %v286_v8 = vld [vmem:[%s1483_s9 + $0x120] sm:$0xf]  ;;  %v288_v9 = vld [vmem:[%s1483_s9 + $0x144] sm:$0xf] }
  0x17   : > { %v290_v10 = vld [vmem:[%s1483_s9 + $0x168] sm:$0xf]  ;;  %287 = vst [vmem:[%s249_s10 + $0x20] sm:$0xf] %v286_v8  ;;  %289 = vst [vmem:[%s249_s10 + $0x24] sm:$0xf] %v288_v9 }
  0x18   : > { %291 = vst [vmem:[%s249_s10 + $0x28] sm:$0xf] %v290_v10  ;;  %v292_v11 = vld [vmem:[%s1483_s9 + $0x18c] sm:$0xf]  ;;  %v294_v12 = vld [vmem:[%s1483_s9 + $0x1b0] sm:$0xf] }
  0x19   : > { %v296_v13 = vld [vmem:[%s1483_s9 + $0x1d4] sm:$0xf]  ;;  %293 = vst [vmem:[%s249_s10 + $0x2c] sm:$0xf] %v292_v11  ;;  %295 = vst [vmem:[%s249_s10 + $0x30] sm:$0xf] %v294_v12 }
  0x1a   : > { %297 = vst [vmem:[%s249_s10 + $0x34] sm:$0xf] %v296_v13  ;;  %v298_v14 = vld [vmem:[%s1483_s9 + $0x1f8] sm:$0xf]  ;;  %v300_v15 = vld [vmem:[%s1483_s9 + $0x21c] sm:$0xf] }
  0x1b   : > { %299 = vst [vmem:[%s249_s10 + $0x38] sm:$0xf] %v298_v14  ;;  %301 = vst [vmem:[%s249_s10 + $0x3c] sm:$0xf] %v300_v15 }
  0x1c PF: > { %p1136_p6 = scmp.ge.s32.totalorder %s1402_s2, 1  ;;  %p379_p7 = scmp.lt.s32.totalorder %s1402_s2, 10 }
  0x1e   : > { %p380_p8 = pnand %p1136_p6, %p379_p7 }
  0x1f   : > { %s386_s11 = sand.u32 (!%p380_p8), 1, %s1386_s21   ;;  %s1138_s12 = sshll.u32 (!%p380_p8), %s1394_s23, 4 }
  0x20   : > { %383 = sbr.rel (%p380_p8) target bundleno = 353 (0x161), region = 73  ;;  %s1137_s13 = sshll.u32 (!%p380_p8), %s386_s11, 6 }
  0x21   : > { %p448_p9 = scmp.lt.s32.totalorder (!%p380_p8), %s1138_s12, 143  ;;  %s1510_s18 = scalar_lea.vmem (!%p380_p8), [#allocation3], %s1137_s13 }
  0x22   : > { %p1140_p10 = scmp.ne.s32.totalorder (!%p380_p8), %s1394_s23, 0 }
  0x27   : > { %s1589_s12 = smov (!%p448_p9, %s1138_s12), 143  ;;  %489 = sbr.rel (%p1140_p10) target bundleno = 49 (0x31), region = 81 }
  0x28   : > { %s1139_s14 = sshll.u32 %s1589_s12, 2  ;;  %v1404_v16 = vmov (!%p1140_p10), 0.0  }
  0x29   : > { %s1508_s17 = scalar_lea.vmem %s1576_s1, %s1139_s14  ;;  %490 = vst [vmem:[#allocation2] sm:$0xff] (!%p1140_p10), %v1404_v16  ;;  %491 = vst [vmem:[#allocation2 + $0x8] sm:$0xff] (!%p1140_p10), %v1404_v16 }
  0x2a   : > { %492 = vst [vmem:[#allocation2 + $0x10] sm:$0xff] (!%p1140_p10), %v1404_v16  ;;  %493 = vst [vmem:[#allocation2 + $0x18] sm:$0xff] (!%p1140_p10), %v1404_v16 }
  0x2b   : > { %494 = vst [vmem:[#allocation2 + $0x20] sm:$0xff] (!%p1140_p10), %v1404_v16  ;;  %495 = vst [vmem:[#allocation2 + $0x28] sm:$0xff] (!%p1140_p10), %v1404_v16 }
  0x2c   : > { %496 = vst [vmem:[#allocation2 + $0x30] sm:$0xff] (!%p1140_p10), %v1404_v16  ;;  %497 = vst [vmem:[#allocation2 + $0x38] sm:$0xff] (!%p1140_p10), %v1404_v16 }
  0x2d   : > { %498 = vst [vmem:[#allocation2 + $0x40] sm:$0xff] (!%p1140_p10), %v1404_v16  ;;  %499 = vst [vmem:[#allocation2 + $0x48] sm:$0xff] (!%p1140_p10), %v1404_v16 }
  0x2e   : > { %500 = vst [vmem:[#allocation2 + $0x50] sm:$0xff] %v1404_v16  ;;  %501 = vst [vmem:[#allocation2 + $0x58] sm:$0xff] %v1404_v16 }
  0x2f   : > { %502 = vst [vmem:[#allocation2 + $0x60] sm:$0xff] %v1404_v16  ;;  %503 = vst [vmem:[#allocation2 + $0x68] sm:$0xff] %v1404_v16 }
  0x30   : > { %504 = vst [vmem:[#allocation2 + $0x70] sm:$0xff] %v1404_v16  ;;  %505 = vst [vmem:[#allocation2 + $0x78] sm:$0xff] %v1404_v16 }
  0x31 PF: > { %v1348_v17 = vld [vmem:[%s1508_s17] sm:$0xff]   ;;  %v1349_v18 = vld [vmem:[%s1508_s17 + $0x8] sm:$0xff]   ;;  %v1350_v19 = vld [vmem:[%s1508_s17 + $0x10] sm:$0xff]   ;;  %p1157_p11 = scmp.ne.s32.totalorder %s1394_s23, 8 }
  0x32   : > { %1259 = vmatprep.subr.bf16.mxu0 %v1348_v17  ;;  %1291 = vmatprep.subr.bf16.mxu1 %v1348_v17  ;;  %v1351_v20 = vld [vmem:[%s1508_s17 + $0x18] sm:$0xff]   ;;  %v1356_v21 = vld [vmem:[%s1510_s18] sm:$0xff]   ;;  %v1353_v24 = vld [vmem:[%s1508_s17 + $0x28] sm:$0xff]  }
  0x33   : > { %1260 = vmatpush3.bf16.msra.mxu0 %v1348_v17  ;;  %1299 = vmatpush3.bf16.msra.mxu1 %v1348_v17  ;;  %v1357_v22 = vld [vmem:[%s1510_s18 + $0x20] sm:$0xff]   ;;  %v1354_v25 = vld [vmem:[%s1508_s17 + $0x30] sm:$0xff]   ;;  %v1355_v26 = vld [vmem:[%s1508_s17 + $0x38] sm:$0xff]  }
  0x34   : > { %1261 = vmatprep.subr.bf16.mxu0 %v1349_v18  ;;  %1292 = vmatprep.subr.bf16.mxu1 %v1349_v18  ;;  %v1352_v23 = vld [vmem:[%s1508_s17 + $0x20] sm:$0xff]   ;;  %v1358_v27 = vld [vmem:[%s1510_s18 + $0x8] sm:$0xff]   ;;  %v1360_v29 = vld [vmem:[%s1510_s18 + $0x10] sm:$0xff]  }
  0x35   : > { %1275 = vmatprep.mubr.bf16.mxu0 %v1356_v21  ;;  %1283 = vmatprep.mubr.bf16.mxu1 %v1357_v22  ;;  %v1359_v28 = vld [vmem:[%s1510_s18 + $0x28] sm:$0xff]   ;;  %v1361_v30 = vld [vmem:[%s1510_s18 + $0x30] sm:$0xff]   ;;  %v1362_v31 = vld [vmem:[%s1510_s18 + $0x18] sm:$0xff]  }
  0x36   : > { %v1363_v32 = vld [vmem:[%s1510_s18 + $0x38] sm:$0xff]   ;;  %v524_v33 = vld [vmem:[#allocation2 + $0x10] sm:$0xff]  ;;  %v522_v35 = vld [vmem:[#allocation2] sm:$0xff] }
  0x37   : > { %1262 = vmatpush3.bf16.msra.mxu0 %v1349_v18  ;;  %1300 = vmatpush3.bf16.msra.mxu1 %v1349_v18  ;;  %v532_v34 = vld [vmem:[#allocation2 + $0x50] sm:$0xff]  ;;  %v530_v36 = vld [vmem:[#allocation2 + $0x40] sm:$0xff]  ;;  %v525_v39 = vld [vmem:[#allocation2 + $0x18] sm:$0xff] }
  0x38   : > { %1263 = vmatprep.subr.bf16.mxu0 %v1350_v19  ;;  %1293 = vmatprep.subr.bf16.mxu1 %v1350_v19  ;;  %v533_v40 = vld [vmem:[#allocation2 + $0x58] sm:$0xff]  ;;  %v523_v45 = vld [vmem:[#allocation2 + $0x8] sm:$0xff]  ;;  %v528_v57 = vld [vmem:[#allocation2 + $0x30] sm:$0xff] }
  0x39   : > { %v531_v46 = vld [vmem:[#allocation2 + $0x48] sm:$0xff]  ;;  %v536_v58 = vld [vmem:[#allocation2 + $0x70] sm:$0xff]  ;;  %v526_v59 = vld [vmem:[#allocation2 + $0x20] sm:$0xff] }
  0x3a   : > { %v534_v60 = vld [vmem:[#allocation2 + $0x60] sm:$0xff]  ;;  %v529_v63 = vld [vmem:[#allocation2 + $0x38] sm:$0xff]  ;;  %v527_v5 = vld [vmem:[#allocation2 + $0x28] sm:$0xff] }
  0x3b   : > { %1264 = vmatpush3.bf16.msra.mxu0 %v1350_v19  ;;  %1301 = vmatpush3.bf16.msra.mxu1 %v1350_v19  ;;  %v537_v0 = vld [vmem:[#allocation2 + $0x78] sm:$0xff]  ;;  %v535_v6 = vld [vmem:[#allocation2 + $0x68] sm:$0xff] }
  0x3c   : > { %1265 = vmatprep.subr.bf16.mxu0 %v1351_v20  ;;  %1294 = vmatprep.subr.bf16.mxu1 %v1351_v20 }
  0x3f   : > { %1266 = vmatpush3.bf16.msra.mxu0 %v1351_v20  ;;  %1302 = vmatpush3.bf16.msra.mxu1 %v1351_v20 }
  0x40   : > { %1267 = vmatprep.subr.bf16.mxu0 %v1352_v23  ;;  %1295 = vmatprep.subr.bf16.mxu1 %v1352_v23 }
  0x43   : > { %1268 = vmatpush3.bf16.msra.mxu0 %v1352_v23  ;;  %1303 = vmatpush3.bf16.msra.mxu1 %v1352_v23 }
  0x44   : > { %1269 = vmatprep.subr.bf16.mxu0 %v1353_v24  ;;  %1296 = vmatprep.subr.bf16.mxu1 %v1353_v24 }
  0x47   : > { %1270 = vmatpush3.bf16.msra.mxu0 %v1353_v24  ;;  %1304 = vmatpush3.bf16.msra.mxu1 %v1353_v24 }
  0x48   : > { %1271 = vmatprep.subr.bf16.mxu0 %v1354_v25  ;;  %1297 = vmatprep.subr.bf16.mxu1 %v1354_v25 }
  0x4b   : > { %1272 = vmatpush3.bf16.msra.mxu0 %v1354_v25  ;;  %1305 = vmatpush3.bf16.msra.mxu1 %v1354_v25 }
  0x4c   : > { %1273 = vmatprep.subr.bf16.mxu0 %v1355_v26  ;;  %1298 = vmatprep.subr.bf16.mxu1 %v1355_v26 }
  0x4f   : > { %1274 = vmatpush3.bf16.msra.mxu0 %v1355_v26  ;;  %1306 = vmatpush3.bf16.msra.mxu1 %v1355_v26 }
  0x52   : > { %1276 = vmatmul.mubr.bf16.vlgmr.msra.gmra.mrb[0].mxu0 %v1358_v27  ;;  %1284 = vmatmul.mubr.bf16.vlgmr.msra.gmra.mrb[0].mxu1 %v1359_v28 }
  0x53   : > { %1279 = vmatprep.mubr.bf16.mxu0 %v1360_v29  ;;  %1287 = vmatprep.mubr.bf16.mxu1 %v1361_v30 }
  0x5a   : > { %1280 = vmatmul.mubr.bf16.gmra.mrb[4].mxu0 %v1362_v31  ;;  %1288 = vmatmul.mubr.bf16.gmra.mrb[4].mxu1 %v1363_v32 }
 0x125   : > { %v1277_v37 = vpop.f32.mrb[0].mxu0  ;;  %v1285_v38 = vpop.f32.mrb[0].mxu1 }
 0x126   : > { %v749_v41 = vadd.f32 %v1277_v37, %v524_v33  ;;  %v757_v42 = vadd.f32 %v1285_v38, %v532_v34  ;;  %v684_v43 = vpop.f32.mrb[1].mxu0  ;;  %v716_v44 = vpop.f32.mrb[1].mxu1 }
 0x127   : > { %v747_v47 = vadd.f32 %v684_v43, %v522_v35  ;;  %v755_v48 = vadd.f32 %v716_v44, %v530_v36  ;;  %v1278_v49 = vpop.f32.mrb[2].mxu0  ;;  %v1286_v50 = vpop.f32.mrb[2].mxu1 }
 0x128   : > { %765 = vst [vmem:[#allocation2 + $0x10] sm:$0xff] %v749_v41  ;;  %773 = vst [vmem:[#allocation2 + $0x50] sm:$0xff] %v757_v42  ;;  %v750_v51 = vadd.f32 %v1278_v49, %v525_v39  ;;  %v758_v52 = vadd.f32 %v1286_v50, %v533_v40  ;;  %v687_v53 = vpop.f32.mrb[3].mxu0  ;;  %v719_v54 = vpop.f32.mrb[3].mxu1 }
 0x129   : > { %763 = vst [vmem:[#allocation2] sm:$0xff] %v747_v47  ;;  %771 = vst [vmem:[#allocation2 + $0x40] sm:$0xff] %v755_v48  ;;  %v748_v55 = vadd.f32 %v687_v53, %v523_v45  ;;  %v756_v56 = vadd.f32 %v719_v54, %v531_v46 }
 0x12a   : > { %766 = vst [vmem:[#allocation2 + $0x18] sm:$0xff] %v750_v51  ;;  %774 = vst [vmem:[#allocation2 + $0x58] sm:$0xff] %v758_v52 }
 0x12b   : > { %764 = vst [vmem:[#allocation2 + $0x8] sm:$0xff] %v748_v55  ;;  %772 = vst [vmem:[#allocation2 + $0x48] sm:$0xff] %v756_v56 }
 0x12d   : > { %v1281_v61 = vpop.f32.mrb[4].mxu0  ;;  %v1289_v62 = vpop.f32.mrb[4].mxu1  ;;  %782 = sbr.rel (%p1157_p11) target bundleno = 353 (0x161), region = 85 }
 0x12e   : > { %v753_v1 = vadd.f32 %v1281_v61, %v528_v57  ;;  %v761_v2 = vadd.f32 %v1289_v62, %v536_v58  ;;  %v700_v3 = vpop.f32.mrb[5].mxu0  ;;  %v732_v4 = vpop.f32.mrb[5].mxu1 }
 0x12f   : > { %v751_v7 = vadd.f32 %v700_v3, %v526_v59  ;;  %v759_v8 = vadd.f32 %v732_v4, %v534_v60  ;;  %v1282_v9 = vpop.f32.mrb[6].mxu0  ;;  %v1290_v10 = vpop.f32.mrb[6].mxu1  ;;  %v785_v19 = vld [vmem:[#allocation2 + $0x10] sm:$0xff] (!%p1157_p11) }
 0x130   : > { %769 = vst [vmem:[#allocation2 + $0x30] sm:$0xff] %v753_v1  ;;  %777 = vst [vmem:[#allocation2 + $0x70] sm:$0xff] %v761_v2  ;;  %v754_v11 = vadd.f32 %v1282_v9, %v529_v63  ;;  %v762_v12 = vadd.f32 %v1290_v10, %v537_v0  ;;  %v703_v13 = vpop.f32.mrb[7].mxu0  ;;  %v735_v14 = vpop.f32.mrb[7].mxu1  ;;  %v783_v17 = vld [vmem:[#allocation2] sm:$0xff] (!%p1157_p11)  ;;  %v902_v28 = vmul.f32 (!%p1157_p11), %v785_v19, %v785_v19  ;;  %v793_v39 = vld [vmem:[#allocation2 + $0x50] sm:$0xff] (!%p1157_p11) }
 0x131   : > { %767 = vst [vmem:[#allocation2 + $0x20] sm:$0xff] %v751_v7  ;;  %775 = vst [vmem:[#allocation2 + $0x60] sm:$0xff] %v759_v8  ;;  %v752_v15 = vadd.f32 %v703_v13, %v527_v5  ;;  %v760_v16 = vadd.f32 %v735_v14, %v535_v6  ;;  %v900_v22 = vmul.f32 (!%p1157_p11), %v783_v17, %v783_v17  ;;  %v786_v24 = vld [vmem:[#allocation2 + $0x18] sm:$0xff] (!%p1157_p11)  ;;  %v791_v35 = vld [vmem:[#allocation2 + $0x40] sm:$0xff] (!%p1157_p11) }
 0x132   : > { %770 = vst [vmem:[#allocation2 + $0x38] sm:$0xff] %v754_v11  ;;  %778 = vst [vmem:[#allocation2 + $0x78] sm:$0xff] %v762_v12  ;;  %v784_v18 = vld [vmem:[#allocation2 + $0x8] sm:$0xff] (!%p1157_p11)  ;;  %v1204_v27 = vpack.c.bf16 (!%p1157_p11), %v786_v24, %v785_v19  ;;  %v903_v33 = vmul.f32 (!%p1157_p11), %v786_v24, %v786_v24  ;;  %v794_v43 = vld [vmem:[#allocation2 + $0x58] sm:$0xff] (!%p1157_p11)  ;;  %v908_v62 = vmul.f32 (!%p1157_p11), %v791_v35, %v791_v35 }
 0x133   : > { %768 = vst [vmem:[#allocation2 + $0x28] sm:$0xff] %v752_v15  ;;  %776 = vst [vmem:[#allocation2 + $0x68] sm:$0xff] %v760_v16  ;;  %v1199_v20 = vpack.c.bf16 (!%p1157_p11), %v784_v18, %v783_v17  ;;  %v879_v21 = vadd.f32 (!%p1157_p11), %v784_v18, %v783_v17  ;;  %v901_v23 = vmul.f32 (!%p1157_p11), %v784_v18, %v784_v18  ;;  %v792_v36 = vld [vmem:[#allocation2 + $0x48] sm:$0xff] (!%p1157_p11) }
 0x134   : > { %1236 = vst [vmem:[%s1579_s4 + $0x8] sm:$0xff] %v1204_v27   ;;  %v1219_v38 = vpack.c.bf16 %v792_v36, %v791_v35  ;;  %v1224_v46 = vpack.c.bf16 %v794_v43, %v793_v39  ;;  %v909_v1 = vmul.f32 %v792_v36, %v792_v36  ;;  %v910_v4 = vmul.f32 %v793_v39, %v793_v39 }
 0x135   : > { %1200 = vst [vmem:[%s1579_s4] sm:$0xff] %v1199_v20   ;;  %v916_v31 = vadd.f32 %v901_v23, %v900_v22  ;;  %v880_v32 = vadd.f32 %v879_v21, %v785_v19  ;;  %v911_v7 = vmul.f32 %v794_v43, %v794_v43 }
 0x136   : > { %1239 = vst [vmem:[%s1579_s4 + $0x20] sm:$0xff] %v1219_v38   ;;  %1240 = vst [vmem:[%s1579_s4 + $0x28] sm:$0xff] %v1224_v46  }
 0x137   : > { %v789_v30 = vld [vmem:[#allocation2 + $0x30] sm:$0xff]  ;;  %v881_v40 = vadd.f32 %v880_v32, %v786_v24  ;;  %v917_v41 = vadd.f32 %v916_v31, %v902_v28 }
 0x138   : > { %v787_v25 = vld [vmem:[#allocation2 + $0x20] sm:$0xff]  ;;  %v797_v51 = vld [vmem:[#allocation2 + $0x70] sm:$0xff]  ;;  %v906_v56 = vmul.f32 %v789_v30, %v789_v30 }
 0x139   : > { %v790_v34 = vld [vmem:[#allocation2 + $0x38] sm:$0xff]  ;;  %v904_v42 = vmul.f32 %v787_v25, %v787_v25  ;;  %v795_v44 = vld [vmem:[#allocation2 + $0x60] sm:$0xff]  ;;  %v918_v48 = vadd.f32 %v917_v41, %v903_v33  ;;  %v882_v49 = vadd.f32 %v881_v40, %v787_v25  ;;  %v914_v16 = vmul.f32 %v797_v51, %v797_v51 }
 0x13a   : > { %v788_v26 = vld [vmem:[#allocation2 + $0x28] sm:$0xff]  ;;  %v1214_v37 = vpack.c.bf16 %v790_v34, %v789_v30  ;;  %v798_v52 = vld [vmem:[#allocation2 + $0x78] sm:$0xff]  ;;  %v907_v59 = vmul.f32 %v790_v34, %v790_v34  ;;  %v912_v10 = vmul.f32 %v795_v44, %v795_v44 }
 0x13b   : > { %v1209_v29 = vpack.c.bf16 %v788_v26, %v787_v25  ;;  %v796_v45 = vld [vmem:[#allocation2 + $0x68] sm:$0xff]  ;;  %v905_v50 = vmul.f32 %v788_v26, %v788_v26  ;;  %v1234_v53 = vpack.c.bf16 %v798_v52, %v797_v51  ;;  %v883_v54 = vadd.f32 %v882_v49, %v788_v26 }
 0x13c   : > { %1238 = vst [vmem:[%s1579_s4 + $0x18] sm:$0xff] %v1214_v37   ;;  %v1229_v47 = vpack.c.bf16 %v796_v45, %v795_v44  ;;  %v919_v55 = vadd.f32 %v918_v48, %v904_v42  ;;  %v913_v13 = vmul.f32 %v796_v45, %v796_v45  ;;  %v915_v19 = vmul.f32 %v798_v52, %v798_v52 }
 0x13d   : > { %1237 = vst [vmem:[%s1579_s4 + $0x10] sm:$0xff] %v1209_v29   ;;  %1242 = vst [vmem:[%s1579_s4 + $0x38] sm:$0xff] %v1234_v53   ;;  %v884_v58 = vadd.f32 %v883_v54, %v789_v30 }
 0x13e   : > { %1241 = vst [vmem:[%s1579_s4 + $0x30] sm:$0xff] %v1229_v47   ;;  %v920_v57 = vadd.f32 %v919_v55, %v905_v50 }
 0x13f   : > { %v885_v60 = vadd.f32 %v884_v58, %v790_v34 }
 0x140   : > { %v921_v61 = vadd.f32 %v920_v57, %v906_v56 }
 0x141   : > { %v886_v0 = vadd.f32 %v885_v60, %v791_v35 }
 0x142   : > { %v922_v63 = vadd.f32 %v921_v61, %v907_v59 }
 0x143   : > { %v887_v2 = vadd.f32 %v886_v0, %v792_v36 }
 0x144   : > { %v923_v3 = vadd.f32 %v922_v63, %v908_v62 }
 0x145   : > { %v888_v6 = vadd.f32 %v887_v2, %v793_v39 }
 0x146   : > { %v924_v5 = vadd.f32 %v923_v3, %v909_v1 }
 0x147   : > { %v889_v8 = vadd.f32 %v888_v6, %v794_v43 }
 0x148   : > { %v925_v9 = vadd.f32 %v924_v5, %v910_v4 }
 0x149   : > { %v890_v12 = vadd.f32 %v889_v8, %v795_v44 }
 0x14a   : > { %v926_v11 = vadd.f32 %v925_v9, %v911_v7 }
 0x14b   : > { %v891_v14 = vadd.f32 %v890_v12, %v796_v45 }
 0x14c   : > { %v927_v15 = vadd.f32 %v926_v11, %v912_v10 }
 0x14d   : > { %v892_v18 = vadd.f32 %v891_v14, %v797_v51 }
 0x14e   : > { %v928_v17 = vadd.f32 %v927_v15, %v913_v13 }
 0x14f   : > { %v893_v20 = vadd.f32 %v892_v18, %v798_v52 }
 0x150   : > { %v929_v21 = vadd.f32 %v928_v17, %v914_v16 }
 0x151   : > { %v894_v22 = vrot.slane %v893_v20, 4 }
 0x152   : > { %v930_v23 = vadd.f32 %v929_v21, %v915_v19 }
 0x153   : > { %v895_v24 = vadd.f32 %v894_v22, %v893_v20 }
 0x154   : > { %v931_v25 = vrot.slane %v930_v23, 4 }
 0x155   : > { %v896_v26 = vrot.slane %v895_v24, 2 }
 0x156   : > { %v932_v27 = vadd.f32 %v931_v25, %v930_v23 }
 0x157   : > { %v897_v28 = vadd.f32 %v896_v26, %v895_v24 }
 0x158   : > { %v933_v29 = vrot.slane %v932_v27, 2 }
 0x159   : > { %v898_v30 = vrot.slane %v897_v28, 1 }
 0x15a   : > { %v934_v31 = vadd.f32 %v933_v29, %v932_v27 }
 0x15b   : > { %v899_v32 = vadd.f32 %v898_v30, %v897_v28 }
 0x15c   : > { %v935_v33 = vrot.slane %v934_v31, 1 }
 0x15d   : > { %937 = vst [vmem:[%s1580_s5] sm:$0xff] %v899_v32 }
 0x15e   : > { %v936_v34 = vadd.f32 %v935_v33, %v934_v31 }
 0x160   : > { %938 = vst [vmem:[%s1581_s6] sm:$0xff] %v936_v34 }
 0x161 PF: > { %s17_s2 = sadd.s32 1, %s1402_s2   ;;  %s1582_s21 = smov %s1390_s22 }
 0x162   : > { %p14_p12 = scmp.ge.s32.totalorder %s17_s2, 11   ;;  %s1583_s22 = smov %s1475_s27 }
 0x163   : > { %s1584_s23 = smov %s1398_s24  ;;  %s1585_s24 = smov %s1587_s3 }
 0x164   :  { %16 = sbr.rel (!%p14_p12) target bundleno = 3 (0x3), region = 153 }

</bundles_post_ra>
